<compile_context>
chip_gen: v7x
topology: tpu7x:2x2x1
jax: 0.10.0
libtpu: 0.0.40
codegen_flags: <defaults>
</compile_context>

<pallas_src>
import jax
import jax.numpy as jnp
from jax import lax
from jax.experimental import pallas as pl
from jax.experimental.pallas import tpu as pltpu

CIN = 103          # conv in channels (module spec)
CIN_PAD = 128      # lane-aligned K
COUT = 200         # conv out channels (module spec)
COUT_PAD = 256     # lane-aligned N
KH = KW = 3
W_IN = 16          # Linear(16, 9) in-features == spatial W
J_OUT = 9          # Linear out-features


def fused_conv_linear_kernel(x_ref, wc_ref, w2_ref, b_ref, o_ref):
    """One batch element: conv3x3(pad=1, no bias) fused with Linear(W -> 9).

    x_ref : (1, H+2, W+2, C)   bf16  spatially + channel zero-padded NHWC input
    wc_ref: (3, 3*C, Coutp)    bf16  conv weights, index [kh, kw*C + ci, co]
    w2_ref: (J, W)             bf16  fc2 weight (PyTorch (out, in) layout)
    b_ref : (J, Coutp)         f32   fc2 bias broadcast along the Coutp lanes
    o_ref : (1, H, J, Coutp)   f32   out[h, j, co] = sum_w fc2_w[j,w]*conv[h,w,co] + b[j]
    """
    H = o_ref.shape[1]
    J = o_ref.shape[2]
    W = w2_ref.shape[1]
    Hp2 = x_ref.shape[1]

    x = x_ref[0]                                                   # (H+2, W+2, C)
    # kw-shifted slabs concatenated along channels, built once per grid step:
    #   xcat[p, w, kw*C + ci] = x[p, w + kw, ci]
    xcat = jnp.concatenate(
        [x[:, 0:W, :], x[:, 1:W + 1, :], x[:, 2:W + 2, :]], axis=-1
    )                                                              # (H+2, W, 3C)

    # fc2 contraction over W applied first (valid: the chain is linear and
    # modelx is identity).  z[p, j, k] = sum_w w2[j, w] * xcat[p, w, k]
    # Explicit broadcast so the einsum lowers as a batched (over p) dot_general.
    w2_b = jnp.broadcast_to(w2_ref[...][None], (Hp2, J, W))        # (H+2, J, W)
    z = jnp.einsum('pjw,pwk->pjk', w2_b, xcat,
                   preferred_element_type=jnp.float32)             # (H+2, J, 3C) f32
    z = z.astype(wc_ref.dtype)                                     # bf16 for the MXU

    # 3x3 conv channel contraction: 3 kh taps (leading-dim slices -> no sublane
    # relayout), functional accumulation in f32.
    wc = wc_ref[...]                                               # (3, 3C, Coutp)

    def tap(kh):
        return lax.dot_general(
            z[kh:kh + H], wc[kh],
            dimension_numbers=(((2,), (0,)), ((), ())),
            preferred_element_type=jnp.float32,
        )                                                          # (H, J, Coutp) f32

    acc = tap(0) + tap(1) + tap(2) + b_ref[...]
    # Single lane-dense (last dim = 256) unmasked store.
    o_ref[...] = acc[None].astype(o_ref.dtype)


def prepare_params(fc1_w, fc2_w, fc2_b):
    """PyTorch-layout params -> kernel-ready padded/packed params (done once)."""
    cout, cin, kh, kw = fc1_w.shape
    w_hwio = jnp.transpose(fc1_w, (2, 3, 1, 0))                    # (3, 3, Cin, Cout)
    w_hwio = jnp.pad(
        w_hwio, ((0, 0), (0, 0), (0, CIN_PAD - cin), (0, COUT_PAD - cout)))
    wc = w_hwio.reshape(kh, kw * CIN_PAD, COUT_PAD).astype(jnp.bfloat16)
    w2 = fc2_w.astype(jnp.bfloat16)                                # (9, 16)
    b2 = jnp.broadcast_to(
        fc2_b.astype(jnp.float32)[:, None], (fc2_b.shape[0], COUT_PAD))
    return {"wc": wc, "w2": w2, "b2": jnp.asarray(b2)}


def finetune_forward(x, params):
    """x: (B, 103, H, 16) f32 NCHW -> (B, 200, H, 9) f32 (eval mode)."""
    B, cin, H, W = x.shape
    assert cin == CIN and W == W_IN, (cin, W)

    # Layout prep (single small fused XLA op): NCHW -> NHWC, pad spatial by 1 and
    # channels 103 -> 128 with zeros, cast to bf16 for the MXU.
    xp = jnp.pad(
        jnp.transpose(x, (0, 2, 3, 1)),
        ((0, 0), (1, 1), (1, 1), (0, CIN_PAD - cin)),
    ).astype(jnp.bfloat16)                                         # (B, H+2, W+2, 128)

    out = pl.pallas_call(
        fused_conv_linear_kernel,
        out_shape=jax.ShapeDtypeStruct((B, H, J_OUT, COUT_PAD), jnp.float32),
        grid_spec=pltpu.PrefetchScalarGridSpec(
            num_scalar_prefetch=0,
            grid=(B,),
            in_specs=[
                pl.BlockSpec((1, H + 2, W + 2, CIN_PAD), lambda b: (b, 0, 0, 0)),
                # Constant block indices -> weights DMA'd once, reused every step.
                pl.BlockSpec((KH, KW * CIN_PAD, COUT_PAD), lambda b: (0, 0, 0)),
                pl.BlockSpec((J_OUT, W_IN), lambda b: (0, 0)),
                pl.BlockSpec((J_OUT, COUT_PAD), lambda b: (0, 0)),
            ],
            out_specs=pl.BlockSpec((1, H, J_OUT, COUT_PAD), lambda b: (b, 0, 0, 0)),
        ),
        compiler_params=pltpu.CompilerParams(
            dimension_semantics=("parallel",)),
    )(xp, params["wc"], params["w2"], params["b2"])

    # (B, H, 9, 256) -> drop Cout padding and permute to PyTorch (B, 200, H, 9).
    return jnp.transpose(out[..., :COUT], (0, 3, 1, 2))


if __name__ == "__main__":
    key = jax.random.PRNGKey(0)
    kx, k1, k2, k3 = jax.random.split(key, 4)
    B, H = 2, 16
    x = jax.random.normal(kx, (B, CIN, H, W_IN), jnp.float32)
    fc1_w = jax.random.normal(k1, (COUT, CIN, 3, 3), jnp.float32) * 0.05
    fc2_w = jax.random.normal(k2, (J_OUT, W_IN), jnp.float32) * 0.1
    fc2_b = jax.random.normal(k3, (J_OUT,), jnp.float32) * 0.1

    params = prepare_params(fc1_w, fc2_w, fc2_b)
    fwd = jax.jit(finetune_forward)
    out = jax.block_until_ready(fwd(x, params))
    assert out.shape == (B, COUT, H, J_OUT), out.shape

    # Pure-JAX f32 reference (conv -> linear); dropout is eval-mode identity.
    ref_conv = lax.conv_general_dilated(
        x, fc1_w, window_strides=(1, 1), padding="SAME",
        dimension_numbers=("NCHW", "OIHW", "NCHW"))
    ref = jnp.einsum("bchw,jw->bchj", ref_conv, fc2_w) + fc2_b
    max_err = float(jnp.max(jnp.abs(out - ref)))
    assert jnp.allclose(out, ref, atol=5e-2, rtol=5e-2), max_err
    print("KERNEL_OK")
</pallas_src>

<mosaic_0001>
module attributes {stable_mosaic.version = 11 : i64} {
  func.func @fused_conv_linear_kernel(%arg0: i32, %arg1: memref<1x18x18x128xbf16, #tpu.memory_space<vmem>>, %arg2: memref<3x384x256xbf16, #tpu.memory_space<vmem>>, %arg3: memref<9x16xbf16, #tpu.memory_space<vmem>>, %arg4: memref<9x256xf32, #tpu.memory_space<vmem>>, %arg5: memref<1x16x9x256xf32, #tpu.memory_space<vmem>>) attributes {dimension_semantics = [#tpu.dimension_semantics<parallel>], iteration_bounds = array<i64: 2>, scalar_prefetch = 0 : i64, scratch_operands = 0 : i64, tpu.core_type = #tpu.core_type<tc>, window_params = [{transform_indices = @transform_0, window_bounds = array<i64: 1, 18, 18, 128>}, {pipeline_mode = #tpu.pipeline_mode<synchronous>, transform_indices = @transform_1, window_bounds = array<i64: 3, 384, 256>}, {pipeline_mode = #tpu.pipeline_mode<synchronous>, transform_indices = @transform_2, window_bounds = array<i64: 9, 16>}, {pipeline_mode = #tpu.pipeline_mode<synchronous>, transform_indices = @transform_3, window_bounds = array<i64: 9, 256>}, {transform_indices = @transform_4, window_bounds = array<i64: 1, 16, 9, 256>}]} {
    %c0 = arith.constant 0 : index
    %c0_0 = arith.constant 0 : index
    %c0_1 = arith.constant 0 : index
    %c0_2 = arith.constant 0 : index
    %0 = vector.load %arg1[%c0, %c0_0, %c0_1, %c0_2] : memref<1x18x18x128xbf16, #tpu.memory_space<vmem>>, vector<1x18x18x128xbf16>
    %1 = vector.shape_cast %0 : vector<1x18x18x128xbf16> to vector<18x18x128xbf16>
    %2 = vector.extract_strided_slice %1 {offsets = [0, 0, 0], sizes = [18, 16, 128], strides = [1, 1, 1]} : vector<18x18x128xbf16> to vector<18x16x128xbf16>
    %3 = vector.extract_strided_slice %1 {offsets = [0, 1, 0], sizes = [18, 16, 128], strides = [1, 1, 1]} : vector<18x18x128xbf16> to vector<18x16x128xbf16>
    %4 = vector.extract_strided_slice %1 {offsets = [0, 2, 0], sizes = [18, 16, 128], strides = [1, 1, 1]} : vector<18x18x128xbf16> to vector<18x16x128xbf16>
    %5 = tpu.concatenate %2, %3, %4 in 2 : vector<18x16x128xbf16>, vector<18x16x128xbf16>, vector<18x16x128xbf16> -> vector<18x16x384xbf16>
    %c0_3 = arith.constant 0 : index
    %c0_4 = arith.constant 0 : index
    %6 = vector.load %arg3[%c0_3, %c0_4] : memref<9x16xbf16, #tpu.memory_space<vmem>>, vector<9x16xbf16>
    %7 = vector.shape_cast %6 : vector<9x16xbf16> to vector<1x9x16xbf16>
    %8 = vector.shape_cast %7 : vector<1x9x16xbf16> to vector<1x9x16xbf16>
    %9 = vector.broadcast %8 : vector<1x9x16xbf16> to vector<18x9x16xbf16>
    "tpu.trace_start"() <{level = 10 : i32, message = "pjw,pwk->pjk"}> : () -> ()
    %cst = arith.constant dense<0.000000e+00> : vector<18x9x384xf32>
    %10 = tpu.matmul %9, %5, %cst {dimension_numbers = #tpu.dot_dimension_numbers<[2], [1], [1], [2], [0, 0, 0, 1, 1, 2], [0], [0]>} : vector<18x9x16xbf16>, vector<18x16x384xbf16>, vector<18x9x384xf32> -> vector<18x9x384xf32>
    "tpu.trace_stop"() : () -> ()
    %11 = arith.truncf %10 : vector<18x9x384xf32> to vector<18x9x384xbf16>
    %c0_5 = arith.constant 0 : index
    %c0_6 = arith.constant 0 : index
    %c0_7 = arith.constant 0 : index
    %12 = vector.load %arg2[%c0_5, %c0_6, %c0_7] : memref<3x384x256xbf16, #tpu.memory_space<vmem>>, vector<3x384x256xbf16>
    %13 = vector.extract_strided_slice %11 {offsets = [0, 0, 0], sizes = [16, 9, 384], strides = [1, 1, 1]} : vector<18x9x384xbf16> to vector<16x9x384xbf16>
    %14 = vector.extract_strided_slice %12 {offsets = [0, 0, 0], sizes = [1, 384, 256], strides = [1, 1, 1]} : vector<3x384x256xbf16> to vector<1x384x256xbf16>
    %15 = vector.shape_cast %14 : vector<1x384x256xbf16> to vector<384x256xbf16>
    %cst_8 = arith.constant dense<0.000000e+00> : vector<16x9x256xf32>
    %16 = tpu.matmul %13, %15, %cst_8 {dimension_numbers = #tpu.dot_dimension_numbers<[2], [0], [0, 1], [1], [0, 0, 0, 1, 1, 1], [], []>} : vector<16x9x384xbf16>, vector<384x256xbf16>, vector<16x9x256xf32> -> vector<16x9x256xf32>
    %17 = vector.extract_strided_slice %11 {offsets = [1, 0, 0], sizes = [16, 9, 384], strides = [1, 1, 1]} : vector<18x9x384xbf16> to vector<16x9x384xbf16>
    %18 = vector.extract_strided_slice %12 {offsets = [1, 0, 0], sizes = [1, 384, 256], strides = [1, 1, 1]} : vector<3x384x256xbf16> to vector<1x384x256xbf16>
    %19 = vector.shape_cast %18 : vector<1x384x256xbf16> to vector<384x256xbf16>
    %cst_9 = arith.constant dense<0.000000e+00> : vector<16x9x256xf32>
    %20 = tpu.matmul %17, %19, %cst_9 {dimension_numbers = #tpu.dot_dimension_numbers<[2], [0], [0, 1], [1], [0, 0, 0, 1, 1, 1], [], []>} : vector<16x9x384xbf16>, vector<384x256xbf16>, vector<16x9x256xf32> -> vector<16x9x256xf32>
    %21 = arith.addf %16, %20 : vector<16x9x256xf32>
    %22 = vector.extract_strided_slice %11 {offsets = [2, 0, 0], sizes = [16, 9, 384], strides = [1, 1, 1]} : vector<18x9x384xbf16> to vector<16x9x384xbf16>
    %23 = vector.extract_strided_slice %12 {offsets = [2, 0, 0], sizes = [1, 384, 256], strides = [1, 1, 1]} : vector<3x384x256xbf16> to vector<1x384x256xbf16>
    %24 = vector.shape_cast %23 : vector<1x384x256xbf16> to vector<384x256xbf16>
    %cst_10 = arith.constant dense<0.000000e+00> : vector<16x9x256xf32>
    %25 = tpu.matmul %22, %24, %cst_10 {dimension_numbers = #tpu.dot_dimension_numbers<[2], [0], [0, 1], [1], [0, 0, 0, 1, 1, 1], [], []>} : vector<16x9x384xbf16>, vector<384x256xbf16>, vector<16x9x256xf32> -> vector<16x9x256xf32>
    %26 = arith.addf %21, %25 : vector<16x9x256xf32>
    %c0_11 = arith.constant 0 : index
    %c0_12 = arith.constant 0 : index
    %27 = vector.load %arg4[%c0_11, %c0_12] : memref<9x256xf32, #tpu.memory_space<vmem>>, vector<9x256xf32>
    %28 = vector.shape_cast %27 : vector<9x256xf32> to vector<1x9x256xf32>
    %29 = vector.broadcast %28 : vector<1x9x256xf32> to vector<16x9x256xf32>
    %30 = arith.addf %26, %29 : vector<16x9x256xf32>
    %31 = vector.shape_cast %30 : vector<16x9x256xf32> to vector<1x16x9x256xf32>
    %c0_13 = arith.constant 0 : index
    %c0_14 = arith.constant 0 : index
    %c0_15 = arith.constant 0 : index
    %c0_16 = arith.constant 0 : index
    %32 = vector.load %arg5[%c0_13, %c0_14, %c0_15, %c0_16] : memref<1x16x9x256xf32, #tpu.memory_space<vmem>>, vector<1x16x9x256xf32>
    tpu.vector_store %arg5[%c0_13, %c0_14, %c0_15, %c0_16], %31 {strides = array<i32>} : memref<1x16x9x256xf32, #tpu.memory_space<vmem>>, vector<1x16x9x256xf32>,
    return
  }
  func.func @transform_0(%arg0: i32) -> (i32, i32, i32, i32) {
    %c0_i32 = arith.constant 0 : i32
    %c0_i32_0 = arith.constant 0 : i32
    %c0_i32_1 = arith.constant 0 : i32
    %c0_i32_2 = arith.constant 0 : i32
    return %arg0, %c0_i32, %c0_i32_0, %c0_i32_1 : i32, i32, i32, i32
  }
  func.func @transform_1(%arg0: i32) -> (i32, i32, i32) {
    %c0_i32 = arith.constant 0 : i32
    %c0_i32_0 = arith.constant 0 : i32
    %c0_i32_1 = arith.constant 0 : i32
    %c0_i32_2 = arith.constant 0 : i32
    return %c0_i32, %c0_i32_0, %c0_i32_1 : i32, i32, i32
  }
  func.func @transform_2(%arg0: i32) -> (i32, i32) {
    %c0_i32 = arith.constant 0 : i32
    %c0_i32_0 = arith.constant 0 : i32
    %c0_i32_1 = arith.constant 0 : i32
    return %c0_i32, %c0_i32_0 : i32, i32
  }
  func.func @transform_3(%arg0: i32) -> (i32, i32) {
    %c0_i32 = arith.constant 0 : i32
    %c0_i32_0 = arith.constant 0 : i32
    %c0_i32_1 = arith.constant 0 : i32
    return %c0_i32, %c0_i32_0 : i32, i32
  }
  func.func @transform_4(%arg0: i32) -> (i32, i32, i32, i32) {
    %c0_i32 = arith.constant 0 : i32
    %c0_i32_0 = arith.constant 0 : i32
    %c0_i32_1 = arith.constant 0 : i32
    %c0_i32_2 = arith.constant 0 : i32
    return %arg0, %c0_i32, %c0_i32_0, %c0_i32_1 : i32, i32, i32, i32
  }
}

</mosaic_0001>

<bundles_post_ra>
// kernel: finetune_forward.1
= control target key start
LH: loop header
LB: loop body
LE: loop exit
PB: predicated region body
PF: predicated region fallthrough
CT: control target
= control target key end

     0   :  { %s12523_s15 = smov 0   ;;  %s16452_s0 = inlined_call_operand.vmem [shape: bf16[2,18,18,128], index: 0, kind: input, shape index: {}]   ;;  %s16453_s1 = inlined_call_operand.vmem [shape: bf16[3,384,256], index: 1, kind: input, shape index: {}]   ;;  %s16454_s2 = inlined_call_operand.vmem [shape: bf16[9,16], index: 2, kind: input, shape index: {}]   ;;  %s16455_s3 = inlined_call_operand.vmem [shape: f32[9,256], index: 3, kind: input, shape index: {}]   ;;  %s16456_s4 = inlined_call_operand.vmem [shape: f32[2,16,9,256], index: 4, kind: output, shape index: {}]  }
   0x1 LB: > { %s11452_s16 = sadd.s32 4294967295, %s12492_s15   ;;  %p11456_p0 = scmp.ge.s32.totalorder %s12492_s15, 1  ;;  %s12492_s15 = sphi %s12523_s15, %s14_s15  }
   0x2   : > { %p162_p1 = scmp.lt.s32.totalorder %s12492_s15, 3 }
   0x4   : > { %p163_p2 = pnand %p11456_p0, %p162_p1 }
   0x6   : > { %166 = sbr.rel (%p163_p2) target bundleno = 1027 (0x403), region = 36 }
   0xd   : > { %p188_p3 = scmp.lt.s32.totalorder %s11452_s16, 1  ;;  %v12494_v0 = vmov 0.0   ;;  %vm12495_vm0 = vmmov 0   ;;  %v16457_v1 = vmov 0   ;;  %vm650_vm1 = vcmask 1046528  }
   0xe   : > { %11899 = vmatprep.subr.bf16.mxu1 %v12494_v0  ;;  %11901 = vmatprep.mubr.msk.bf16.mxu1 %vm12495_vm0, %v12494_v0  ;;  %vm415_vm2 = vsmask.f32 7424  ;;  %vm730_vm3 = vcmask 130048   ;;  %v12549_v9 = vld [vmem:[%s16454_s2] sm:$0x1f]  }
   0xf   : > { %s16962_s16 = smov (!%p188_p3, %s11452_s16), 1  ;;  %766 = vmatprep.mubr.bf16.mxu0 %v16457_v1 }
  0x10   : > { %s12183_s17 = smul.u32 216, %s16962_s16  ;;  %s11862_s23 = sshll.u32 %s16962_s16, 9 }
  0x11   : > { %s15294_s25 = scalar_lea.vmem %s16456_s4, %s11862_s23 }
  0x12   : > { %s12541_s20 = scalar_lea.vmem %s16452_s0, %s12183_s17 }
  0x13   : > { %v12196_v2 = vld [vmem:[%s12541_s20] sm:$0xff]   ;;  %v12197_v3 = vld [vmem:[%s12541_s20 + $0x8] ss:$0 sps:$4 sm:$0x11]   ;;  %v12199_v4 = vld [vmem:[%s12541_s20 + $0xc] sm:$0xff]  }
  0x14   : > { %v651_v5 = vrot.slane %v12196_v2, 1  ;;  %v652_v6 = vrot.slane %v12197_v3, 1  ;;  %v417_v7 = vshrl.u32 %v12196_v2, 16  ;;  %v419_v8 = vshll.u32 %v12196_v2, 16  ;;  %v12554_v21 = vld [vmem:[%s12541_s20 + $0x18] sm:$0xff]   ;;  %v12557_v22 = vld [vmem:[%s12541_s20 + $0x24] sm:$0xff]  }
  0x15   : > { %v424_v10 = vshll.u32 %v12197_v3, 16  ;;  %v12200_v11 = vld [vmem:[%s12541_s20 + $0x14] ss:$0 sps:$4 sm:$0x11]   ;;  %v429_v12 = vshrl.u32 %v12199_v4, 16  ;;  %v431_v13 = vshll.u32 %v12199_v4, 16 }
  0x16   : > { %v653_v14 = vsel %vm650_vm1, %v651_v5, %v652_v6  ;;  %v421_v15 = vrot.slane %v419_v8, 1  ;;  %v654_v16 = vrot.slane %v12199_v4, 1  ;;  %v436_v19 = vshll.u32 %v12200_v11, 16  ;;  %v12202_v24 = vld [vmem:[%s12541_s20 + $0x20] ss:$0 sps:$4 sm:$0x11]  }
  0x17   : > { %11900 = vmatpush3.bf16.msra.mxu1 %v653_v14  ;;  %v426_v17 = vrot.slane %v424_v10, 1  ;;  %v433_v18 = vrot.slane %v431_v13, 1  ;;  %v655_v20 = vrot.slane %v12200_v11, 1  ;;  %v441_v29 = vshrl.u32 %v12554_v21, 16  ;;  %v12571_v35 = vld [vmem:[%s12541_s20 + $0x30] sm:$0xff]   ;;  %v12582_v45 = vld [vmem:[%s12541_s20 + $0x3c] sm:$0xff]  }
  0x18   : > { %v422_v23 = vor.u32 %v421_v15, %v417_v7  ;;  %11905 = vmatprep.subr.bf16.mxu1 %v12494_v0  ;;  %v438_v26 = vrot.slane %v436_v19, 1  ;;  %v443_v30 = vshll.u32 %v12554_v21, 16  ;;  %v448_v31 = vshll.u32 %v12202_v24, 16  ;;  %v12204_v32 = vld [vmem:[%s12541_s20 + $0x2c] ss:$0 sps:$4 sm:$0x11]  }
  0x19   : > { %v434_v25 = vor.u32 %v433_v18, %v429_v12  ;;  %v656_v27 = vsel %vm650_vm1, %v654_v16, %v655_v20  ;;  %v455_v34 = vshll.u32 %v12557_v22, 16  ;;  %v657_v38 = vrot.slane %v12554_v21, 1  ;;  %v12579_v44 = vld [vmem:[%s12541_s20 + $0x38] ss:$0 sps:$4 sm:$0x11]   ;;  %v12601_v55 = vld [vmem:[%s12541_s20 + $0x48] sm:$0xff]  }
  0x1a   : > { %v427_v28 = vsel %vm415_vm2, %v422_v23, %v426_v17  ;;  %11902 = vmatmul.mubr.msk.bf16.vlgmr.msra.gmra.mrb[0].mxu1 %vm730_vm3, %v12549_v9  ;;  %v445_v36 = vrot.slane %v443_v30, 1  ;;  %v450_v37 = vrot.slane %v448_v31, 1  ;;  %v658_v39 = vrot.slane %v12202_v24, 1  ;;  %v12591_v51 = vld [vmem:[%s12541_s20 + $0x44] ss:$0 sps:$4 sm:$0x11]  }
  0x1b   : > { %734 = vmatprep.subr.bf16.mxu0 %v427_v28  ;;  %v439_v33 = vsel %vm415_vm2, %v434_v25, %v438_v26  ;;  %11906 = vmatpush3.bf16.msra.mxu1 %v656_v27  ;;  %v453_v40 = vshrl.u32 %v12557_v22, 16  ;;  %v457_v41 = vrot.slane %v455_v34, 1  ;;  %v460_v42 = vshll.u32 %v12204_v32, 16  ;;  %v12604_v56 = vld [vmem:[%s12541_s20 + $0x50] ss:$0 sps:$4 sm:$0x11]  }
  0x1c   : > { %735 = vmatpush1.bf16.msra.mxu0 %v12196_v2  ;;  %11907 = vmatprep.mubr.msk.bf16.mxu1 %vm12495_vm0, %v12494_v0  ;;  %v446_v43 = vor.u32 %v445_v36, %v441_v29  ;;  %v659_v47 = vsel %vm650_vm1, %v657_v38, %v658_v39  ;;  %v467_v48 = vshll.u32 %v12571_v35, 16  ;;  %v472_v52 = vshll.u32 %v12579_v44, 16  ;;  %v12615_v6 = vld [vmem:[%s12541_s20 + $0x54] sm:$0xff]   ;;  %v12625_v12 = vld [vmem:[%s12541_s20 + $0x5c] ss:$0 sps:$4 sm:$0x11]  }
  0x1d   : > { %818 = vmatprep.subr.bf16.mxu0 %v439_v33  ;;  %11911 = vmatprep.subr.bf16.mxu1 %v12494_v0  ;;  %v458_v49 = vor.u32 %v457_v41, %v453_v40  ;;  %v462_v50 = vrot.slane %v460_v42, 1  ;;  %v479_v53 = vshll.u32 %v12582_v45, 16  ;;  %v660_v54 = vrot.slane %v12557_v22, 1  ;;  %v12628_v13 = vld [vmem:[%s12541_s20 + $0x6c] sm:$0xff]   ;;  %v12637_v19 = vld [vmem:[%s12541_s20 + $0x78] sm:$0xff]   ;;  %v12646_v24 = vld [vmem:[%s12541_s20 + $0x60] sm:$0xff]  }
  0x1e   : > { %v451_v46 = vsel %vm415_vm2, %v446_v43, %v450_v37  ;;  %v661_v57 = vrot.slane %v12204_v32, 1  ;;  %v465_v58 = vshrl.u32 %v12571_v35, 16  ;;  %v469_v59 = vrot.slane %v467_v48, 1  ;;  %v12653_v27 = vld [vmem:[%s12541_s20 + $0x74] ss:$0 sps:$4 sm:$0x11]  }
  0x1f   : > { %11497 = vmatmul.mubr.msk.bf16.vlgmr.msra.gmra.mrb[0].mxu0 %vm730_vm3, %v12549_v9  ;;  %v663_v60 = vrot.slane %v12571_v35, 1  ;;  %v463_v61 = vsel %vm415_vm2, %v458_v49, %v462_v50  ;;  %v664_v62 = vrot.slane %v12579_v44, 1  ;;  %v484_v63 = vshll.u32 %v12591_v51, 16  ;;  %v12218_v37 = vld [vmem:[%s12541_s20 + $0x80] ss:$0 sps:$4 sm:$0x11]  }
  0x20   : > { %819 = vmatpush1.bf16.msra.mxu0 %v12199_v4  ;;  %850 = vmatprep.mubr.bf16.mxu0 %v16457_v1  ;;  %v474_v2 = vrot.slane %v472_v52, 1  ;;  %v477_v3 = vshrl.u32 %v12582_v45, 16  ;;  %v481_v4 = vrot.slane %v479_v53, 1  ;;  %v666_v5 = vrot.slane %v12582_v45, 1  ;;  %v12675_v43 = vld [vmem:[%s12541_s20 + $0x84] sm:$0xff]   ;;  %v12686_v53 = vld [vmem:[%s12541_s20 + $0x90] sm:$0xff]  }
  0x21   : > { %902 = vmatprep.subr.bf16.mxu0 %v451_v46  ;;  %v491_v7 = vshll.u32 %v12601_v55, 16  ;;  %v496_v8 = vshll.u32 %v12604_v56, 16  ;;  %v662_v10 = vsel %vm650_vm1, %v660_v54, %v661_v57  ;;  %v470_v11 = vor.u32 %v469_v59, %v465_v58  ;;  %v12220_v48 = vld [vmem:[%s12541_s20 + $0x8c] ss:$0 sps:$4 sm:$0x11]  }
  0x22   : > { %11908 = vmatmul.mubr.msk.bf16.vlgmr.msra.gmra.mrb[4].mxu1 %vm730_vm3, %v12549_v9  ;;  %v486_v14 = vrot.slane %v484_v63, 1  ;;  %v667_v15 = vrot.slane %v12591_v51, 1  ;;  %v489_v16 = vshrl.u32 %v12601_v55, 16  ;;  %v669_v17 = vrot.slane %v12601_v55, 1 }
  0x23   : > { %11912 = vmatpush3.bf16.msra.mxu1 %v659_v47  ;;  %11913 = vmatprep.mubr.msk.bf16.mxu1 %vm12495_vm0, %v12494_v0  ;;  %v503_v18 = vshll.u32 %v12615_v6, 16  ;;  %v12641_v20 = vrot.slane %v491_v7, 1  ;;  %v501_v23 = vshrl.u32 %v12615_v6, 16  ;;  %v12649_v25 = vrot.slane %v496_v8, 1 }
  0x24   : > { %11917 = vmatprep.subr.bf16.mxu1 %v12494_v0  ;;  %v508_v26 = vshll.u32 %v12625_v12, 16  ;;  %v678_v28 = vrot.slane %v12628_v13, 1  ;;  %v475_v29 = vsel %vm415_vm2, %v470_v11, %v474_v2  ;;  %v537_v30 = vshrl.u32 %v12637_v19, 16  ;;  %v12222_v63 = vld [vmem:[%s12541_s20 + $0x98] ss:$0 sps:$4 sm:$0x11]  }
  0x25   : > { %v539_v31 = vshll.u32 %v12637_v19, 16  ;;  %v12659_v32 = vrot.slane %v503_v18, 1  ;;  %v672_v33 = vrot.slane %v12615_v6, 1  ;;  %v679_v34 = vrot.slane %v12653_v27, 1 }
  0x26   : > { %v681_v36 = vrot.slane %v12637_v19, 1  ;;  %v665_v39 = vsel %vm650_vm1, %v663_v60, %v664_v62  ;;  %v482_v40 = vor.u32 %v481_v4, %v477_v3  ;;  %v515_v41 = vshll.u32 %v12646_v24, 16  ;;  %v12694_v60 = vld [vmem:[%s12541_s20 + $0x9c] sm:$0xff]  }
  0x27   : > { %11499 = vmatmul.mubr.msk.bf16.vlgmr.msra.gmra.mrb[4].mxu0 %vm730_vm3, %v12549_v9  ;;  %v541_v38 = vrot.slane %v539_v31, 1  ;;  %v12672_v42 = vsel %vm650_vm1, %v678_v28, %v679_v34  ;;  %v12677_v44 = vrot.slane %v508_v26, 1  ;;  %v544_v47 = vshll.u32 %v12218_v37, 16  ;;  %v12709_v26 = vld [vmem:[%s12541_s20 + $0xa8] sm:$0xff]  }
  0x28   : > { %903 = vmatpush1.bf16.msra.mxu0 %v12554_v21  ;;  %934 = vmatprep.mubr.bf16.mxu0 %v16457_v1  ;;  %v670_v21 = vrot.slane %v12604_v56, 1  ;;  %v549_v49 = vshrl.u32 %v12675_v43, 16  ;;  %v551_v50 = vshll.u32 %v12675_v43, 16  ;;  %v684_v52 = vrot.slane %v12675_v43, 1 }
  0x29   : > { %986 = vmatprep.subr.bf16.mxu0 %v463_v61  ;;  %v542_v46 = vor.u32 %v541_v38, %v537_v30  ;;  %v546_v54 = vrot.slane %v544_v47, 1  ;;  %v556_v58 = vshll.u32 %v12220_v48, 16  ;;  %v685_v59 = vrot.slane %v12220_v48, 1 }
  0x2a   : > { %11914 = vmatmul.mubr.msk.bf16.vlgmr.msra.gmra.mrb[8].mxu1 %vm730_vm3, %v12549_v9  ;;  %v487_v61 = vsel %vm415_vm2, %v482_v40, %v486_v14  ;;  %v553_v62 = vrot.slane %v551_v50, 1  ;;  %v561_v7 = vshrl.u32 %v12686_v53, 16  ;;  %v568_v11 = vshll.u32 %v12222_v63, 16  ;;  %v12731_v40 = vld [vmem:[%s12541_s20 + $0xb4] sm:$0xff]  }
  0x2b   : > { %11918 = vmatpush3.bf16.msra.mxu1 %v662_v10  ;;  %11919 = vmatprep.mubr.msk.bf16.mxu1 %vm12495_vm0, %v12494_v0  ;;  %v12700_v2 = vsel %vm415_vm2, %v542_v46, %v546_v54  ;;  %v558_v3 = vrot.slane %v556_v58, 1  ;;  %v12703_v4 = vsel %vm650_vm1, %v684_v52, %v685_v59  ;;  %v563_v10 = vshll.u32 %v12686_v53, 16 }
  0x2c   : > { %11923 = vmatprep.subr.bf16.mxu1 %v12494_v0  ;;  %v554_v8 = vor.u32 %v553_v62, %v549_v49  ;;  %v687_v18 = vrot.slane %v12686_v53, 1  ;;  %v668_v14 = vsel %vm650_vm1, %v666_v5, %v667_v15  ;;  %v688_v28 = vrot.slane %v12222_v63, 1  ;;  %v12746_v49 = vld [vmem:[%s12541_s20 + $0xc0] sm:$0xff]  }
  0x2d   : > { %v573_v30 = vshrl.u32 %v12694_v60, 16  ;;  %v575_v31 = vshll.u32 %v12694_v60, 16  ;;  %v565_v51 = vrot.slane %v563_v10, 1  ;;  %v690_v5 = vrot.slane %v12694_v60, 1 }
  0x2e   : > { %v12724_v34 = vsel %vm415_vm2, %v554_v8, %v558_v3  ;;  %v12728_v15 = vsel %vm650_vm1, %v687_v18, %v688_v28  ;;  %v671_v46 = vsel %vm650_vm1, %v669_v17, %v670_v21  ;;  %v585_v48 = vshrl.u32 %v12709_v26, 16  ;;  %v12766_v3 = vld [vmem:[%s12541_s20 + $0xcc] sm:$0xff]  }
  0x2f   : > { %11501 = vmatmul.mubr.msk.bf16.vlgmr.msra.gmra.mrb[8].mxu0 %vm730_vm3, %v12549_v9  ;;  %v566_v47 = vor.u32 %v565_v51, %v561_v7  ;;  %v693_v52 = vrot.slane %v12709_v26, 1  ;;  %v597_v62 = vshrl.u32 %v12731_v40, 16  ;;  %v599_v63 = vshll.u32 %v12731_v40, 16 }
  0x30   : > { %987 = vmatpush1.bf16.msra.mxu0 %v12557_v22  ;;  %1018 = vmatprep.mubr.bf16.mxu0 %v16457_v1  ;;  %v682_v22 = vrot.slane %v12218_v37, 1  ;;  %v577_v37 = vrot.slane %v575_v31, 1  ;;  %v12230_v31 = vld [vmem:[%s12541_s20 + $0xc8] ss:$0 sps:$4 sm:$0x11]   ;;  %v609_v51 = vshrl.u32 %v12746_v49, 16 }
  0x31   : > { %1070 = vmatprep.subr.bf16.mxu0 %v475_v29  ;;  %v12224_v29 = vld [vmem:[%s12541_s20 + $0xa4] ss:$0 sps:$4 sm:$0x11]  }
  0x32   : > { %11920 = vmatmul.mubr.msk.bf16.vlgmr.msra.gmra.mrb[12].mxu1 %vm730_vm3, %v12549_v9  ;;  %v12691_v57 = vsel %vm650_vm1, %v681_v36, %v682_v22  ;;  %v570_v36 = vrot.slane %v568_v11, 1  ;;  %v580_v38 = vshll.u32 %v12224_v29, 16  ;;  %v12226_v22 = vld [vmem:[%s12541_s20 + $0xb0] ss:$0 sps:$4 sm:$0x11]   ;;  %v578_v50 = vor.u32 %v577_v37, %v573_v30 }
  0x33   : > { %11924 = vmatpush3.bf16.msra.mxu1 %v665_v39  ;;  %11925 = vmatprep.mubr.msk.bf16.mxu1 %vm12495_vm0, %v12494_v0  ;;  %v691_v39 = vrot.slane %v12224_v29, 1  ;;  %v592_v21 = vshll.u32 %v12226_v22, 16  ;;  %v694_v54 = vrot.slane %v12226_v22, 1  ;;  %v696_v11 = vrot.slane %v12731_v40, 1 }
  0x34   : > { %11929 = vmatprep.subr.bf16.mxu1 %v12494_v0  ;;  %v12756_v17 = vsel %vm415_vm2, %v566_v47, %v570_v36  ;;  %v12214_v30 = vld [vmem:[%s12541_s20 + $0x68] ss:$0 sps:$4 sm:$0x11]   ;;  %v611_v36 = vshll.u32 %v12746_v49, 16  ;;  %v621_v47 = vshrl.u32 %v12766_v3, 16 }
  0x35   : > { %v12751_v56 = vsel %vm650_vm1, %v690_v5, %v691_v39  ;;  %v594_v8 = vrot.slane %v592_v21, 1  ;;  %v12771_v10 = vsel %vm650_vm1, %v693_v52, %v694_v54  ;;  %v699_v5 = vrot.slane %v12746_v49, 1 }
  0x37   : > { %11503 = vmatmul.mubr.msk.bf16.vlgmr.msra.gmra.mrb[12].mxu0 %vm730_vm3, %v12549_v9 }
  0x38   : > { %1071 = vmatpush1.bf16.msra.mxu0 %v12571_v35  ;;  %1102 = vmatprep.mubr.bf16.mxu0 %v16457_v1  ;;  %v494_v35 = vor.u32 %v12641_v20, %v489_v16  ;;  %v582_v16 = vrot.slane %v580_v38, 1  ;;  %v587_v20 = vshll.u32 %v12709_v26, 16 }
  0x39   : > { %1154 = vmatprep.subr.bf16.mxu0 %v487_v61  ;;  %v12228_v61 = vld [vmem:[%s12541_s20 + $0xbc] ss:$0 sps:$4 sm:$0x11]  }
  0x3a   : > { %11926 = vmatmul.mubr.msk.bf16.vlgmr.msra.gmra.mrb[16].mxu1 %vm730_vm3, %v12549_v9  ;;  %v12760_v58 = vsel %vm415_vm2, %v578_v50, %v582_v16  ;;  %v589_v59 = vrot.slane %v587_v20, 1  ;;  %v499_v7 = vsel %vm415_vm2, %v494_v35, %v12649_v25  ;;  %v604_v28 = vshll.u32 %v12228_v61, 16 }
  0x3b   : > { %11930 = vmatpush3.bf16.msra.mxu1 %v668_v14  ;;  %11931 = vmatprep.mubr.msk.bf16.mxu1 %vm12495_vm0, %v12494_v0  ;;  %v601_v14 = vrot.slane %v599_v63, 1  ;;  %v697_v29 = vrot.slane %v12228_v61, 1  ;;  %v506_v25 = vor.u32 %v12659_v32, %v501_v23  ;;  %v613_v23 = vrot.slane %v611_v36, 1 }
  0x3c   : > { %11935 = vmatprep.subr.bf16.mxu1 %v12494_v0  ;;  %v590_v18 = vor.u32 %v589_v59, %v585_v48  ;;  %v606_v38 = vrot.slane %v604_v28, 1  ;;  %v616_v32 = vshll.u32 %v12230_v31, 16  ;;  %v700_v35 = vrot.slane %v12230_v31, 1  ;;  %v12232_v48 = vld [vmem:[%s12541_s20 + $0xd4] ss:$0 sps:$4 sm:$0x11]  }
  0x3d   : > { %v12790_v39 = vsel %vm650_vm1, %v696_v11, %v697_v29  ;;  %v623_v50 = vshll.u32 %v12766_v3, 16  ;;  %v702_v16 = vrot.slane %v12766_v3, 1  ;;  %v673_v20 = vrot.slane %v12625_v12, 1 }
  0x3e   : > { %v12787_v37 = vsel %vm415_vm2, %v590_v18, %v594_v8  ;;  %v614_v21 = vor.u32 %v613_v23, %v609_v51  ;;  %v618_v52 = vrot.slane %v616_v32, 1  ;;  %v12806_v54 = vsel %vm650_vm1, %v699_v5, %v700_v35  ;;  %v12251_v23 = vld [vmem:[%s16453_s1 + $0x1e0] ss:$8 sps:$4 sm:$0xff]   ;;  %v12256_v32 = vld [vmem:[%s16453_s1 + $0x1f4] ss:$8 sps:$4 sm:$0xff]  }
  0x3f   : > { %11505 = vmatmul.mubr.msk.bf16.vlgmr.msra.gmra.mrb[16].mxu0 %vm730_vm3, %v12549_v9  ;;  %v625_v59 = vrot.slane %v623_v50, 1  ;;  %v628_v61 = vshll.u32 %v12232_v48, 16  ;;  %v511_v63 = vsel %vm415_vm2, %v506_v25, %v12677_v44  ;;  %v520_v8 = vshll.u32 %v12214_v30, 16  ;;  %v12287_v35 = vld [vmem:[%s16453_s1 + $0x2d0] ss:$8 sps:$4 sm:$0xff]  }
  0x40   : > { %1155 = vmatpush1.bf16.msra.mxu0 %v12582_v45  ;;  %1186 = vmatprep.mubr.bf16.mxu0 %v16457_v1  ;;  %v602_v45 = vor.u32 %v601_v14, %v597_v62  ;;  %v703_v62 = vrot.slane %v12232_v48, 1  ;;  %v12814_v11 = vsel %vm415_vm2, %v614_v21, %v618_v52  ;;  %v527_v25 = vshll.u32 %v12628_v13, 16  ;;  %v12262_v48 = vld [vmem:[%s16453_s1 + $0x204] ss:$8 sps:$4 sm:$0xff]   ;;  %v12293_v50 = vld [vmem:[%s16453_s1 + $0x2e0] ss:$8 sps:$4 sm:$0xff]  }
  0x41   : > { %1238 = vmatprep.subr.bf16.mxu0 %v499_v7  ;;  %v517_v7 = vrot.slane %v515_v41, 1  ;;  %v626_v12 = vor.u32 %v625_v59, %v621_v47  ;;  %v630_v18 = vrot.slane %v628_v61, 1  ;;  %v674_v41 = vsel %vm650_vm1, %v672_v33, %v673_v20  ;;  %v12295_v47 = vld [vmem:[%s16453_s1 + $0x2e4] ss:$8 sps:$4 sm:$0xff]   ;;  %v12260_v20 = vld [vmem:[%s16453_s1 + $0x200] ss:$8 sps:$4 sm:$0xff]  }
  0x42   : > { %11932 = vmatmul.mubr.msk.bf16.vlgmr.msra.gmra.mrb[20].mxu1 %vm730_vm3, %v12549_v9  ;;  %v12798_v22 = vsel %vm415_vm2, %v602_v45, %v606_v38  ;;  %v12819_v14 = vsel %vm650_vm1, %v702_v16, %v703_v62  ;;  %v522_v29 = vrot.slane %v520_v8, 1  ;;  %v676_v33 = vrot.slane %v12214_v30, 1  ;;  %v12301_v16 = vld [vmem:[%s16453_s1 + $0x2f4] ss:$8 sps:$4 sm:$0xff]   ;;  %v12299_v52 = vld [vmem:[%s16453_s1 + $0x2f0] ss:$8 sps:$4 sm:$0xff]  }
  0x43   : > { %11936 = vmatpush3.bf16.msra.mxu1 %v671_v46  ;;  %11937 = vmatprep.mubr.msk.bf16.mxu1 %vm12495_vm0, %v12494_v0  ;;  %v513_v46 = vshrl.u32 %v12646_v24, 16  ;;  %v12827_v44 = vsel %vm415_vm2, %v626_v12, %v630_v18  ;;  %v525_v51 = vshrl.u32 %v12628_v13, 16  ;;  %v529_v36 = vrot.slane %v527_v25, 1  ;;  %v12268_v21 = vld [vmem:[%s16453_s1 + $0x214] ss:$8 sps:$4 sm:$0xff]  }
  0x44   : > { %11941 = vmatprep.subr.bf16.mxu1 %v12494_v0  ;;  %v532_v5 = vshll.u32 %v12653_v27, 16  ;;  %v12272_v59 = vld [vmem:[%s16453_s1 + $0x220] ss:$8 sps:$4 sm:$0xff]   ;;  %v12280_v61 = vld [vmem:[%s16453_s1 + $0x234] ss:$8 sps:$4 sm:$0xff]  }
  0x45   : > { %v518_v28 = vor.u32 %v517_v7, %v513_v46  ;;  %v530_v30 = vor.u32 %v529_v36, %v525_v51  ;;  %v12274_v46 = vld [vmem:[%s16453_s1 + $0x224] ss:$8 sps:$4 sm:$0xff]   ;;  %v12278_v62 = vld [vmem:[%s16453_s1 + $0x230] ss:$8 sps:$4 sm:$0xff]   ;;  %v12284_v7 = vld [vmem:[%s16453_s1 + $0x240] ss:$8 sps:$4 sm:$0xff]  }
  0x46   : > { %v534_v38 = vrot.slane %v532_v5, 1  ;;  %v12292_v8 = vld [vmem:[%s16453_s1 + $0x254] ss:$8 sps:$4 sm:$0xff]   ;;  %v12298_v12 = vld [vmem:[%s16453_s1 + $0x264] ss:$8 sps:$4 sm:$0xff]  }
  0x47   : > { %11507 = vmatmul.mubr.msk.bf16.vlgmr.msra.gmra.mrb[20].mxu0 %vm730_vm3, %v12549_v9  ;;  %v523_v31 = vsel %vm415_vm2, %v518_v28, %v522_v29  ;;  %v12307_v18 = vld [vmem:[%s16453_s1 + $0x4] ss:$8 sps:$4 sm:$0xff]   ;;  %v12497_v29 = vmov 1966171168  }
  0x48   : > { %1239 = vmatpush1.bf16.msra.mxu0 %v12601_v55  ;;  %1270 = vmatprep.mubr.bf16.mxu0 %v16457_v1  ;;  %v675_v55 = vrot.slane %v12646_v24, 1  ;;  %v535_v27 = vsel %vm415_vm2, %v530_v30, %v534_v38  ;;  %v12316_v28 = vld [vmem:[%s16453_s1 + $0x304] ss:$8 sps:$4 sm:$0xff]   ;;  %v2496_v25 = vunpack.c.l.s4 %v12497_v29 }
  0x49   : > { %1322 = vmatprep.subr.bf16.mxu0 %v511_v63  ;;  %v12286_v63 = vld [vmem:[%s16453_s1 + $0x244] ss:$8 sps:$4 sm:$0xff]  }
  0x4a   : > { %11938 = vmatmul.mubr.msk.bf16.vlgmr.msra.gmra.mrb[24].mxu1 %vm730_vm3, %v12549_v9  ;;  %v677_v45 = vsel %vm650_vm1, %v675_v55, %v676_v33  ;;  %v2498_v55 = vlaneseq  ;;  %v2497_v51 = vunpack.c.0.s8 %v2496_v25 }
  0x4b   : > { %11942 = vmatpush3.bf16.msra.mxu1 %v674_v41  ;;  %11943 = vmatprep.mubr.msk.bf16.mxu1 %vm12495_vm0, %v12494_v0  ;;  %v12304_v41 = vld [vmem:[%s16453_s1 + $0x274] ss:$8 sps:$4 sm:$0xff]  }
  0x4c   : > { %11947 = vmatprep.subr.bf16.mxu1 %v12494_v0  ;;  %v2499_v36 = vshrl.u32 %v2498_v55, 7 }
  0x4e   : > { %v13102_v38 = vsub.s32 %v2497_v51, %v2499_v36 }
  0x4f   : > { %11509 = vmatmul.mubr.msk.bf16.vlgmr.msra.gmra.mrb[24].mxu0 %vm730_vm3, %v12549_v9 }
  0x50   : > { %1323 = vmatpush1.bf16.msra.mxu0 %v12615_v6  ;;  %1354 = vmatprep.mubr.bf16.mxu0 %v16457_v1  ;;  %v12453_v6 = vld [vmem:[%s16454_s2] sm:$0x1f]  }
  0x51   : > { %1406 = vmatprep.subr.bf16.mxu0 %v523_v31 }
  0x52   : > { %11944 = vmatmul.mubr.msk.bf16.vlgmr.msra.gmra.mrb[28].mxu1 %vm730_vm3, %v12549_v9 }
  0x53   : > { %11948 = vmatpush3.bf16.msra.mxu1 %v677_v45  ;;  %11949 = vmatprep.mubr.msk.bf16.mxu1 %vm12495_vm0, %v12494_v0 }
  0x54   : > { %11953 = vmatprep.subr.bf16.mxu1 %v12494_v0 }
  0x57   : > { %11511 = vmatmul.mubr.msk.bf16.vlgmr.msra.gmra.mrb[28].mxu0 %vm730_vm3, %v12549_v9 }
  0x58   : > { %1407 = vmatpush1.bf16.msra.mxu0 %v12646_v24  ;;  %1438 = vmatprep.mubr.bf16.mxu0 %v16457_v1  ;;  %v12238_v24 = vld [vmem:[%s16453_s1 + $0x194] ss:$8 sps:$4 sm:$0xff]  }
  0x59   : > { %1490 = vmatprep.subr.bf16.mxu0 %v535_v27 }
  0x5a   : > { %11950 = vmatmul.mubr.msk.bf16.vlgmr.msra.gmra.mrb[32].mxu1 %vm730_vm3, %v12549_v9 }
  0x5b   : > { %11954 = vmatpush3.bf16.msra.mxu1 %v12672_v42  ;;  %11955 = vmatprep.mubr.msk.bf16.mxu1 %vm12495_vm0, %v12494_v0  ;;  %v12241_v42 = vld [vmem:[%s16453_s1 + $0x1a4] ss:$8 sps:$4 sm:$0xff]  }
  0x5c   : > { %11959 = vmatprep.subr.bf16.mxu1 %v12494_v0 }
  0x5f   : > { %11513 = vmatmul.mubr.msk.bf16.vlgmr.msra.gmra.mrb[32].mxu0 %vm730_vm3, %v12549_v9 }
  0x60   : > { %1491 = vmatpush1.bf16.msra.mxu0 %v12628_v13  ;;  %1522 = vmatprep.mubr.bf16.mxu0 %v16457_v1  ;;  %v12259_v13 = vld [vmem:[%s16453_s1 + $0x284] ss:$8 sps:$4 sm:$0xff]  }
  0x61   : > { %1574 = vmatprep.subr.bf16.mxu0 %v12700_v2  ;;  %v12263_v2 = vld [vmem:[%s16453_s1 + $0x290] ss:$8 sps:$4 sm:$0xff]  }
  0x62   : > { %11956 = vmatmul.mubr.msk.bf16.vlgmr.msra.gmra.mrb[36].mxu1 %vm730_vm3, %v12549_v9 }
  0x63   : > { %11960 = vmatpush3.bf16.msra.mxu1 %v12691_v57  ;;  %11961 = vmatprep.mubr.msk.bf16.mxu1 %vm12495_vm0, %v12494_v0  ;;  %v12239_v57 = vld [vmem:[%s16453_s1 + $0x1a0] ss:$8 sps:$4 sm:$0xff]  }
  0x64   : > { %11965 = vmatprep.subr.bf16.mxu1 %v12494_v0 }
  0x67   : > { %11515 = vmatmul.mubr.msk.bf16.vlgmr.msra.gmra.mrb[36].mxu0 %vm730_vm3, %v12549_v9 }
  0x68   : > { %1575 = vmatpush1.bf16.msra.mxu0 %v12637_v19  ;;  %1606 = vmatprep.mubr.bf16.mxu0 %v16457_v1  ;;  %v12233_v19 = vld [vmem:[%s16453_s1 + $0x180] ss:$8 sps:$4 sm:$0xff]  }
  0x69   : > { %1658 = vmatprep.subr.bf16.mxu0 %v12724_v34  ;;  %v12247_v34 = vld [vmem:[%s16453_s1 + $0x1c4] ss:$8 sps:$4 sm:$0xff]  }
  0x6a   : > { %11962 = vmatmul.mubr.msk.bf16.vlgmr.msra.gmra.mrb[40].mxu1 %vm730_vm3, %v12549_v9 }
  0x6b   : > { %11966 = vmatpush3.bf16.msra.mxu1 %v12703_v4  ;;  %11967 = vmatprep.mubr.msk.bf16.mxu1 %vm12495_vm0, %v12494_v0  ;;  %v12271_v4 = vld [vmem:[%s16453_s1 + $0x2a4] ss:$8 sps:$4 sm:$0xff]  }
  0x6c   : > { %11971 = vmatprep.subr.bf16.mxu1 %v12494_v0 }
  0x6f   : > { %11517 = vmatmul.mubr.msk.bf16.vlgmr.msra.gmra.mrb[40].mxu0 %vm730_vm3, %v12549_v9 }
  0x70   : > { %1659 = vmatpush1.bf16.msra.mxu0 %v12675_v43  ;;  %1690 = vmatprep.mubr.bf16.mxu0 %v16457_v1  ;;  %v12257_v43 = vld [vmem:[%s16453_s1 + $0x280] ss:$8 sps:$4 sm:$0xff]  }
  0x71   : > { %1742 = vmatprep.subr.bf16.mxu0 %v12756_v17  ;;  %v12275_v17 = vld [vmem:[%s16453_s1 + $0x2b0] ss:$8 sps:$4 sm:$0xff]  }
  0x72   : > { %11968 = vmatmul.mubr.msk.bf16.vlgmr.msra.gmra.mrb[44].mxu1 %vm730_vm3, %v12549_v9 }
  0x73   : > { %11972 = vmatpush3.bf16.msra.mxu1 %v12728_v15  ;;  %11973 = vmatprep.mubr.msk.bf16.mxu1 %vm12495_vm0, %v12494_v0  ;;  %v12269_v15 = vld [vmem:[%s16453_s1 + $0x2a0] ss:$8 sps:$4 sm:$0xff]  }
  0x74   : > { %11977 = vmatprep.subr.bf16.mxu1 %v12494_v0 }
  0x77   : > { %11519 = vmatmul.mubr.msk.bf16.vlgmr.msra.gmra.mrb[44].mxu0 %vm730_vm3, %v12549_v9 }
  0x78   : > { %1743 = vmatpush1.bf16.msra.mxu0 %v12686_v53  ;;  %1774 = vmatprep.mubr.bf16.mxu0 %v16457_v1  ;;  %v12265_v53 = vld [vmem:[%s16453_s1 + $0x294] ss:$8 sps:$4 sm:$0xff]  }
  0x79   : > { %1826 = vmatprep.subr.bf16.mxu0 %v12760_v58  ;;  %v12283_v58 = vld [vmem:[%s16453_s1 + $0x2c4] ss:$8 sps:$4 sm:$0xff]  }
  0x7a   : > { %11974 = vmatmul.mubr.msk.bf16.vlgmr.msra.gmra.mrb[48].mxu1 %vm730_vm3, %v12549_v9 }
  0x7b   : > { %11978 = vmatpush3.bf16.msra.mxu1 %v12751_v56  ;;  %11979 = vmatprep.mubr.msk.bf16.mxu1 %vm12495_vm0, %v12494_v0  ;;  %v12250_v56 = vld [vmem:[%s16453_s1 + $0x1d4] ss:$8 sps:$4 sm:$0xff]  }
  0x7c   : > { %11983 = vmatprep.subr.bf16.mxu1 %v12494_v0 }
  0x7f   : > { %11521 = vmatmul.mubr.msk.bf16.vlgmr.msra.gmra.mrb[48].mxu0 %vm730_vm3, %v12549_v9 }
  0x80   : > { %1827 = vmatpush1.bf16.msra.mxu0 %v12694_v60  ;;  %1858 = vmatprep.mubr.bf16.mxu0 %v16457_v1  ;;  %v12244_v60 = vld [vmem:[%s16453_s1 + $0x1b4] ss:$8 sps:$4 sm:$0xff]  }
  0x81   : > { %1910 = vmatprep.subr.bf16.mxu0 %v12787_v37  ;;  %v12281_v37 = vld [vmem:[%s16453_s1 + $0x2c0] ss:$8 sps:$4 sm:$0xff]  }
  0x82   : > { %11980 = vmatmul.mubr.msk.bf16.vlgmr.msra.gmra.mrb[52].mxu1 %vm730_vm3, %v12549_v9 }
  0x83   : > { %11984 = vmatpush3.bf16.msra.mxu1 %v12771_v10  ;;  %11985 = vmatprep.mubr.msk.bf16.mxu1 %vm12495_vm0, %v12494_v0  ;;  %v12253_v10 = vld [vmem:[%s16453_s1 + $0x1e4] ss:$8 sps:$4 sm:$0xff]  }
  0x84   : > { %11989 = vmatprep.subr.bf16.mxu1 %v12494_v0 }
  0x87   : > { %11523 = vmatmul.mubr.msk.bf16.vlgmr.msra.gmra.mrb[52].mxu0 %vm730_vm3, %v12549_v9 }
  0x88   : > { %1911 = vmatpush1.bf16.msra.mxu0 %v12709_v26  ;;  %1942 = vmatprep.mubr.bf16.mxu0 %v16457_v1  ;;  %v12242_v26 = vld [vmem:[%s16453_s1 + $0x1b0] ss:$8 sps:$4 sm:$0xff]  }
  0x89   : > { %1994 = vmatprep.subr.bf16.mxu0 %v12798_v22  ;;  %v12254_v22 = vld [vmem:[%s16453_s1 + $0x1f0] ss:$8 sps:$4 sm:$0xff]  }
  0x8a   : > { %11986 = vmatmul.mubr.msk.bf16.vlgmr.msra.gmra.mrb[56].mxu1 %vm730_vm3, %v12549_v9  ;;  %v12235_v9 = vld [vmem:[%s16453_s1 + $0x184] ss:$8 sps:$4 sm:$0xff]  }
  0x8b   : > { %11990 = vmatpush3.bf16.msra.mxu1 %v12790_v39  ;;  %11991 = vmatprep.mubr.msk.bf16.mxu1 %vm12495_vm0, %v12494_v0  ;;  %v12289_v39 = vld [vmem:[%s16453_s1 + $0x2d4] ss:$8 sps:$4 sm:$0xff]  }
  0x8c   : > { %11995 = vmatprep.subr.bf16.mxu1 %v12494_v0 }
  0x8f   : > { %11525 = vmatmul.mubr.msk.bf16.vlgmr.msra.gmra.mrb[56].mxu0 %vm730_vm3, %v12453_v6 }
  0x90   : > { %1995 = vmatpush1.bf16.msra.mxu0 %v12731_v40  ;;  %2026 = vmatprep.mubr.bf16.mxu0 %v16457_v1  ;;  %v12277_v40 = vld [vmem:[%s16453_s1 + $0x2b4] ss:$8 sps:$4 sm:$0xff]  }
  0x91   : > { %2078 = vmatprep.subr.bf16.mxu0 %v12814_v11  ;;  %v12290_v11 = vld [vmem:[%s16453_s1 + $0x250] ss:$8 sps:$4 sm:$0xff]  }
  0x92   : > { %11992 = vmatmul.mubr.msk.bf16.vlgmr.msra.gmra.mrb[60].mxu1 %vm730_vm3, %v12453_v6 }
  0x93   : > { %11996 = vmatpush3.bf16.msra.mxu1 %v12806_v54  ;;  %11997 = vmatprep.mubr.msk.bf16.mxu1 %vm12495_vm0, %v12494_v0  ;;  %v12266_v54 = vld [vmem:[%s16453_s1 + $0x210] ss:$8 sps:$4 sm:$0xff]  }
  0x94   : > { %12001 = vmatprep.subr.bf16.mxu1 %v12494_v0 }
  0x97   : > { %11527 = vmatmul.mubr.msk.bf16.vlgmr.msra.gmra.mrb[60].mxu0 %vm730_vm3, %v12453_v6 }
  0x98   : > { %2079 = vmatpush1.bf16.msra.mxu0 %v12746_v49  ;;  %2110 = vmatprep.mubr.bf16.mxu0 %v16457_v1  ;;  %v12245_v49 = vld [vmem:[%s16453_s1 + $0x1c0] ss:$8 sps:$4 sm:$0xff]  }
  0x99   : > { %2162 = vmatprep.subr.bf16.mxu0 %v12827_v44  ;;  %v12302_v44 = vld [vmem:[%s16453_s1 + $0x270] ss:$8 sps:$4 sm:$0xff]  }
  0x9a   : > { %11998 = vmatmul.mubr.msk.bf16.vlgmr.msra.gmra.mrb[64].mxu1 %vm730_vm3, %v12453_v6 }
  0x9b   : > { %12002 = vmatpush3.bf16.msra.mxu1 %v12819_v14  ;;  %12003 = vmatprep.mubr.msk.bf16.mxu1 %vm12495_vm0, %v12494_v0  ;;  %v12236_v0 = vld [vmem:[%s16453_s1 + $0x190] ss:$8 sps:$4 sm:$0xff]   ;;  %v12296_v14 = vld [vmem:[%s16453_s1 + $0x260] ss:$8 sps:$4 sm:$0xff]  }
  0x9c   : > { %4490 = vmatprep.subr.bf16.mxu1 %v12235_v9 }
  0x9f   : > { %11529 = vmatmul.mubr.msk.bf16.vlgmr.msra.gmra.mrb[64].mxu0 %vm730_vm3, %v12453_v6 }
  0xa0   : > { %2163 = vmatpush1.bf16.msra.mxu0 %v12766_v3  ;;  %2194 = vmatprep.mubr.bf16.mxu0 %v16457_v1  ;;  %v12248_v3 = vld [vmem:[%s16453_s1 + $0x1d0] ss:$8 sps:$4 sm:$0xff]  }
  0xa1   : > { %4613 = vmatprep.subr.bf16.mxu0 %v12259_v13 }
  0xa2   : > { %12004 = vmatmul.mubr.msk.bf16.vlgmr.msra.gmra.mrb[68].mxu1 %vm730_vm3, %v12453_v6 }
  0xa3   : > { %4491 = vmatpush1.bf16.msra.mxu1 %v12233_v19 }
  0xa4   : > { %4492 = vmatprep.subr.bf16.mxu1 %v12238_v24 }
  0xa7   : > { %11531 = vmatmul.mubr.msk.bf16.vlgmr.msra.gmra.mrb[68].mxu0 %vm730_vm3, %v12453_v6  ;;  %4493 = vmatpush1.bf16.msra.mxu1 %v12236_v0 }
  0xa8   : > { %4494 = vmatprep.subr.bf16.mxu1 %v12241_v42  ;;  %4614 = vmatpush1.bf16.msra.mxu0 %v12257_v43 }
  0xa9   : > { %4615 = vmatprep.subr.bf16.mxu0 %v12265_v53  ;;  %4645 = vmatprep.mubr.bf16.mxu0 %v16457_v1 }
  0xab   : > { %4495 = vmatpush1.bf16.msra.mxu1 %v12239_v57 }
  0xac   : > { %4496 = vmatprep.subr.bf16.mxu1 %v12244_v60  ;;  %4616 = vmatpush1.bf16.msra.mxu0 %v12263_v2 }
  0xad   : > { %4617 = vmatprep.subr.bf16.mxu0 %v12271_v4 }
  0xaf   : > { %4497 = vmatpush1.bf16.msra.mxu1 %v12242_v26 }
  0xb0   : > { %4498 = vmatprep.subr.bf16.mxu1 %v12247_v34  ;;  %4618 = vmatpush1.bf16.msra.mxu0 %v12269_v15 }
  0xb1   : > { %4619 = vmatprep.subr.bf16.mxu0 %v12277_v40 }
  0xb3   : > { %4499 = vmatpush1.bf16.msra.mxu1 %v12245_v49 }
  0xb4   : > { %4500 = vmatprep.subr.bf16.mxu1 %v12250_v56  ;;  %4620 = vmatpush1.bf16.msra.mxu0 %v12275_v17 }
  0xb5   : > { %4621 = vmatprep.subr.bf16.mxu0 %v12283_v58 }
  0xb7   : > { %4501 = vmatpush1.bf16.msra.mxu1 %v12248_v3 }
  0xb8   : > { %4502 = vmatprep.subr.bf16.mxu1 %v12253_v10  ;;  %4622 = vmatpush1.bf16.msra.mxu0 %v12281_v37 }
  0xb9   : > { %4623 = vmatprep.subr.bf16.mxu0 %v12289_v39 }
  0xbb   : > { %4503 = vmatpush1.bf16.msra.mxu1 %v12251_v23 }
  0xbc   : > { %4504 = vmatprep.subr.bf16.mxu1 %v12256_v32  ;;  %4624 = vmatpush1.bf16.msra.mxu0 %v12287_v35 }
  0xbd   : > { %4625 = vmatprep.subr.bf16.mxu0 %v12295_v47 }
  0xbf   : > { %4505 = vmatpush1.bf16.msra.mxu1 %v12254_v22 }
  0xc0   : > { %4506 = vmatprep.subr.bf16.mxu1 %v12262_v48  ;;  %4626 = vmatpush1.bf16.msra.mxu0 %v12293_v50 }
  0xc1   : > { %4627 = vmatprep.subr.bf16.mxu0 %v12301_v16 }
  0xc3   : > { %4507 = vmatpush1.bf16.msra.mxu1 %v12260_v20 }
  0xc4   : > { %4508 = vmatprep.subr.bf16.mxu1 %v12268_v21  ;;  %4628 = vmatpush1.bf16.msra.mxu0 %v12299_v52 }
  0xc5   : > { %5747 = vmatprep.subr.bf16.mxu0 %v12307_v18 }
  0xc7   : > { %4509 = vmatpush1.bf16.msra.mxu1 %v12266_v54 }
  0xc8   : > { %4510 = vmatprep.subr.bf16.mxu1 %v12274_v46 }
  0xcb   : > { %4511 = vmatpush1.bf16.msra.mxu1 %v12272_v59 }
  0xcc   : > { %4512 = vmatprep.subr.bf16.mxu1 %v12280_v61 }
  0xcf   : > { %4513 = vmatpush1.bf16.msra.mxu1 %v12278_v62 }
  0xd0   : > { %4514 = vmatprep.subr.bf16.mxu1 %v12286_v63 }
  0xd3   : > { %4515 = vmatpush1.bf16.msra.mxu1 %v12284_v7 }
  0xd4   : > { %4516 = vmatprep.subr.bf16.mxu1 %v12292_v8 }
  0xd7   : > { %4517 = vmatpush1.bf16.msra.mxu1 %v12290_v11 }
  0xd8   : > { %4518 = vmatprep.subr.bf16.mxu1 %v12298_v12 }
  0xdb   : > { %4519 = vmatpush1.bf16.msra.mxu1 %v12296_v14 }
  0xdc   : > { %4520 = vmatprep.subr.bf16.mxu1 %v12304_v41 }
  0xdf   : > { %4521 = vmatpush1.bf16.msra.mxu1 %v12302_v44 }
  0xe0   : > { %12007 = vmatprep.subr.bf16.mxu1 %v12316_v28 }
  0xed   : > { %v811_v33 = vpop.f32.mrb[0].mxu1 }
  0xee   : > { %v11903_v31 = vpop.f32.mrb[1].mxu1 }
  0xef   : > { %v814_v5 = vpop.f32.mrb[2].mxu1 }
  0xf0   : > { %v2248_v45 = vpack.c.bf16 %v814_v5, %v811_v33  ;;  %v11904_v30 = vpop.f32.mrb[3].mxu1  ;;  %v11675_v6 = vpack.c.bf16 %v814_v5, %v814_v5 }
  0xf2   : > { %v768_v27 = vpop.f32.mrb[0].mxu0  ;;  %v4762_v42 = vrot.slane %v2248_v45, %v13102_v38  ;;  %v4769_v60 = vrot.slane %v11675_v6, %v13102_v38 }
  0xf3   : > { %v770_v9 = vpop.f32.mrb[1].mxu0 }
  0xf4   : > { %v11673_v13 = vpack.c.bf16 %v770_v9, %v768_v27  ;;  %v772_v19 = vpop.f32.mrb[2].mxu0 }
  0xf5   : > { %v774_v24 = vpop.f32.mrb[3].mxu0  ;;  %v895_v0 = vpop.f32.mrb[4].mxu1 }
  0xf6   : > { %v4748_v43 = vrot.slane %v11673_v13, %v13102_v38  ;;  %v11674_v53 = vpack.c.bf16 %v774_v24, %v772_v19  ;;  %v11909_v57 = vpop.f32.mrb[5].mxu1 }
  0xf7   : > { %v898_v2 = vpop.f32.mrb[6].mxu1 }
  0xf8   : > { %v4770_v4 = vcombine.low %v4748_v43, %v4762_v42  ;;  %v4771_v26 = vcombine.high %v4748_v43, %v4762_v42  ;;  %v4755_v34 = vrot.slane %v11674_v53, %v13102_v38  ;;  %v2251_v15 = vpack.c.bf16 %v898_v2, %v895_v0  ;;  %v11910_v40 = vpop.f32.mrb[7].mxu1 }
  0xf9   : > { %v11535_v3 = vpack.c.bf16 %v898_v2, %v898_v2 }
  0xfa   : > { %v4779_v49 = vrot.slane %v4770_v4, %v13102_v38  ;;  %v4793_v56 = vrot.slane %v4771_v26, %v13102_v38  ;;  %v4772_v17 = vcombine.low %v4755_v34, %v4769_v60  ;;  %v852_v58 = vpop.f32.mrb[4].mxu0  ;;  %v2515_v35 = vrot.slane %v2251_v15, %v13102_v38 }
  0xfb   : > { %v854_v10 = vpop.f32.mrb[5].mxu0  ;;  %v2522_v52 = vrot.slane %v11535_v3, %v13102_v38 }
  0xfc   : > { %v4877_v37 = vcombine.low %v4779_v49, %v4793_v56  ;;  %v11716_v39 = vcombine.high %v4779_v49, %v4793_v56  ;;  %v11533_v23 = vpack.c.bf16 %v854_v10, %v852_v58  ;;  %v856_v32 = vpop.f32.mrb[6].mxu0  ;;  %v13121_v44 = vrot.slane %v4772_v17, %v13102_v38 }
  0xfd   : > { %v858_v47 = vpop.f32.mrb[7].mxu0  ;;  %v979_v22 = vpop.f32.mrb[8].mxu1 }
  0xfe   : > { %v2501_v48 = vrot.slane %v11533_v23, %v13102_v38  ;;  %v11534_v50 = vpack.c.bf16 %v858_v47, %v856_v32  ;;  %v11915_v16 = vpop.f32.mrb[9].mxu1  ;;  %v4887_v20 = vrot.slane %v4877_v37, %v13102_v38  ;;  %v4894_v21 = vrot.slane %v11716_v39, %v13102_v38 }
  0xff   : > { %v982_v54 = vpop.f32.mrb[10].mxu1 }
 0x100   : > { %v2523_v46 = vcombine.low %v2501_v48, %v2515_v35  ;;  %v2524_v59 = vcombine.high %v2501_v48, %v2515_v35  ;;  %v2508_v61 = vrot.slane %v11534_v50, %v13102_v38  ;;  %v2254_v62 = vpack.c.bf16 %v982_v54, %v979_v22  ;;  %v11916_v63 = vpop.f32.mrb[11].mxu1 }
 0x101   : > { %v11538_v7 = vpack.c.bf16 %v982_v54, %v982_v54  ;;  %v4909_v8 = vcombine.low %v4887_v20, %v4894_v21  ;;  %v4910_v11 = vcombine.high %v4887_v20, %v4894_v21 }
 0x102   : > { %v13117_v12 = vrot.slane %v2523_v46, %v13102_v38  ;;  %v2546_v18 = vrot.slane %v2524_v59, %v13102_v38  ;;  %v2525_v14 = vcombine.low %v2508_v61, %v2522_v52  ;;  %v936_v41 = vpop.f32.mrb[8].mxu0  ;;  %v2572_v28 = vrot.slane %v2254_v62, %v13102_v38 }
 0x103   : > { %v2579_v29 = vrot.slane %v11538_v7, %v13102_v38  ;;  %v938_v25 = vpop.f32.mrb[9].mxu0  ;;  %v13126_v55 = vrot.slane %v4910_v11, %v13102_v38  ;;  %v13159_v50 = vrot.slane %v4909_v8, %v13102_v38 }
 0x104   : > { %v13129_v33 = vrot.slane %v2525_v14, %v13102_v38  ;;  %v2548_v31 = vcombine.high %v2546_v18, %v2546_v18  ;;  %v11536_v51 = vpack.c.bf16 %v938_v25, %v936_v41  ;;  %v940_v36 = vpop.f32.mrb[10].mxu0  ;;  %v3620_v5 = vcombine.low %v13117_v12, %v2546_v18 }
 0x105   : > { %v942_v45 = vpop.f32.mrb[11].mxu0  ;;  %v1063_v30 = vpop.f32.mrb[12].mxu1  ;;  %v11621_v27 = vcombine.high %v13117_v12, %v2546_v18  ;;  %v2547_v6 = vcombine.high %v13117_v12, %v13117_v12  ;;  %v3405_v9 = vunpack.i.h.s16 %v13117_v12  ;;  %v3407_v13 = vunpack.i.h.s16 %v2546_v18  ;;  %16593 = vst [vmem:[#allocation3_spill] sm:$0xff] %v13159_v50 }
 0x106   : > { %v3411_v19 = vunpack.i.h.s16 %v2548_v31  ;;  %v2558_v24 = vrot.slane %v11536_v51, %v13102_v38  ;;  %v11537_v0 = vpack.c.bf16 %v942_v45, %v940_v36  ;;  %v11921_v42 = vpop.f32.mrb[13].mxu1  ;;  %v3630_v43 = vrot.slane %v3620_v5, %v13102_v38 }
 0x107   : > { %v1066_v53 = vpop.f32.mrb[14].mxu1  ;;  %v3637_v57 = vrot.slane %v11621_v27, %v13102_v38  ;;  %v3409_v60 = vunpack.i.h.s16 %v2547_v6  ;;  %v11676_v2 = vpack.i.b16 %v13117_v12, %v13121_v44  ;;  %v11677_v4 = vpack.i.b16 %v2546_v18, %v3405_v9 }
 0x108   : > { %v13142_v26 = vpack.i.b16 %v13129_v33, %v3411_v19  ;;  %v2580_v34 = vcombine.low %v2558_v24, %v2572_v28  ;;  %v2581_v15 = vcombine.high %v2558_v24, %v2572_v28  ;;  %v2565_v40 = vrot.slane %v11537_v0, %v13102_v38  ;;  %v11922_v49 = vpop.f32.mrb[15].mxu1 }
 0x109   : > { %v2257_v56 = vpack.c.bf16 %v1066_v53, %v1063_v30  ;;  %v11541_v17 = vpack.c.bf16 %v1066_v53, %v1066_v53  ;;  %v3653_v58 = vcombine.high %v3630_v43, %v3637_v57  ;;  %v3652_v3 = vcombine.low %v3630_v43, %v3637_v57 }
 0x10a   : > { %v13146_v10 = vrot.slane %v2580_v34, %v13102_v38  ;;  %v13149_v37 = vrot.slane %v2581_v15, %v13102_v38  ;;  %v2582_v39 = vcombine.low %v2565_v40, %v2579_v29  ;;  %v1020_v23 = vpop.f32.mrb[12].mxu0  ;;  %v13151_v32 = vpack.i.b16 %v2547_v6, %v3407_v13 }
 0x10b   : > { %v2629_v35 = vrot.slane %v2257_v56, %v13102_v38  ;;  %v2636_v47 = vrot.slane %v11541_v17, %v13102_v38  ;;  %v1022_v22 = vpop.f32.mrb[13].mxu0  ;;  %v13156_v48 = vrot.slane %v3653_v58, %v13102_v38  ;;  %v13170_v54 = vrot.slane %v3652_v3, %v13102_v38 }
 0x10c   : > { %16592 = vst [vmem:[#allocation2_spill] sm:$0xff] %v13149_v37  ;;  %v13163_v16 = vcombine.high %v13149_v37, %v13149_v37  ;;  %v11539_v20 = vpack.c.bf16 %v1022_v22, %v1020_v23  ;;  %v1024_v21 = vpop.f32.mrb[14].mxu0  ;;  %v13167_v52 = vcombine.high %v13146_v10, %v13146_v10  ;;  %v13173_v46 = vrot.slane %v2582_v39, %v13102_v38 }
 0x10d   : > { %v1026_v59 = vpop.f32.mrb[15].mxu0  ;;  %v1147_v61 = vpop.f32.mrb[16].mxu1  ;;  %v3414_v62 = vunpack.i.h.s16 %v13146_v10  ;;  %v3416_v63 = vunpack.i.h.s16 %v13149_v37  ;;  %v13177_v7 = vpack.i.b16 %v2548_v31, %v3409_v60  ;;  %v11581_v44 = vpack.i.b16 %v13146_v10, %v13129_v33 }
 0x10e   : > { %16594 = vst [vmem:[#allocation4_spill] sm:$0xff] %v13163_v16  ;;  %16595 = vst [vmem:[#allocation5_spill] sm:$0xff] %v13167_v52  ;;  %v3420_v8 = vunpack.i.h.s16 %v13163_v16  ;;  %v2615_v11 = vrot.slane %v11539_v20, %v13102_v38  ;;  %v11540_v12 = vpack.c.bf16 %v1026_v59, %v1024_v21  ;;  %v11927_v18 = vpop.f32.mrb[17].mxu1  ;;  %v3418_v14 = vunpack.i.h.s16 %v13167_v52 }
 0x10f   : > { %v1150_v41 = vpop.f32.mrb[18].mxu1  ;;  %v11582_v28 = vpack.i.b16 %v13149_v37, %v3414_v62  ;;  %v4879_v29 = vcombine.low %v11676_v2, %v11677_v4  ;;  %v11583_v45 = vpack.i.b16 %v13167_v52, %v3416_v63 }
 0x110   : > { %v2637_v31 = vcombine.low %v2615_v11, %v2629_v35  ;;  %v2638_v51 = vcombine.high %v2615_v11, %v2629_v35  ;;  %v2622_v36 = vrot.slane %v11540_v12, %v13102_v38  ;;  %v11928_v5 = vpop.f32.mrb[19].mxu1  ;;  %v2260_v30 = vpack.c.bf16 %v1150_v41, %v1147_v61 }
 0x111   : > { %v11544_v27 = vpack.c.bf16 %v1150_v41, %v1150_v41  ;;  %v11584_v6 = vpack.i.b16 %v13163_v16, %v3418_v14  ;;  %v3622_v9 = vcombine.low %v11581_v44, %v11582_v28  ;;  %v11585_v33 = vpack.i.b16 %v13173_v46, %v3420_v8 }
 0x112   : > { %v13192_v13 = vrot.slane %v2637_v31, %v13102_v38  ;;  %v13195_v19 = vrot.slane %v2638_v51, %v13102_v38  ;;  %v2639_v24 = vcombine.low %v2622_v36, %v2636_v47  ;;  %v1104_v0 = vpop.f32.mrb[16].mxu0  ;;  %v2686_v42 = vrot.slane %v2260_v30, %v13102_v38 }
 0x113   : > { %v2693_v43 = vrot.slane %v11544_v27, %v13102_v38  ;;  %v1106_v53 = vpop.f32.mrb[17].mxu0  ;;  %v3623_v57 = vcombine.low %v11583_v45, %v11584_v6  ;;  %v13200_v60 = vrot.slane %v4879_v29, %v13102_v38  ;;  %v3644_v40 = vrot.slane %v3622_v9, %v13102_v38 }
 0x114   : > { %v13204_v2 = vcombine.high %v13192_v13, %v13192_v13  ;;  %v13208_v4 = vcombine.high %v13195_v19, %v13195_v19  ;;  %v1108_v15 = vpop.f32.mrb[18].mxu0  ;;  %v13213_v49 = vrot.slane %v2639_v24, %v13102_v38  ;;  %v11542_v56 = vpack.c.bf16 %v1106_v53, %v1104_v0  ;;  %v12305_v24 = vld [vmem:[%s16453_s1] ss:$8 sps:$4 sm:$0xff]  }
 0x115   : > { %v1110_v17 = vpop.f32.mrb[19].mxu0  ;;  %v1231_v58 = vpop.f32.mrb[20].mxu1  ;;  %v3651_v3 = vrot.slane %v3623_v57, %v13102_v38  ;;  %v3687_v39 = vcombine.low %v11585_v33, %v13192_v13 }
 0x116   : > { %v3427_v23 = vunpack.i.h.s16 %v13204_v2  ;;  %v3429_v35 = vunpack.i.h.s16 %v13208_v4  ;;  %v11543_v47 = vpack.c.bf16 %v1110_v17, %v1108_v15  ;;  %v11933_v22 = vpop.f32.mrb[21].mxu1  ;;  %v3688_v20 = vcombine.low %v13195_v19, %v13204_v2  ;;  %v12310_v15 = vld [vmem:[%s16453_s1 + $0x14] ss:$8 sps:$4 sm:$0xff]  }
 0x117   : > { %v2672_v21 = vrot.slane %v11542_v56, %v13102_v38  ;;  %v1234_v59 = vpop.f32.mrb[22].mxu1  ;;  %v3655_v61 = vcombine.high %v3644_v40, %v3651_v3  ;;  %v3654_v62 = vcombine.low %v3644_v40, %v3651_v3  ;;  %v13223_v63 = vrot.slane %v3687_v39, %v13102_v38 }
 0x118   : > { %v13226_v8 = vpack.i.b16 %v13208_v4, %v3427_v23  ;;  %v13229_v11 = vpack.i.b16 %v13213_v49, %v3429_v35  ;;  %v2679_v12 = vrot.slane %v11543_v47, %v13102_v38  ;;  %v2263_v18 = vpack.c.bf16 %v1234_v59, %v1231_v58  ;;  %v11934_v14 = vpop.f32.mrb[23].mxu1 }
 0x119   : > { %v2694_v41 = vcombine.low %v2672_v21, %v2686_v42  ;;  %v2695_v44 = vcombine.high %v2672_v21, %v2686_v42  ;;  %v11547_v28 = vpack.c.bf16 %v1234_v59, %v1234_v59  ;;  %v3683_v29 = vrot.slane %v3655_v61, %v13102_v38  ;;  %v12319_v21 = vld [vmem:[%s16453_s1 + $0x314] ss:$8 sps:$4 sm:$0xff]  }
 0x11a   : > { %16596 = vst [vmem:[#allocation6_spill] sm:$0xff] %v13226_v8  ;;  %16597 = vst [vmem:[#allocation7_spill] sm:$0xff] %v13229_v11  ;;  %v2696_v51 = vcombine.low %v2679_v12, %v2693_v43  ;;  %v2743_v36 = vrot.slane %v2263_v18, %v13102_v38  ;;  %v1188_v5 = vpop.f32.mrb[20].mxu0  ;;  %v3676_v45 = vrot.slane %v3654_v62, %v13102_v38 }
 0x11b   : > { %v13238_v30 = vrot.slane %v2694_v41, %v13102_v38  ;;  %v13241_v27 = vrot.slane %v2695_v44, %v13102_v38  ;;  %v2750_v6 = vrot.slane %v11547_v28, %v13102_v38  ;;  %v1190_v9 = vpop.f32.mrb[21].mxu0  ;;  %v3686_v33 = vcombine.low %v13156_v48, %v3683_v29 }
 0x11c   : > { %v13249_v0 = vrot.slane %v2696_v51, %v13102_v38  ;;  %v11545_v42 = vpack.c.bf16 %v1190_v9, %v1188_v5  ;;  %v1192_v43 = vpop.f32.mrb[22].mxu0  ;;  %v3685_v53 = vcombine.high %v13170_v54, %v3676_v45  ;;  %v3684_v57 = vcombine.low %v13170_v54, %v3676_v45  ;;  %v12314_v54 = vld [vmem:[%s16453_s1 + $0x300] ss:$8 sps:$4 sm:$0xff]   ;;  %v12313_v51 = vld [vmem:[%s16453_s1 + $0x24] ss:$8 sps:$4 sm:$0xff]  }
 0x11d   : > { %16598 = vst [vmem:[#allocation8_spill] sm:$0xff] %v13238_v30  ;;  %16599 = vst [vmem:[#allocation9_spill] sm:$0xff] %v13241_v27  ;;  %v13258_v48 = vcombine.high %v13238_v30, %v13238_v30  ;;  %v13262_v40 = vcombine.high %v13241_v27, %v13241_v27  ;;  %4522 = vmatprep.mubr.bf16.mxu1 %v3686_v33  ;;  %v1194_v56 = vpop.f32.mrb[23].mxu0  ;;  %v1315_v17 = vpop.f32.mrb[24].mxu1  ;;  %v3432_v58 = vunpack.i.h.s16 %v13238_v30  ;;  %v3434_v3 = vunpack.i.h.s16 %v13241_v27 }
 0x11e   : > { %16600 = vst [vmem:[#allocation10_spill] sm:$0xff] %v13249_v0  ;;  %v2729_v23 = vrot.slane %v11545_v42, %v13102_v38  ;;  %4646 = vmatmul.mubr.bf16.vlgmr.msra.gmra.mrb[72].mxu0 %v3685_v53  ;;  %v11546_v35 = vpack.c.bf16 %v1194_v56, %v1192_v43  ;;  %4523 = vmatmul.mubr.bf16.vlgmr.msra.gmra.mrb[72].mxu1 %v3684_v57  ;;  %v11939_v47 = vpop.f32.mrb[25].mxu1 }
 0x11f   : > { %16601 = vst [vmem:[#allocation11_spill] sm:$0xff] %v13258_v48  ;;  %16602 = vst [vmem:[#allocation12_spill] sm:$0xff] %v13262_v40  ;;  %v11586_v22 = vpack.i.b16 %v13238_v30, %v13213_v49  ;;  %v3436_v59 = vunpack.i.h.s16 %v13258_v48  ;;  %v3438_v61 = vunpack.i.h.s16 %v13262_v40  ;;  %v1318_v62 = vpop.f32.mrb[26].mxu1  ;;  %4655 = vmatprep.mubr.bf16.mxu0 %v16457_v1  ;;  %v11587_v12 = vpack.i.b16 %v13241_v27, %v3432_v58  ;;  %v12308_v49 = vld [vmem:[%s16453_s1 + $0x10] ss:$8 sps:$4 sm:$0xff]  }
 0x120   : > { %v11588_v18 = vpack.i.b16 %v13258_v48, %v3434_v3  ;;  %5748 = vmatpush1.bf16.msra.mxu0 %v12305_v24  ;;  %v2751_v14 = vcombine.low %v2729_v23, %v2743_v36  ;;  %v2752_v41 = vcombine.high %v2729_v23, %v2743_v36  ;;  %v2736_v44 = vrot.slane %v11546_v35, %v13102_v38  ;;  %v11940_v29 = vpop.f32.mrb[27].mxu1  ;;  %v12317_v36 = vld [vmem:[%s16453_s1 + $0x310] ss:$8 sps:$4 sm:$0xff]   ;;  %v12311_v3 = vld [vmem:[%s16453_s1 + $0x20] ss:$8 sps:$4 sm:$0xff]  }
 0x121   : > { %v2266_v28 = vpack.c.bf16 %v1318_v62, %v1315_v17  ;;  %5749 = vmatprep.subr.bf16.mxu0 %v12310_v15  ;;  %v13289_v5 = vpack.i.b16 %v13262_v40, %v3436_v59  ;;  %v13292_v45 = vpack.i.b16 %v13249_v0, %v3438_v61  ;;  %v11550_v9 = vpack.c.bf16 %v1318_v62, %v1318_v62 }
 0x122   : > { %v3689_v33 = vcombine.low %v13208_v4, %v11586_v22  ;;  %12023 = vmatpush1.bf16.msra.mxu1 %v12314_v54  ;;  %v13299_v24 = vrot.slane %v2751_v14, %v13102_v38  ;;  %v13302_v42 = vrot.slane %v2752_v41, %v13102_v38  ;;  %v2753_v43 = vcombine.low %v2736_v44, %v2750_v6  ;;  %v1272_v57 = vpop.f32.mrb[24].mxu0  ;;  %v12325_v4 = vld [vmem:[%s16453_s1 + $0x324] ss:$8 sps:$4 sm:$0xff]  }
 0x123   : > { %v2800_v53 = vrot.slane %v2266_v28, %v13102_v38  ;;  %12008 = vmatprep.subr.bf16.mxu1 %v12319_v21  ;;  %v3754_v15 = vcombine.low %v13289_v5, %v13292_v45  ;;  %v13311_v56 = vrot.slane %v11550_v9, %v13102_v38  ;;  %v1274_v17 = vpop.f32.mrb[25].mxu0  ;;  %v3690_v58 = vcombine.low %v11587_v12, %v11588_v18  ;;  %v12332_v5 = vld [vmem:[%s16453_s1 + $0x50] ss:$8 sps:$4 sm:$0xff]   ;;  %v12343_v45 = vld [vmem:[%s16453_s1 + $0x354] ss:$8 sps:$4 sm:$0xff]  }
 0x124   : > { %16603 = vst [vmem:[#allocation13_spill] sm:$0xff] %v13302_v42  ;;  %v3704_v6 = vrot.slane %v3688_v20, %v13102_v38  ;;  %5750 = vmatpush1.bf16.msra.mxu0 %v12308_v49  ;;  %v13321_v54 = vrot.slane %v2753_v43, %v13102_v38  ;;  %v13325_v23 = vcombine.high %v13299_v24, %v13299_v24  ;;  %v1276_v22 = vpop.f32.mrb[26].mxu0  ;;  %v12322_v20 = vld [vmem:[%s16453_s1 + $0x34] ss:$8 sps:$4 sm:$0xff]   ;;  %v12323_v49 = vld [vmem:[%s16453_s1 + $0x320] ss:$8 sps:$4 sm:$0xff]  }
 0x125   : > { %v2776_v35 = vcombine.high %v13302_v42, %v13302_v42  ;;  %v11548_v47 = vpack.c.bf16 %v1274_v17, %v1272_v57  ;;  %5751 = vmatprep.subr.bf16.mxu0 %v12313_v51  ;;  %v1278_v21 = vpop.f32.mrb[27].mxu0  ;;  %v1399_v59 = vpop.f32.mrb[28].mxu1  ;;  %v3711_v61 = vrot.slane %v3689_v33, %v13102_v38  ;;  %v3718_v62 = vrot.slane %v3690_v58, %v13102_v38  ;;  %v12331_v51 = vld [vmem:[%s16453_s1 + $0x334] ss:$8 sps:$4 sm:$0xff]   ;;  %v12320_v57 = vld [vmem:[%s16453_s1 + $0x30] ss:$8 sps:$4 sm:$0xff]  }
 0x126   : > { %16604 = vst [vmem:[#allocation14_spill] sm:$0xff] %v13325_v23  ;;  %v3720_v12 = vcombine.high %v13223_v63, %v3704_v6  ;;  %v3719_v18 = vcombine.low %v13223_v63, %v3704_v6  ;;  %12024 = vmatpush1.bf16.msra.mxu1 %v12317_v36  ;;  %v3445_v14 = vunpack.i.h.s16 %v13325_v23  ;;  %v11549_v28 = vpack.c.bf16 %v1278_v21, %v1276_v22  ;;  %v11945_v29 = vpop.f32.mrb[29].mxu1  ;;  %v12328_v22 = vld [vmem:[%s16453_s1 + $0x44] ss:$8 sps:$4 sm:$0xff]   ;;  %v12356_v23 = vld [vmem:[%s16453_s1 + $0x90] ss:$8 sps:$4 sm:$0xff]  }
 0x127   : > { %v3447_v41 = vunpack.i.h.s16 %v2776_v35  ;;  %v2786_v44 = vrot.slane %v11548_v47, %v13102_v38  ;;  %12009 = vmatprep.subr.bf16.mxu1 %v12325_v4  ;;  %v1402_v9 = vpop.f32.mrb[30].mxu1  ;;  %v3722_v33 = vcombine.high %v3711_v61, %v3718_v62  ;;  %v3721_v36 = vcombine.low %v3711_v61, %v3718_v62 }
 0x128   : > { %v3736_v63 = vrot.slane %v3720_v12, %v13102_v38  ;;  %v3729_v43 = vrot.slane %v3719_v18, %v13102_v38  ;;  %5752 = vmatpush1.bf16.msra.mxu0 %v12311_v3  ;;  %v13349_v17 = vpack.i.b16 %v2776_v35, %v3445_v14  ;;  %v11946_v47 = vpop.f32.mrb[31].mxu1  ;;  %v2793_v21 = vrot.slane %v11549_v28, %v13102_v38  ;;  %v12329_v35 = vld [vmem:[%s16453_s1 + $0x330] ss:$8 sps:$4 sm:$0xff]  }
 0x129   : > { %v13352_v4 = vpack.i.b16 %v13321_v54, %v3447_v41  ;;  %v2808_v58 = vcombine.low %v2786_v44, %v2800_v53  ;;  %v2809_v6 = vcombine.high %v2786_v44, %v2800_v53  ;;  %5753 = vmatprep.subr.bf16.mxu0 %v12322_v20  ;;  %v2269_v3 = vpack.c.bf16 %v1402_v9, %v1399_v59 }
 0x12a   : > { %v11553_v61 = vpack.c.bf16 %v1402_v9, %v1402_v9  ;;  %v3750_v62 = vrot.slane %v3722_v33, %v13102_v38  ;;  %12025 = vmatpush1.bf16.msra.mxu1 %v12323_v49  ;;  %v1356_v18 = vpop.f32.mrb[28].mxu0  ;;  %v3743_v59 = vrot.slane %v3721_v36, %v13102_v38  ;;  %v2810_v14 = vcombine.low %v2793_v21, %v13311_v56  ;;  %v12326_v56 = vld [vmem:[%s16453_s1 + $0x40] ss:$8 sps:$4 sm:$0xff]   ;;  %v12334_v21 = vld [vmem:[%s16453_s1 + $0x54] ss:$8 sps:$4 sm:$0xff]  }
 0x12b   : > { %v13365_v20 = vrot.slane %v2808_v58, %v13102_v38  ;;  %v13368_v12 = vrot.slane %v2809_v6, %v13102_v38  ;;  %12010 = vmatprep.subr.bf16.mxu1 %v12331_v51  ;;  %v2857_v49 = vrot.slane %v2269_v3, %v13102_v38  ;;  %v1358_v28 = vpop.f32.mrb[29].mxu0 }
 0x12c   : > { %v13374_v41 = vrot.slane %v11553_v61, %v13102_v38  ;;  %v3753_v44 = vcombine.low %v3736_v63, %v3750_v62  ;;  %5754 = vmatpush1.bf16.msra.mxu0 %v12320_v57  ;;  %v3752_v9 = vcombine.high %v3729_v43, %v3743_v59  ;;  %v11551_v33 = vpack.c.bf16 %v1358_v28, %v1356_v18  ;;  %v1360_v6 = vpop.f32.mrb[30].mxu0 }
 0x12d   : > { %v13378_v29 = vcombine.high %v13368_v12, %v13368_v12  ;;  %v3751_v58 = vcombine.low %v3729_v43, %v3743_v59  ;;  %5755 = vmatprep.subr.bf16.mxu0 %v12328_v22  ;;  %v13384_v51 = vrot.slane %v2810_v14, %v13102_v38  ;;  %v1362_v63 = vpop.f32.mrb[31].mxu0  ;;  %v1483_v36 = vpop.f32.mrb[32].mxu1  ;;  %v3450_v57 = vunpack.i.h.s16 %v13365_v20 }
 0x12e   : > { %4532 = vmatprep.mubr.bf16.mxu1 %v3753_v44  ;;  %v11591_v47 = vpack.i.b16 %v13365_v20, %v13321_v54  ;;  %v3755_v43 = vcombine.low %v13299_v24, %v13302_v42  ;;  %12026 = vmatpush1.bf16.msra.mxu1 %v12329_v35  ;;  %v2843_v3 = vrot.slane %v11551_v33, %v13102_v38  ;;  %v11951_v62 = vpop.f32.mrb[33].mxu1  ;;  %v12337_v54 = vld [vmem:[%s16453_s1 + $0x344] ss:$8 sps:$4 sm:$0xff]   ;;  %v3452_v25 = vunpack.i.h.s16 %v13368_v12 }
 0x12f   : > { %16605 = vst [vmem:[#allocation15_spill] sm:$0xff] %v13378_v29  ;;  %v3456_v22 = vunpack.i.h.s16 %v13378_v29  ;;  %4656 = vmatmul.mubr.bf16.gmra.mrb[76].mxu0 %v3752_v9  ;;  %4533 = vmatmul.mubr.bf16.gmra.mrb[76].mxu1 %v3751_v58  ;;  %v11552_v61 = vpack.c.bf16 %v1362_v63, %v1360_v6  ;;  %v11622_v18 = vcombine.high %v13299_v24, %v13302_v42  ;;  %v1486_v35 = vpop.f32.mrb[34].mxu1  ;;  %v12335_v9 = vld [vmem:[%s16453_s1 + $0x340] ss:$8 sps:$4 sm:$0xff]  }
 0x130   : > { %4665 = vmatprep.mubr.bf16.mxu0 %v16457_v1  ;;  %v11592_v59 = vpack.i.b16 %v13368_v12, %v3450_v57  ;;  %v3764_v14 = vrot.slane %v3754_v15, %v13102_v38  ;;  %v3771_v44 = vrot.slane %v3755_v43, %v13102_v38  ;;  %v13410_v28 = vcombine.high %v13365_v20, %v13365_v20  ;;  %v11952_v57 = vpop.f32.mrb[35].mxu1 }
 0x131   : > { %v13416_v33 = vpack.i.b16 %v13384_v51, %v3456_v22  ;;  %v2865_v58 = vcombine.low %v2843_v3, %v2857_v49  ;;  %v2866_v6 = vcombine.high %v2843_v3, %v2857_v49  ;;  %v2850_v63 = vrot.slane %v11552_v61, %v13102_v38  ;;  %5756 = vmatpush1.bf16.msra.mxu0 %v12326_v56  ;;  %v12340_v49 = vld [vmem:[%s16453_s1 + $0x64] ss:$8 sps:$4 sm:$0xff]  }
 0x132   : > { %16606 = vst [vmem:[#allocation16_spill] sm:$0xff] %v13410_v28  ;;  %v2272_v15 = vpack.c.bf16 %v1486_v35, %v1483_v36  ;;  %v11556_v43 = vpack.c.bf16 %v1486_v35, %v1486_v35  ;;  %v3757_v62 = vcombine.low %v11591_v47, %v11592_v59  ;;  %v13426_v22 = vrot.slane %v11622_v18, %v13102_v38  ;;  %v1440_v57 = vpop.f32.mrb[32].mxu0 }
 0x133   : > { %5757 = vmatprep.subr.bf16.mxu0 %v12334_v21  ;;  %v13432_v56 = vrot.slane %v2865_v58, %v13102_v38  ;;  %v13435_v3 = vrot.slane %v2866_v6, %v13102_v38  ;;  %v2867_v61 = vcombine.low %v2850_v63, %v13374_v41  ;;  %v3787_v36 = vcombine.high %v3764_v14, %v3771_v44  ;;  %v1442_v21 = vpop.f32.mrb[33].mxu0  ;;  %v12341_v58 = vld [vmem:[%s16453_s1 + $0x350] ss:$8 sps:$4 sm:$0xff]  }
 0x134   : > { %12011 = vmatprep.subr.bf16.mxu1 %v12337_v54  ;;  %v2914_v47 = vrot.slane %v2272_v15, %v13102_v38  ;;  %v13440_v18 = vrot.slane %v11556_v43, %v13102_v38  ;;  %v3785_v35 = vrot.slane %v3757_v62, %v13102_v38  ;;  %v3786_v59 = vcombine.low %v3764_v14, %v3771_v44  ;;  %v1444_v15 = vpop.f32.mrb[34].mxu0  ;;  %v12338_v14 = vld [vmem:[%s16453_s1 + $0x60] ss:$8 sps:$4 sm:$0xff]  }
 0x135   : > { %12027 = vmatpush1.bf16.msra.mxu1 %v12335_v9  ;;  %v13448_v41 = vcombine.high %v13432_v56, %v13432_v56  ;;  %v13452_v54 = vcombine.high %v13435_v3, %v13435_v3  ;;  %5758 = vmatpush1.bf16.msra.mxu0 %v12332_v5  ;;  %v13460_v44 = vrot.slane %v2867_v61, %v13102_v38  ;;  %v1446_v43 = vpop.f32.mrb[35].mxu0  ;;  %v1567_v62 = vpop.f32.mrb[36].mxu1  ;;  %v12346_v5 = vld [vmem:[%s16453_s1 + $0x74] ss:$8 sps:$4 sm:$0xff]  }
 0x136   : > { %12012 = vmatprep.subr.bf16.mxu1 %v12343_v45  ;;  %v11554_v9 = vpack.c.bf16 %v1442_v21, %v1440_v57  ;;  %v3789_v31 = vcombine.high %v13426_v22, %v3785_v35  ;;  %v3803_v39 = vrot.slane %v3787_v36, %v13102_v38  ;;  %5759 = vmatprep.subr.bf16.mxu0 %v12340_v49  ;;  %v11957_v53 = vpop.f32.mrb[37].mxu1  ;;  %v12349_v57 = vld [vmem:[%s16453_s1 + $0x364] ss:$8 sps:$4 sm:$0xff]  }
 0x137   : > { %16607 = vst [vmem:[#allocation17_spill] sm:$0xff] %v13448_v41  ;;  %v3463_v63 = vunpack.i.h.s16 %v13448_v41  ;;  %v3465_v34 = vunpack.i.h.s16 %v13452_v54  ;;  %v11555_v45 = vpack.c.bf16 %v1446_v43, %v1444_v15  ;;  %v3788_v61 = vcombine.low %v13426_v22, %v3785_v35  ;;  %v1570_v36 = vpop.f32.mrb[38].mxu1  ;;  %v12347_v53 = vld [vmem:[%s16453_s1 + $0x360] ss:$8 sps:$4 sm:$0xff]  }
 0x138   : > { %v2900_v21 = vrot.slane %v11554_v9, %v13102_v38  ;;  %v3817_v49 = vrot.slane %v3789_v31, %v13102_v38  ;;  %v3796_v6 = vrot.slane %v3786_v59, %v13102_v38  ;;  %v2275_v9 = vpack.c.bf16 %v1570_v36, %v1567_v62  ;;  %v11958_v43 = vpop.f32.mrb[39].mxu1  ;;  %v12344_v31 = vld [vmem:[%s16453_s1 + $0x70] ss:$8 sps:$4 sm:$0xff]  }
 0x139   : > { %12028 = vmatpush1.bf16.msra.mxu1 %v12341_v58  ;;  %v13481_v22 = vpack.i.b16 %v13452_v54, %v3463_v63  ;;  %v13484_v35 = vpack.i.b16 %v13460_v44, %v3465_v34  ;;  %v2907_v15 = vrot.slane %v11555_v45, %v13102_v38  ;;  %5760 = vmatpush1.bf16.msra.mxu0 %v12338_v14  ;;  %v12352_v63 = vld [vmem:[%s16453_s1 + $0x84] ss:$8 sps:$4 sm:$0xff]  }
 0x13a   : > { %v2922_v59 = vcombine.low %v2900_v21, %v2914_v47  ;;  %v2923_v58 = vcombine.high %v2900_v21, %v2914_v47  ;;  %v11559_v1 = vpack.c.bf16 %v1570_v36, %v1570_v36  ;;  %v3820_v40 = vcombine.low %v3803_v39, %v3817_v49  ;;  %5761 = vmatprep.subr.bf16.mxu0 %v12346_v5  ;;  %v1524_v45 = vpop.f32.mrb[36].mxu0 }
 0x13b   : > { %16608 = vst [vmem:[#allocation18_spill] sm:$0xff] %v13481_v22  ;;  %16609 = vst [vmem:[#allocation19_spill] sm:$0xff] %v13484_v35  ;;  %v2924_v62 = vcombine.low %v2907_v15, %v13440_v18  ;;  %v2971_v14 = vrot.slane %v2275_v9, %v13102_v38  ;;  %v3810_v43 = vrot.slane %v3788_v61, %v13102_v38  ;;  %12013 = vmatprep.subr.bf16.mxu1 %v12349_v57  ;;  %v1526_v21 = vpop.f32.mrb[37].mxu0  ;;  %v12355_v18 = vld [vmem:[%s16453_s1 + $0x374] ss:$8 sps:$4 sm:$0xff]  }
 0x13c   : > { %v13499_v47 = vrot.slane %v2922_v59, %v13102_v38  ;;  %v13502_v39 = vrot.slane %v2923_v58, %v13102_v38  ;;  %v13505_v5 = vrot.slane %v11559_v1, %v13102_v38  ;;  %4542 = vmatprep.mubr.bf16.mxu1 %v3820_v40  ;;  %v3454_v36 = vunpack.i.h.s16 %v13410_v28  ;;  %v1528_v9 = vpop.f32.mrb[38].mxu0  ;;  %v12350_v1 = vld [vmem:[%s16453_s1 + $0x80] ss:$8 sps:$4 sm:$0xff]   ;;  %v12373_v22 = vld [vmem:[%s16453_s1 + $0xb4] ss:$8 sps:$4 sm:$0xff]  }
 0x13d   : > { %12029 = vmatpush1.bf16.msra.mxu1 %v12347_v53  ;;  %v13512_v61 = vrot.slane %v2924_v62, %v13102_v38  ;;  %v3819_v57 = vcombine.high %v3796_v6, %v3810_v43  ;;  %v11557_v49 = vpack.c.bf16 %v1526_v21, %v1524_v45  ;;  %v3818_v15 = vcombine.low %v3796_v6, %v3810_v43  ;;  %v1530_v59 = vpop.f32.mrb[39].mxu0  ;;  %v1651_v58 = vpop.f32.mrb[40].mxu1 }
 0x13e   : > { %16610 = vst [vmem:[#allocation20_spill] sm:$0xff] %v13499_v47  ;;  %16611 = vst [vmem:[#allocation21_spill] sm:$0xff] %v13502_v39  ;;  %5762 = vmatpush1.bf16.msra.mxu0 %v12344_v31  ;;  %v13519_v40 = vcombine.high %v13499_v47, %v13499_v47  ;;  %v13523_v53 = vcombine.high %v13502_v39, %v13502_v39  ;;  %v11593_v62 = vpack.i.b16 %v13410_v28, %v3452_v25  ;;  %v12353_v31 = vld [vmem:[%s16453_s1 + $0x370] ss:$8 sps:$4 sm:$0xff]   ;;  %v11963_v21 = vpop.f32.mrb[41].mxu1 }
 0x13f   : > { %16612 = vst [vmem:[#allocation22_spill] sm:$0xff] %v13512_v61  ;;  %v11594_v6 = vpack.i.b16 %v13378_v29, %v3454_v36  ;;  %5763 = vmatprep.subr.bf16.mxu0 %v12352_v63  ;;  %4666 = vmatmul.mubr.bf16.gmra.mrb[80].mxu0 %v3819_v57  ;;  %v2957_v45 = vrot.slane %v11557_v49, %v13102_v38  ;;  %v12358_v25 = vld [vmem:[%s16453_s1 + $0x94] ss:$8 sps:$4 sm:$0xff]   ;;  %v1654_v29 = vpop.f32.mrb[42].mxu1  ;;  %v16615_v57 = vmov 0   ;;  %v3470_v30 = vunpack.i.h.s16 %v13502_v39 }
 0x140   : > { %16613 = vst [vmem:[#allocation23_spill] sm:$0xff] %v13519_v40  ;;  %16614 = vst [vmem:[#allocation24_spill] sm:$0xff] %v13523_v53  ;;  %4543 = vmatmul.mubr.bf16.gmra.mrb[80].mxu1 %v3818_v15  ;;  %v11558_v43 = vpack.c.bf16 %v1530_v59, %v1528_v9  ;;  %v11596_v34 = vpack.i.b16 %v13499_v47, %v13460_v44  ;;  %v3472_v63 = vunpack.i.h.s16 %v13519_v40  ;;  %v3474_v36 = vunpack.i.h.s16 %v13523_v53  ;;  %v12361_v44 = vld [vmem:[%s16453_s1 + $0x384] ss:$8 sps:$4 sm:$0xff]   ;;  %v11964_v28 = vpop.f32.mrb[43].mxu1 }
 0x141   : > { %4675 = vmatprep.mubr.bf16.mxu0 %v16615_v57  ;;  %v3821_v49 = vcombine.low %v11593_v62, %v11594_v6  ;;  %v3822_v15 = vcombine.low %v13416_v33, %v13432_v56  ;;  %12014 = vmatprep.subr.bf16.mxu1 %v12355_v18  ;;  %v2979_v9 = vcombine.low %v2957_v45, %v2971_v14  ;;  %v12359_v28 = vld [vmem:[%s16453_s1 + $0x380] ss:$8 sps:$4 sm:$0xff]  }
 0x142   : > { %v2980_v59 = vcombine.high %v2957_v45, %v2971_v14  ;;  %v2964_v21 = vrot.slane %v11558_v43, %v13102_v38  ;;  %v2278_v48 = vpack.c.bf16 %v1654_v29, %v1651_v58  ;;  %5764 = vmatpush1.bf16.msra.mxu0 %v12350_v1  ;;  %v13550_v62 = vpack.i.b16 %v13523_v53, %v3472_v63  ;;  %v12364_v14 = vld [vmem:[%s16453_s1 + $0xa4] ss:$8 sps:$4 sm:$0xff]   ;;  %v1608_v43 = vpop.f32.mrb[40].mxu0 }
 0x143   : > { %v13553_v33 = vpack.i.b16 %v13512_v61, %v3474_v36  ;;  %v11562_v18 = vpack.c.bf16 %v1654_v29, %v1654_v29  ;;  %v3823_v6 = vcombine.low %v13435_v3, %v13448_v41  ;;  %12030 = vmatpush1.bf16.msra.mxu1 %v12353_v31  ;;  %v13564_v1 = vrot.slane %v2979_v9, %v13102_v38  ;;  %v12367_v31 = vld [vmem:[%s16453_s1 + $0x394] ss:$8 sps:$4 sm:$0xff]   ;;  %v1610_v9 = vpop.f32.mrb[41].mxu0 }
 0x144   : > { %v13567_v58 = vrot.slane %v2980_v59, %v13102_v38  ;;  %v2981_v29 = vcombine.low %v2964_v21, %v13505_v5  ;;  %v3028_v45 = vrot.slane %v2278_v48, %v13102_v38  ;;  %5765 = vmatprep.subr.bf16.mxu0 %v12358_v25  ;;  %v3824_v59 = vcombine.low %v13452_v54, %v11596_v34  ;;  %v1612_v63 = vpop.f32.mrb[42].mxu0  ;;  %v12362_v54 = vld [vmem:[%s16453_s1 + $0xa0] ss:$8 sps:$4 sm:$0xff]  }
 0x145   : > { %v13577_v36 = vrot.slane %v11562_v18, %v13102_v38  ;;  %v3831_v11 = vrot.slane %v3821_v49, %v13102_v38  ;;  %12015 = vmatprep.subr.bf16.mxu1 %v12361_v44  ;;  %v13586_v5 = vcombine.high %v13564_v1, %v13564_v1  ;;  %v11560_v21 = vpack.c.bf16 %v1610_v9, %v1608_v43  ;;  %v1614_v34 = vpop.f32.mrb[43].mxu0  ;;  %v1735_v49 = vpop.f32.mrb[44].mxu1 }
 0x146   : > { %v13582_v48 = vrot.slane %v2981_v29, %v13102_v38  ;;  %v3004_v25 = vcombine.high %v13567_v58, %v13567_v58  ;;  %5766 = vmatpush1.bf16.msra.mxu0 %v12356_v23  ;;  %v3838_v44 = vrot.slane %v3822_v15, %v13102_v38  ;;  %v3845_v18 = vrot.slane %v3823_v6, %v13102_v38  ;;  %v12365_v23 = vld [vmem:[%s16453_s1 + $0x390] ss:$8 sps:$4 sm:$0xff]   ;;  %v11969_v0 = vpop.f32.mrb[45].mxu1  ;;  %v12370_v15 = vld [vmem:[%s16453_s1 + $0x3a4] ss:$8 sps:$4 sm:$0xff]  }
 0x147   : > { %16616 = vst [vmem:[#allocation25_spill] sm:$0xff] %v13586_v5  ;;  %v3852_v29 = vrot.slane %v3824_v59, %v13102_v38  ;;  %12031 = vmatpush1.bf16.msra.mxu1 %v12359_v28  ;;  %5767 = vmatprep.subr.bf16.mxu0 %v12364_v14  ;;  %v3481_v43 = vunpack.i.h.s16 %v13586_v5  ;;  %v3014_v27 = vrot.slane %v11560_v21, %v13102_v38  ;;  %v1738_v53 = vpop.f32.mrb[46].mxu1 }
 0x148   : > { %v3483_v9 = vunpack.i.h.s16 %v3004_v25  ;;  %v11561_v42 = vpack.c.bf16 %v1614_v34, %v1612_v63  ;;  %12016 = vmatprep.subr.bf16.mxu1 %v12367_v31  ;;  %v3854_v6 = vcombine.high %v3831_v11, %v3838_v44  ;;  %v3853_v28 = vcombine.low %v3831_v11, %v3838_v44  ;;  %v11970_v63 = vpop.f32.mrb[47].mxu1  ;;  %v12371_v34 = vld [vmem:[%s16453_s1 + $0xb0] ss:$8 sps:$4 sm:$0xff]  }
 0x149   : > { %v3856_v59 = vcombine.high %v3845_v18, %v3852_v29  ;;  %v3855_v14 = vcombine.low %v3845_v18, %v3852_v29  ;;  %v13608_v5 = vpack.i.b16 %v3004_v25, %v3481_v43  ;;  %v3036_v0 = vcombine.low %v3014_v27, %v3028_v45 }
 0x14a   : > { %v13611_v21 = vpack.i.b16 %v13582_v48, %v3483_v9  ;;  %v3037_v31 = vcombine.high %v3014_v27, %v3028_v45  ;;  %5768 = vmatpush1.bf16.msra.mxu0 %v12362_v54  ;;  %v3021_v11 = vrot.slane %v11561_v42, %v13102_v38  ;;  %v3870_v44 = vrot.slane %v3854_v6, %v13102_v38  ;;  %v1692_v43 = vpop.f32.mrb[44].mxu0 }
 0x14b   : > { %16617 = vst [vmem:[#allocation26_spill] sm:$0xff] %v13608_v5  ;;  %v3884_v18 = vrot.slane %v3856_v59, %v13102_v38  ;;  %v3863_v25 = vrot.slane %v3853_v28, %v13102_v38  ;;  %12032 = vmatpush1.bf16.msra.mxu1 %v12365_v23  ;;  %v13623_v27 = vrot.slane %v3036_v0, %v13102_v38  ;;  %v1694_v28 = vpop.f32.mrb[45].mxu0 }
 0x14c   : > { %16618 = vst [vmem:[#allocation27_spill] sm:$0xff] %v13611_v21  ;;  %v13626_v45 = vrot.slane %v3037_v31, %v13102_v38  ;;  %v3877_v54 = vrot.slane %v3855_v14, %v13102_v38  ;;  %12017 = vmatprep.subr.bf16.mxu1 %v12370_v15  ;;  %v3038_v42 = vcombine.low %v3021_v11, %v13577_v36  ;;  %v1696_v31 = vpop.f32.mrb[46].mxu0  ;;  %v12368_v14 = vld [vmem:[%s16453_s1 + $0x3a0] ss:$8 sps:$4 sm:$0xff]   ;;  %v16621_v15 = vunpack.i.h.s16 %v13499_v47 }
 0x14d   : > { %v3887_v9 = vcombine.low %v3870_v44, %v3884_v18  ;;  %v2281_v6 = vpack.c.bf16 %v1738_v53, %v1735_v49  ;;  %v11565_v59 = vpack.c.bf16 %v1738_v53, %v1738_v53  ;;  %5769 = vmatprep.subr.bf16.mxu0 %v12373_v22  ;;  %v11563_v29 = vpack.c.bf16 %v1694_v28, %v1692_v43  ;;  %v1698_v49 = vpop.f32.mrb[47].mxu0  ;;  %v1819_v44 = vpop.f32.mrb[48].mxu1  ;;  %v12376_v18 = vld [vmem:[%s16453_s1 + $0x3b4] ss:$8 sps:$4 sm:$0xff]  }
 0x14e   : > { %v13632_v23 = vcombine.high %v13626_v45, %v13626_v45  ;;  %v3886_v0 = vcombine.high %v3863_v25, %v3877_v54  ;;  %v3885_v63 = vcombine.low %v3863_v25, %v3877_v54  ;;  %5770 = vmatpush1.bf16.msra.mxu0 %v12371_v34  ;;  %v13638_v36 = vrot.slane %v3038_v42, %v13102_v38  ;;  %v11975_v42 = vpop.f32.mrb[49].mxu1 }
 0x14f   : > { %4552 = vmatprep.mubr.bf16.mxu1 %v3887_v9  ;;  %v3085_v53 = vrot.slane %v2281_v6, %v13102_v38  ;;  %v3092_v22 = vrot.slane %v11565_v59, %v13102_v38  ;;  %v11597_v11 = vpack.i.b16 %v13502_v39, %v16621_v15  ;;  %v3071_v25 = vrot.slane %v11563_v29, %v13102_v38  ;;  %v12379_v9 = vld [vmem:[%s16453_s1 + $0xc4] ss:$8 sps:$4 sm:$0xff]   ;;  %v1822_v29 = vpop.f32.mrb[50].mxu1 }
 0x150   : > { %16619 = vst [vmem:[#allocation28_spill] sm:$0xff] %v13632_v23  ;;  %16620 = vst [vmem:[#allocation29_spill] sm:$0xff] %v13638_v36  ;;  %v3492_v34 = vunpack.i.h.s16 %v13632_v23  ;;  %4676 = vmatmul.mubr.bf16.gmra.mrb[84].mxu0 %v3886_v0  ;;  %4553 = vmatmul.mubr.bf16.gmra.mrb[84].mxu1 %v3885_v63  ;;  %v11564_v54 = vpack.c.bf16 %v1698_v49, %v1696_v31  ;;  %v11598_v43 = vpack.i.b16 %v13519_v40, %v3470_v30  ;;  %v12377_v63 = vld [vmem:[%s16453_s1 + $0xc0] ss:$8 sps:$4 sm:$0xff]  }
 0x151   : > { %v3890_v6 = vcombine.low %v13564_v1, %v13567_v58  ;;  %v11623_v59 = vcombine.high %v13564_v1, %v13567_v58  ;;  %v16622_v28 = vcombine.low %v13550_v62, %v13553_v33  ;;  %4685 = vmatprep.mubr.bf16.mxu0 %v16615_v57  ;;  %v13665_v30 = vcombine.high %v13623_v27, %v13623_v27  ;;  %v11976_v62 = vpop.f32.mrb[51].mxu1  ;;  %v12374_v33 = vld [vmem:[%s16453_s1 + $0x3b0] ss:$8 sps:$4 sm:$0xff]  }
 0x152   : > { %v13671_v31 = vpack.i.b16 %v13638_v36, %v3492_v34  ;;  %v3093_v49 = vcombine.low %v3071_v25, %v3085_v53  ;;  %v3094_v15 = vcombine.high %v3071_v25, %v3085_v53  ;;  %v3078_v42 = vrot.slane %v11564_v54, %v13102_v38  ;;  %12033 = vmatpush1.bf16.msra.mxu1 %v12368_v14  ;;  %v12382_v53 = vld [vmem:[%s16453_s1 + $0x3c4] ss:$8 sps:$4 sm:$0xff]   ;;  %v1776_v39 = vpop.f32.mrb[48].mxu0 }
 0x153   : > { %v3905_v0 = vrot.slane %v16622_v28, %v13102_v38  ;;  %16623 = vst [vmem:[#allocation30_spill] sm:$0xff] %v13665_v30  ;;  %v12385_v28 = vld [vmem:[%s16453_s1 + $0xd4] ss:$8 sps:$4 sm:$0xff]   ;;  %v3888_v21 = vcombine.low %v11597_v11, %v11598_v43  ;;  %v3912_v5 = vrot.slane %v3890_v6, %v13102_v38  ;;  %v3919_v34 = vrot.slane %v11623_v59, %v13102_v38  ;;  %v12383_v59 = vld [vmem:[%s16453_s1 + $0xd0] ss:$8 sps:$4 sm:$0xff]  }
 0x154   : > { %v2284_v36 = vpack.c.bf16 %v1822_v29, %v1819_v44  ;;  %12018 = vmatprep.subr.bf16.mxu1 %v12376_v18  ;;  %v13686_v14 = vrot.slane %v3093_v49, %v13102_v38  ;;  %v13689_v25 = vrot.slane %v3094_v15, %v13102_v38  ;;  %v3095_v54 = vcombine.low %v3078_v42, %v3092_v22  ;;  %v1778_v18 = vpop.f32.mrb[49].mxu0 }
 0x155   : > { %v11568_v62 = vpack.c.bf16 %v1822_v29, %v1822_v29  ;;  %5771 = vmatprep.subr.bf16.mxu0 %v12379_v9  ;;  %v3898_v11 = vrot.slane %v3888_v21, %v13102_v38  ;;  %v3923_v43 = vcombine.high %v3912_v5, %v3919_v34  ;;  %v3922_v6 = vcombine.low %v3912_v5, %v3919_v34  ;;  %v12380_v9 = vld [vmem:[%s16453_s1 + $0x3c0] ss:$8 sps:$4 sm:$0xff]   ;;  %v1903_v40 = vpop.f32.mrb[52].mxu1  ;;  %v12388_v5 = vld [vmem:[%s16453_s1 + $0x3d4] ss:$8 sps:$4 sm:$0xff]  }
 0x156   : > { %16624 = vst [vmem:[#allocation31_spill] sm:$0xff] %v13689_v25  ;;  %v13693_v44 = vrot.slane %v2284_v36, %v13102_v38  ;;  %5772 = vmatpush1.bf16.msra.mxu0 %v12377_v63  ;;  %v13700_v49 = vcombine.high %v13686_v14, %v13686_v14  ;;  %v13704_v22 = vcombine.high %v13689_v25, %v13689_v25  ;;  %v1780_v36 = vpop.f32.mrb[50].mxu0  ;;  %v11981_v35 = vpop.f32.mrb[53].mxu1 }
 0x157   : > { %12034 = vmatpush1.bf16.msra.mxu1 %v12374_v33  ;;  %5773 = vmatprep.subr.bf16.mxu0 %v12385_v28  ;;  %v13712_v29 = vrot.slane %v3095_v54, %v13102_v38  ;;  %v3921_v63 = vcombine.high %v3898_v11, %v3905_v0  ;;  %v3951_v15 = vrot.slane %v3923_v43, %v13102_v38  ;;  %v1782_v34 = vpop.f32.mrb[51].mxu0  ;;  %v1906_v61 = vpop.f32.mrb[54].mxu1 }
 0x158   : > { %16625 = vst [vmem:[#allocation32_spill] sm:$0xff] %v13700_v49  ;;  %v3920_v42 = vcombine.low %v3898_v11, %v3905_v0  ;;  %12019 = vmatprep.subr.bf16.mxu1 %v12382_v53  ;;  %v3499_v33 = vunpack.i.h.s16 %v13700_v49  ;;  %v3501_v21 = vunpack.i.h.s16 %v13704_v22  ;;  %v3944_v28 = vrot.slane %v3922_v6, %v13102_v38  ;;  %v12391_v0 = vld [vmem:[%s16453_s1 + $0xe4] ss:$8 sps:$4 sm:$0xff]   ;;  %v11982_v8 = vpop.f32.mrb[55].mxu1 }
 0x159   : > { %v3149_v54 = vrot.slane %v11568_v62, %v13102_v38  ;;  %v3937_v11 = vrot.slane %v3921_v63, %v13102_v38  ;;  %v11566_v43 = vpack.c.bf16 %v1778_v18, %v1776_v39  ;;  %v11567_v47 = vpack.c.bf16 %v1782_v34, %v1780_v36  ;;  %v12386_v39 = vld [vmem:[%s16453_s1 + $0x3d0] ss:$8 sps:$4 sm:$0xff]  }
 0x15a   : > { %v3930_v53 = vrot.slane %v3920_v42, %v13102_v38  ;;  %5774 = vmatpush1.bf16.msra.mxu0 %v12383_v59  ;;  %v13728_v41 = vpack.i.b16 %v13704_v22, %v3499_v33  ;;  %v13731_v6 = vpack.i.b16 %v13712_v29, %v3501_v21  ;;  %v2287_v62 = vpack.c.bf16 %v1906_v61, %v1903_v40  ;;  %v12389_v21 = vld [vmem:[%s16453_s1 + $0xe0] ss:$8 sps:$4 sm:$0xff]   ;;  %v12394_v42 = vld [vmem:[%s16453_s1 + $0x3e4] ss:$8 sps:$4 sm:$0xff]  }
 0x15b   : > { %v11571_v35 = vpack.c.bf16 %v1906_v61, %v1906_v61  ;;  %12035 = vmatpush1.bf16.msra.mxu1 %v12380_v9  ;;  %v3954_v16 = vcombine.low %v3937_v11, %v3951_v15  ;;  %v3128_v63 = vrot.slane %v11566_v43, %v13102_v38  ;;  %v3135_v59 = vrot.slane %v11567_v47, %v13102_v38  ;;  %v1860_v61 = vpop.f32.mrb[52].mxu0 }
 0x15c   : > { %16626 = vst [vmem:[#allocation33_spill] sm:$0xff] %v13728_v41  ;;  %16627 = vst [vmem:[#allocation34_spill] sm:$0xff] %v13731_v6  ;;  %v3953_v37 = vcombine.high %v3930_v53, %v3944_v28  ;;  %v3952_v52 = vcombine.low %v3930_v53, %v3944_v28  ;;  %12020 = vmatprep.subr.bf16.mxu1 %v12388_v5  ;;  %v3199_v40 = vrot.slane %v2287_v62, %v13102_v38  ;;  %v1862_v9 = vpop.f32.mrb[53].mxu0 }
 0x15d   : > { %v13742_v8 = vrot.slane %v11571_v35, %v13102_v38  ;;  %5775 = vmatprep.subr.bf16.mxu0 %v12391_v0  ;;  %4562 = vmatprep.mubr.bf16.mxu1 %v3954_v16  ;;  %v3150_v5 = vcombine.low %v3128_v63, %v13693_v44  ;;  %v3151_v36 = vcombine.high %v3128_v63, %v13693_v44  ;;  %v3486_v47 = vunpack.i.h.s16 %v13623_v27  ;;  %v1864_v28 = vpop.f32.mrb[54].mxu0  ;;  %v12397_v44 = vld [vmem:[%s16453_s1 + $0xf4] ss:$8 sps:$4 sm:$0xff]  }
 0x15e   : > { %4686 = vmatmul.mubr.bf16.gmra.mrb[88].mxu0 %v3953_v37  ;;  %v3488_v15 = vunpack.i.h.s16 %v13626_v45  ;;  %4563 = vmatmul.mubr.bf16.gmra.mrb[88].mxu1 %v3952_v52  ;;  %v3152_v34 = vcombine.low %v3135_v59, %v3149_v54  ;;  %v11569_v33 = vpack.c.bf16 %v1862_v9, %v1860_v61  ;;  %v3490_v37 = vunpack.i.h.s16 %v13665_v30  ;;  %v1866_v52 = vpop.f32.mrb[55].mxu0  ;;  %v13767_v54 = vpop.f32.mrb[56].mxu1 }
 0x15f   : > { %4695 = vmatprep.mubr.bf16.mxu0 %v16615_v57  ;;  %v11601_v16 = vpack.i.b16 %v13623_v27, %v13582_v48  ;;  %v13762_v0 = vrot.slane %v3150_v5, %v13102_v38  ;;  %v13765_v11 = vrot.slane %v3151_v36, %v13102_v38  ;;  %v11602_v53 = vpack.i.b16 %v13626_v45, %v3486_v47  ;;  %v12392_v48 = vld [vmem:[%s16453_s1 + $0x3e0] ss:$8 sps:$4 sm:$0xff]   ;;  %v11987_v59 = vpop.f32.mrb[57].mxu1  ;;  %v12395_v5 = vld [vmem:[%s16453_s1 + $0xf0] ss:$8 sps:$4 sm:$0xff]  }
 0x160   : > { %v11603_v43 = vpack.i.b16 %v13665_v30, %v3488_v15  ;;  %12036 = vmatpush1.bf16.msra.mxu1 %v12386_v39  ;;  %v13775_v62 = vrot.slane %v3152_v34, %v13102_v38  ;;  %v3185_v35 = vrot.slane %v11569_v33, %v13102_v38  ;;  %v11570_v63 = vpack.c.bf16 %v1866_v52, %v1864_v28  ;;  %v1990_v15 = vpop.f32.mrb[58].mxu1 }
 0x161   : > { %16628 = vst [vmem:[#allocation35_spill] sm:$0xff] %v13762_v0  ;;  %16629 = vst [vmem:[#allocation36_spill] sm:$0xff] %v13765_v11  ;;  %v11604_v61 = vpack.i.b16 %v13632_v23, %v3490_v37  ;;  %5776 = vmatpush1.bf16.msra.mxu0 %v12389_v21  ;;  %v13784_v39 = vcombine.high %v13762_v0, %v13762_v0  ;;  %v13788_v36 = vcombine.high %v13765_v11, %v13765_v11  ;;  %v12400_v21 = vld [vmem:[%s16453_s1 + $0x3f4] ss:$8 sps:$4 sm:$0xff]   ;;  %v11988_v52 = vpop.f32.mrb[59].mxu1 }
 0x162   : > { %16630 = vst [vmem:[#allocation37_spill] sm:$0xff] %v13775_v62  ;;  %v3955_v9 = vcombine.low %v11601_v16, %v11602_v53  ;;  %v3957_v47 = vcombine.low %v13671_v31, %v13686_v14  ;;  %12021 = vmatprep.subr.bf16.mxu1 %v12394_v42  ;;  %v3207_v34 = vcombine.low %v3185_v35, %v3199_v40  ;;  %v12403_v16 = vld [vmem:[%s16453_s1 + $0x104] ss:$8 sps:$4 sm:$0xff]  }
 0x163   : > { %16631 = vst [vmem:[#allocation38_spill] sm:$0xff] %v13784_v39  ;;  %16632 = vst [vmem:[#allocation39_spill] sm:$0xff] %v13788_v36  ;;  %v3208_v33 = vcombine.high %v3185_v35, %v3199_v40  ;;  %v3192_v28 = vrot.slane %v11570_v63, %v13102_v38  ;;  %v3956_v37 = vcombine.low %v11603_v43, %v11604_v61  ;;  %5777 = vmatprep.subr.bf16.mxu0 %v12397_v44  ;;  %v12398_v40 = vld [vmem:[%s16453_s1 + $0x3f0] ss:$8 sps:$4 sm:$0xff]   ;;  %v1944_v61 = vpop.f32.mrb[56].mxu0 }
 0x164   : > { %v3508_v53 = vunpack.i.h.s16 %v13784_v39  ;;  %v3510_v31 = vunpack.i.h.s16 %v13788_v36  ;;  %v3958_v42 = vcombine.low %v13689_v25, %v13700_v49  ;;  %v3965_v59 = vrot.slane %v3955_v9, %v13102_v38  ;;  %12037 = vmatpush1.bf16.msra.mxu1 %v12392_v48  ;;  %v12412_v48 = vld [vmem:[%s16453_s1 + $0x404] ss:$8 sps:$4 sm:$0xff]   ;;  %v1946_v18 = vpop.f32.mrb[57].mxu0 }
 0x165   : > { %v13808_v44 = vrot.slane %v3207_v34, %v13102_v38  ;;  %v13811_v43 = vrot.slane %v3208_v33, %v13102_v38  ;;  %v3209_v35 = vcombine.low %v3192_v28, %v13742_v8  ;;  %v3972_v63 = vrot.slane %v3956_v37, %v13102_v38  ;;  %5778 = vmatpush1.bf16.msra.mxu0 %v12395_v5  ;;  %v2071_v30 = vpop.f32.mrb[60].mxu1 }
 0x166   : > { %v13819_v9 = vpack.i.b16 %v13788_v36, %v3508_v53  ;;  %v13822_v52 = vpack.i.b16 %v13775_v62, %v3510_v31  ;;  %v3979_v34 = vrot.slane %v3957_v47, %v13102_v38  ;;  %v3986_v33 = vrot.slane %v3958_v42, %v13102_v38  ;;  %12022 = vmatprep.subr.bf16.mxu1 %v12400_v21  ;;  %v1948_v53 = vpop.f32.mrb[58].mxu0  ;;  %v11993_v6 = vpop.f32.mrb[61].mxu1 }
 0x167   : > { %v13827_v8 = vrot.slane %v3209_v35, %v13102_v38  ;;  %v13831_v5 = vcombine.high %v13808_v44, %v13808_v44  ;;  %v3232_v28 = vcombine.high %v13811_v43, %v13811_v43  ;;  %v3988_v37 = vcombine.high %v3965_v59, %v3972_v63  ;;  %5870 = vmatprep.subr.bf16.mxu0 %v12403_v16  ;;  %v1950_v21 = vpop.f32.mrb[59].mxu0 }
 0x168   : > { %v3990_v31 = vcombine.high %v3979_v34, %v3986_v33  ;;  %v3987_v42 = vcombine.low %v3965_v59, %v3972_v63  ;;  %v3989_v23 = vcombine.low %v3979_v34, %v3986_v33  ;;  %12038 = vmatpush1.bf16.msra.mxu1 %v12398_v40  ;;  %v2290_v41 = vpack.c.bf16 %v1990_v15, %v13767_v54  ;;  %v2074_v63 = vpop.f32.mrb[62].mxu1 }
 0x169   : > { %16633 = vst [vmem:[#allocation40_spill] sm:$0xff] %v13831_v5  ;;  %v3517_v35 = vunpack.i.h.s16 %v13831_v5  ;;  %v3519_v36 = vunpack.i.h.s16 %v3232_v28  ;;  %v4004_v62 = vrot.slane %v3988_v37, %v13102_v38  ;;  %8144 = vmatprep.subr.bf16.mxu1 %v12412_v48  ;;  %v11574_v59 = vpack.c.bf16 %v1990_v15, %v1990_v15  ;;  %v11994_v5 = vpop.f32.mrb[63].mxu1 }
 0x16a   : > { %v4018_v16 = vrot.slane %v3990_v31, %v13102_v38  ;;  %v3997_v49 = vrot.slane %v3987_v42, %v13102_v38  ;;  %v4011_v47 = vrot.slane %v3989_v23, %v13102_v38  ;;  %v3256_v33 = vrot.slane %v2290_v41, %v13102_v38 }
 0x16b   : > { %v13843_v34 = vpack.i.b16 %v3232_v28, %v3517_v35  ;;  %v13846_v40 = vpack.i.b16 %v13827_v8, %v3519_v36  ;;  %v11572_v37 = vpack.c.bf16 %v1946_v18, %v1944_v61  ;;  %v3263_v48 = vrot.slane %v11574_v59, %v13102_v38  ;;  %v2028_v35 = vpop.f32.mrb[60].mxu0 }
 0x16c   : > { %v4021_v54 = vcombine.low %v4004_v62, %v4018_v16  ;;  %v4020_v6 = vcombine.high %v3997_v49, %v4011_v47  ;;  %v4019_v31 = vcombine.low %v3997_v49, %v4011_v47  ;;  %v11573_v15 = vpack.c.bf16 %v1950_v21, %v1948_v53  ;;  %v2030_v25 = vpop.f32.mrb[61].mxu0 }
 0x16d   : > { %16634 = vst [vmem:[#allocation41_spill] sm:$0xff] %v13843_v34  ;;  %16635 = vst [vmem:[#allocation42_spill] sm:$0xff] %v13846_v40  ;;  %v3242_v23 = vrot.slane %v11572_v37, %v13102_v38  ;;  %v2293_v28 = vpack.c.bf16 %v2074_v63, %v2071_v30  ;;  %v11577_v36 = vpack.c.bf16 %v2074_v63, %v2074_v63  ;;  %v3504_v41 = vunpack.i.h.s16 %v13762_v0  ;;  %v2032_v30 = vpop.f32.mrb[62].mxu0  ;;  %v2155_v37 = vpop.f32.mrb[64].mxu1 }
 0x16e   : > { %4572 = vmatprep.mubr.bf16.mxu1 %v4021_v54  ;;  %4696 = vmatmul.mubr.bf16.gmra.mrb[92].mxu0 %v4020_v6  ;;  %v3506_v18 = vunpack.i.h.s16 %v13765_v11  ;;  %v11606_v62 = vpack.i.b16 %v13762_v0, %v13712_v29  ;;  %v3249_v5 = vrot.slane %v11573_v15, %v13102_v38  ;;  %v11575_v21 = vpack.c.bf16 %v2030_v25, %v2028_v35  ;;  %v2034_v16 = vpop.f32.mrb[63].mxu0 }
 0x16f   : > { %4573 = vmatmul.mubr.bf16.gmra.mrb[92].mxu1 %v4019_v31  ;;  %v3264_v49 = vcombine.low %v3242_v23, %v3256_v33  ;;  %v3265_v61 = vcombine.high %v3242_v23, %v3256_v33  ;;  %v3313_v53 = vrot.slane %v2293_v28, %v13102_v38  ;;  %v3320_v47 = vrot.slane %v11577_v36, %v13102_v38  ;;  %v11999_v31 = vpop.f32.mrb[65].mxu1 }
 0x170   : > { %4705 = vmatprep.mubr.bf16.mxu0 %v16615_v57  ;;  %v11607_v59 = vpack.i.b16 %v13765_v11, %v3504_v41  ;;  %v11608_v63 = vpack.i.b16 %v13784_v39, %v3506_v18  ;;  %v3266_v54 = vcombine.low %v3249_v5, %v3263_v48  ;;  %v11576_v6 = vpack.c.bf16 %v2034_v16, %v2032_v30  ;;  %v2158_v35 = vpop.f32.mrb[66].mxu1 }
 0x171   : > { %v13864_v29 = vrot.slane %v3264_v49, %v13102_v38  ;;  %v13867_v33 = vrot.slane %v3265_v61, %v13102_v38  ;;  %v3299_v23 = vrot.slane %v11575_v21, %v13102_v38  ;;  %v4022_v25 = vcombine.low %v13704_v22, %v11606_v62  ;;  %v12000_v22 = vpop.f32.mrb[67].mxu1 }
 0x172   : > { %v4023_v15 = vcombine.low %v11607_v59, %v11608_v63  ;;  %v4025_v28 = vcombine.low %v13808_v44, %v13811_v43  ;;  %v13874_v36 = vrot.slane %v3266_v54, %v13102_v38  ;;  %v3306_v48 = vrot.slane %v11576_v6, %v13102_v38  ;;  %v2112_v54 = vpop.f32.mrb[64].mxu0 }
 0x173   : > { %16636 = vst [vmem:[#allocation43_spill] sm:$0xff] %v13864_v29  ;;  %v13878_v41 = vcombine.high %v13867_v33, %v13867_v33  ;;  %v16639_v18 = vcombine.low %v13819_v9, %v13822_v52  ;;  %v3321_v62 = vcombine.low %v3299_v23, %v3313_v53  ;;  %v3322_v61 = vcombine.high %v3299_v23, %v3313_v53  ;;  %v2114_v53 = vpop.f32.mrb[65].mxu0 }
 0x174   : > { %16637 = vst [vmem:[#allocation44_spill] sm:$0xff] %v13874_v36  ;;  %v4032_v5 = vrot.slane %v4022_v25, %v13102_v38  ;;  %v4039_v30 = vrot.slane %v4023_v15, %v13102_v38  ;;  %v3323_v16 = vcombine.low %v3306_v48, %v3320_v47  ;;  %v4053_v59 = vrot.slane %v4025_v28, %v13102_v38  ;;  %v2116_v28 = vpop.f32.mrb[66].mxu0 }
 0x175   : > { %16638 = vst [vmem:[#allocation45_spill] sm:$0xff] %v13878_v41  ;;  %v4046_v49 = vrot.slane %v16639_v18, %v13102_v38  ;;  %v3528_v21 = vunpack.i.h.s16 %v13878_v41  ;;  %v2296_v63 = vpack.c.bf16 %v2158_v35, %v2155_v37  ;;  %v13890_v6 = vrot.slane %v3321_v62, %v13102_v38  ;;  %v2118_v62 = vpop.f32.mrb[67].mxu0 }
 0x176   : > { %v13893_v9 = vrot.slane %v3322_v61, %v13102_v38  ;;  %v4055_v52 = vcombine.high %v4032_v5, %v4039_v30  ;;  %v4054_v31 = vcombine.low %v4032_v5, %v4039_v30  ;;  %v13899_v25 = vrot.slane %v3323_v16, %v13102_v38  ;;  %v2239_v61 = vpop.f32.mrb[68].mxu1 }
 0x177   : > { %16640 = vst [vmem:[#allocation46_spill] sm:$0xff] %v13890_v6  ;;  %v13896_v23 = vpack.i.b16 %v13874_v36, %v3528_v21  ;;  %v4057_v47 = vcombine.high %v4046_v49, %v4053_v59  ;;  %v4056_v15 = vcombine.low %v4046_v49, %v4053_v59  ;;  %v13903_v37 = vcombine.high %v13890_v6, %v13890_v6  ;;  %v12005_v16 = vpop.f32.mrb[69].mxu1 }
 0x178   : > { %v13907_v48 = vcombine.high %v13893_v9, %v13893_v9  ;;  %v4071_v5 = vrot.slane %v4055_v52, %v13102_v38  ;;  %v4064_v49 = vrot.slane %v4054_v31, %v13102_v38  ;;  %v11580_v36 = vpack.c.bf16 %v2158_v35, %v2158_v35  ;;  %v2242_v40 = vpop.f32.mrb[70].mxu1 }
 0x179   : > { %v4085_v30 = vrot.slane %v4057_v47, %v13102_v38  ;;  %v4078_v21 = vrot.slane %v4056_v15, %v13102_v38  ;;  %v3535_v59 = vunpack.i.h.s16 %v13903_v37  ;;  %v3370_v18 = vrot.slane %v2296_v63, %v13102_v38  ;;  %v12006_v52 = vpop.f32.mrb[71].mxu1 }
 0x17a   : > { %v3537_v42 = vunpack.i.h.s16 %v13907_v48  ;;  %v11578_v39 = vpack.c.bf16 %v2114_v53, %v2112_v54  ;;  %v3377_v15 = vrot.slane %v11580_v36, %v13102_v38  ;;  %v11579_v16 = vpack.c.bf16 %v2118_v62, %v2116_v28  ;;  %v2196_v63 = vpop.f32.mrb[68].mxu0 }
 0x17b   : > { %v4088_v22 = vcombine.low %v4071_v5, %v4085_v30  ;;  %v4087_v34 = vcombine.high %v4064_v49, %v4078_v21  ;;  %v4086_v11 = vcombine.low %v4064_v49, %v4078_v21  ;;  %v13919_v47 = vpack.i.b16 %v13907_v48, %v3535_v59 }
 0x17c   : > { %v13922_v31 = vpack.i.b16 %v13899_v25, %v3537_v42  ;;  %v3356_v35 = vrot.slane %v11578_v39, %v13102_v38  ;;  %v2299_v0 = vpack.c.bf16 %v2242_v40, %v2239_v61  ;;  %v11770_v5 = vpack.c.bf16 %v2242_v40, %v2242_v40  ;;  %v2198_v42 = vpop.f32.mrb[69].mxu0 }
 0x17d   : > { %16641 = vst [vmem:[#allocation47_spill] sm:$0xff] %v13919_v47  ;;  %4582 = vmatprep.mubr.bf16.mxu1 %v4088_v22  ;;  %4706 = vmatmul.mubr.bf16.gmra.mrb[96].mxu0 %v4087_v34  ;;  %v3522_v30 = vunpack.i.h.s16 %v13864_v29  ;;  %v3363_v53 = vrot.slane %v11579_v16, %v13102_v38  ;;  %v13933_v36 = vcombine.high %v13864_v29, %v13864_v29  ;;  %v3524_v39 = vunpack.i.h.s16 %v13867_v33  ;;  %v2200_v62 = vpop.f32.mrb[70].mxu0 }
 0x17e   : > { %16642 = vst [vmem:[#allocation48_spill] sm:$0xff] %v13922_v31  ;;  %4583 = vmatmul.mubr.bf16.gmra.mrb[96].mxu1 %v4086_v11  ;;  %4715 = vmatprep.mubr.bf16.mxu0 %v16615_v57  ;;  %v3378_v34 = vcombine.low %v3356_v35, %v3370_v18  ;;  %v3379_v28 = vcombine.high %v3356_v35, %v3370_v18  ;;  %v2202_v59 = vpop.f32.mrb[71].mxu0 }
 0x17f   : > { %16643 = vst [vmem:[#allocation49_spill] sm:$0xff] %v13933_v36  ;;  %v11768_v40 = vpack.c.bf16 %v2198_v42, %v2196_v63  ;;  %v7099_v22 = vrot.slane %v2299_v0, %v13102_v38  ;;  %v3380_v61 = vcombine.low %v3363_v53, %v3377_v15  ;;  %v7106_v11 = vrot.slane %v11770_v5, %v13102_v38 }
 0x180   : > { %v3526_v49 = vunpack.i.h.s16 %v13933_v36  ;;  %v11611_v21 = vpack.i.b16 %v13864_v29, %v13827_v8  ;;  %v13942_v52 = vrot.slane %v3378_v34, %v13102_v38  ;;  %v13945_v16 = vrot.slane %v3379_v28, %v13102_v38 }
 0x181   : > { %v7085_v18 = vrot.slane %v11768_v40, %v13102_v38  ;;  %v11612_v0 = vpack.i.b16 %v13867_v33, %v3522_v30  ;;  %v13950_v15 = vrot.slane %v3380_v61, %v13102_v38  ;;  %v11613_v35 = vpack.i.b16 %v13933_v36, %v3524_v39 }
 0x182   : > { %v11614_v63 = vpack.i.b16 %v13878_v41, %v3526_v49  ;;  %v11624_v8 = vcombine.high %v13808_v44, %v13811_v43  ;;  %v13958_v5 = vcombine.high %v13942_v52, %v13942_v52  ;;  %v13962_v53 = vcombine.high %v13945_v16, %v13945_v16 }
 0x183   : > { %16644 = vst [vmem:[#allocation50_spill] sm:$0xff] %v13950_v15  ;;  %v3540_v30 = vunpack.i.h.s16 %v13942_v52  ;;  %v3542_v42 = vunpack.i.h.s16 %v13945_v16  ;;  %v7107_v34 = vcombine.low %v7085_v18, %v7099_v22  ;;  %v7108_v28 = vcombine.high %v7085_v18, %v7099_v22 }
 0x184   : > { %16645 = vst [vmem:[#allocation51_spill] sm:$0xff] %v13962_v53  ;;  %v4090_v39 = vcombine.low %v11611_v21, %v11612_v0  ;;  %v4091_v40 = vcombine.low %v11613_v35, %v11614_v63  ;;  %v3544_v61 = vunpack.i.h.s16 %v13958_v5  ;;  %v3546_v49 = vunpack.i.h.s16 %v13962_v53 }
 0x185   : > { %v4092_v54 = vcombine.low %v13896_v23, %v13890_v6  ;;  %v4099_v41 = vrot.slane %v11624_v8, %v13102_v38  ;;  %v13972_v36 = vrot.slane %v7107_v34, %v13102_v38  ;;  %v13975_v47 = vrot.slane %v7108_v28, %v13102_v38 }
 0x186   : > { %v4106_v31 = vrot.slane %v4090_v39, %v13102_v38  ;;  %v4113_v22 = vrot.slane %v4091_v40, %v13102_v38  ;;  %v11619_v21 = vpack.i.b16 %v13962_v53, %v3544_v61  ;;  %v11620_v18 = vpack.i.b16 %v13950_v15, %v3546_v49 }
 0x187   : > { %v4120_v0 = vrot.slane %v4092_v54, %v13102_v38  ;;  %v11769_v35 = vpack.c.bf16 %v2202_v59, %v2200_v62  ;;  %v13984_v23 = vcombine.high %v13972_v36, %v13972_v36  ;;  %v7132_v63 = vcombine.high %v13975_v47, %v13975_v47 }
 0x188   : > { %v7134_v8 = vunpack.i.h.s16 %v13972_v36  ;;  %v4159_v28 = vcombine.low %v11619_v21, %v11620_v18  ;;  %v4122_v40 = vcombine.high %v4099_v41, %v4106_v31  ;;  %v4121_v59 = vcombine.low %v4099_v41, %v4106_v31 }
 0x189   : > { %v4124_v61 = vcombine.high %v4113_v22, %v4120_v0  ;;  %v7138_v54 = vunpack.i.h.s16 %v13984_v23  ;;  %v4123_v49 = vcombine.low %v4113_v22, %v4120_v0  ;;  %v7092_v29 = vrot.slane %v11769_v35, %v13102_v38 }
 0x18a   : > { %v13994_v62 = vpack.i.b16 %v13975_v47, %v7134_v8  ;;  %v4138_v53 = vrot.slane %v4122_v40, %v13102_v38  ;;  %v7140_v34 = vunpack.i.h.s16 %v7132_v63  ;;  %v4131_v21 = vrot.slane %v4121_v59, %v13102_v38 }
 0x18b   : > { %v4152_v6 = vrot.slane %v4124_v61, %v13102_v38  ;;  %v4145_v18 = vrot.slane %v4123_v49, %v13102_v38  ;;  %v14001_v39 = vpack.i.b16 %v7132_v63, %v7138_v54  ;;  %v11616_v15 = vpack.i.b16 %v13942_v52, %v13899_v25 }
 0x18c   : > { %16646 = vst [vmem:[#allocation52_spill] sm:$0xff] %v13994_v62  ;;  %v7109_v62 = vcombine.low %v7092_v29, %v7106_v11  ;;  %v11617_v41 = vpack.i.b16 %v13945_v16, %v3540_v30  ;;  %v11618_v31 = vpack.i.b16 %v13958_v5, %v3542_v42  ;;  %v4156_v35 = vcombine.low %v13893_v9, %v13903_v37 }
 0x18d   : > { %v4155_v8 = vcombine.low %v4138_v53, %v4152_v6  ;;  %v4154_v22 = vcombine.high %v4131_v21, %v4145_v18  ;;  %v4153_v0 = vcombine.low %v4131_v21, %v4145_v18  ;;  %v4157_v40 = vcombine.low %v13907_v48, %v11616_v15 }
 0x18e   : > { %v7123_v63 = vrot.slane %v7109_v62, %v13102_v38  ;;  %v4158_v61 = vcombine.low %v11617_v41, %v11618_v31  ;;  %v4187_v54 = vrot.slane %v4159_v28, %v13102_v38  ;;  %v16647_v29 = vcombine.low %v13151_v32, %v13177_v7 }
 0x18f   : > { %4592 = vmatprep.mubr.bf16.mxu1 %v4155_v8  ;;  %4716 = vmatmul.mubr.bf16.gmra.mrb[100].mxu0 %v4154_v22  ;;  %v4166_v25 = vrot.slane %v4156_v35, %v13102_v38  ;;  %v4173_v11 = vrot.slane %v4157_v40, %v13102_v38  ;;  %v14020_v48 = vpack.i.b16 %v13432_v56, %v13384_v51  ;;  %v16648_v62 = vunpack.i.h.s16 %v13432_v56 }
 0x190   : > { %v4908_v6 = vrot.slane %v16647_v29, %v13102_v38  ;;  %4593 = vmatmul.mubr.bf16.gmra.mrb[100].mxu1 %v4153_v0  ;;  %v14023_v53 = vpack.i.b16 %v7123_v63, %v7140_v34  ;;  %4725 = vmatprep.mubr.bf16.mxu0 %v16615_v57  ;;  %v4180_v30 = vrot.slane %v4158_v61, %v13102_v38 }
 0x191   : > { %v4189_v42 = vcombine.high %v4166_v25, %v4173_v11  ;;  %v4188_v28 = vcombine.low %v4166_v25, %v4173_v11  ;;  %v14032_v59 = vpack.i.b16 %v13435_v3, %v16648_v62  ;;  %v7286_v51 = vcombine.low %v13365_v20, %v13368_v12 }
 0x192   : > { %v4911_v32 = vcombine.low %v13200_v60, %v4908_v6  ;;  %v4912_v7 = vcombine.high %v13200_v60, %v4908_v6  ;;  %v4191_v49 = vcombine.high %v4180_v30, %v4187_v54  ;;  %v4190_v21 = vcombine.low %v4180_v30, %v4187_v54 }
 0x193   : > { %v4205_v8 = vrot.slane %v4189_v42, %v13102_v38  ;;  %v4198_v60 = vrot.slane %v4188_v28, %v13102_v38  ;;  %v11777_v56 = vcombine.high %v13365_v20, %v13368_v12  ;;  %v7288_v41 = vcombine.low %v14020_v48, %v14032_v59 }
 0x194   : > { %v4940_v18 = vrot.slane %v4912_v7, %v13102_v38  ;;  %v4219_v31 = vrot.slane %v4191_v49, %v13102_v38  ;;  %v4212_v22 = vrot.slane %v4190_v21, %v13102_v38  ;;  %v16649_v35 = vcombine.low %v13349_v17, %v13352_v4 }
 0x195   : > { %v7302_v63 = vrot.slane %v7286_v51, %v13102_v38  ;;  %v7309_v61 = vrot.slane %v11777_v56, %v13102_v38  ;;  %v7316_v54 = vrot.slane %v7288_v41, %v13102_v38  ;;  %v14056_v29 = vrot.slane %v4911_v32, %v13102_v38  ;;  %v16653_v56 = vld [vmem:[#allocation5_spill] sm:$0xff]  ;;  %v16654_v41 = vld [vmem:[#allocation2_spill] sm:$0xff] }
 0x196   : > { %v4943_v0 = vcombine.low %v13126_v55, %v4940_v18  ;;  %v7295_v40 = vrot.slane %v16649_v35, %v13102_v38  ;;  %v4222_v6 = vcombine.low %v4205_v8, %v4219_v31  ;;  %v4221_v25 = vcombine.high %v4198_v60, %v4212_v22 }
 0x197   : > { %16650 = vst [vmem:[#allocation53_spill] sm:$0xff] %v14056_v29  ;;  %v4220_v11 = vcombine.low %v4198_v60, %v4212_v22  ;;  %v14060_v55 = vpack.i.b16 %v13192_v13, %v13173_v46  ;;  %v7319_v42 = vcombine.low %v7309_v61, %v7316_v54  ;;  %v7320_v28 = vcombine.high %v7309_v61, %v7316_v54 }
 0x198   : > { %v7317_v30 = vcombine.low %v7295_v40, %v7302_v63  ;;  %v7318_v7 = vcombine.high %v7295_v40, %v7302_v63  ;;  %4602 = vmatprep.mubr.bf16.mxu1 %v4222_v6  ;;  %4726 = vmatmul.mubr.bf16.gmra.mrb[104].mxu0 %v4221_v25  ;;  %v4941_v62 = vcombine.low %v13159_v50, %v14056_v29  ;;  %v16651_v51 = vunpack.i.h.s16 %v13192_v13  ;;  %v16656_v63 = vld [vmem:[#allocation6_spill] sm:$0xff] }
 0x199   : > { %v16652_v49 = vunpack.i.h.s16 %v13195_v19  ;;  %4603 = vmatmul.mubr.bf16.gmra.mrb[104].mxu1 %v4220_v11  ;;  %5779 = vmatprep.mubr.bf16.mxu0 %v4943_v0  ;;  %v7348_v8 = vrot.slane %v7320_v28, %v13102_v38  ;;  %v4944_v60 = vcombine.low %v13142_v26, %v13146_v10  ;;  %v4945_v31 = vcombine.low %v16654_v41, %v16653_v56  ;;  %v12410_v13 = vld [vmem:[%s16453_s1 + $0x400] ss:$8 sps:$4 sm:$0xff]  }
 0x19a   : > { %v14067_v32 = vpack.i.b16 %v13195_v19, %v16651_v51  ;;  %v7334_v18 = vrot.slane %v7318_v7, %v13102_v38  ;;  %v16655_v19 = vld [vmem:[#allocation4_spill] sm:$0xff]  ;;  %v14092_v61 = vrot.slane %v7317_v30, %v13102_v38  ;;  %v14098_v11 = vrot.slane %v7319_v42, %v13102_v38  ;;  %v12401_v7 = vld [vmem:[%s16453_s1 + $0x100] ss:$8 sps:$4 sm:$0xff]   ;;  %v16660_v51 = vld [vmem:[#allocation17_spill] sm:$0xff] }
 0x19b   : > { %v14072_v21 = vpack.i.b16 %v13204_v2, %v16652_v49  ;;  %v4946_v2 = vcombine.low %v16655_v19, %v14060_v55  ;;  %v4954_v40 = vrot.slane %v4944_v60, %v13102_v38  ;;  %v4961_v54 = vrot.slane %v4945_v31, %v13102_v38  ;;  %v16661_v30 = vld [vmem:[#allocation22_spill] sm:$0xff]  ;;  %v16663_v60 = vld [vmem:[#allocation19_spill] sm:$0xff]  ;;  %v16665_v42 = vld [vmem:[#allocation21_spill] sm:$0xff] }
 0x19c   : > { %v7351_v35 = vcombine.low %v7334_v18, %v7348_v8  ;;  %16657 = vst [vmem:[#allocation5_spill] sm:$0xff] %v14092_v61  ;;  %16658 = vst [vmem:[#allocation2_spill] sm:$0xff] %v14098_v11  ;;  %v16659_v28 = vunpack.i.h.s16 %v13435_v3  ;;  %v14110_v18 = vpack.i.b16 %v13564_v1, %v16661_v30  ;;  %v16662_v8 = vld [vmem:[#allocation20_spill] sm:$0xff]  ;;  %v16664_v31 = vld [vmem:[#allocation23_spill] sm:$0xff] }
 0x19d   : > { %v4947_v22 = vcombine.low %v14067_v32, %v14072_v21  ;;  %v4968_v6 = vrot.slane %v4946_v2, %v13102_v38  ;;  %v7353_v56 = vcombine.low %v16663_v60, %v16662_v8  ;;  %v7354_v19 = vcombine.low %v16665_v42, %v16664_v31  ;;  %v12406_v3 = vld [vmem:[%s16453_s1 + $0x114] ss:$8 sps:$4 sm:$0xff]  }
 0x19e   : > { %8073 = vmatprep.mubr.bf16.mxu1 %v7351_v35  ;;  %v14106_v49 = vpack.i.b16 %v16660_v51, %v16659_v28  ;;  %v4977_v2 = vcombine.high %v4954_v40, %v4961_v54  ;;  %v7349_v35 = vcombine.low %v14092_v61, %v14098_v11  ;;  %v4976_v26 = vcombine.low %v4954_v40, %v4961_v54  ;;  %v16666_v28 = vld [vmem:[#allocation18_spill] sm:$0xff]  ;;  %v16667_v30 = vld [vmem:[#allocation24_spill] sm:$0xff] }
 0x19f   : > { %v4975_v25 = vrot.slane %v4947_v22, %v13102_v38  ;;  %v7355_v0 = vcombine.low %v16667_v30, %v14110_v18  ;;  %v7369_v34 = vrot.slane %v7353_v56, %v13102_v38  ;;  %v7376_v31 = vrot.slane %v7354_v19, %v13102_v38  ;;  %v16669_v19 = vld [vmem:[#allocation10_spill] sm:$0xff] }
 0x1a0   : > { %v7352_v51 = vcombine.low %v14106_v49, %v16666_v28  ;;  %5780 = vmatmul.mubr.bf16.vlgmr.msra.gmra.mrb[72].mxu0 %v4941_v62  ;;  %v4993_v40 = vrot.slane %v4977_v2, %v13102_v38  ;;  %v14133_v15 = vrot.slane %v4976_v26, %v13102_v38  ;;  %v14139_v61 = vpack.i.b16 %v13299_v24, %v16669_v19  ;;  %v12404_v62 = vld [vmem:[%s16453_s1 + $0x110] ss:$8 sps:$4 sm:$0xff]   ;;  %v12409_v19 = vld [vmem:[%s16453_s1 + $0x124] ss:$8 sps:$4 sm:$0xff]  }
 0x1a1   : > { %v4979_v22 = vcombine.high %v4968_v6, %v4975_v25  ;;  %v4978_v46 = vcombine.low %v4968_v6, %v4975_v25  ;;  %5871 = vmatpush1.bf16.msra.mxu0 %v12401_v7  ;;  %8074 = vmatmul.mubr.bf16.vlgmr.msra.gmra.mrb[108].mxu1 %v7349_v35  ;;  %v7383_v56 = vrot.slane %v7355_v0, %v13102_v38  ;;  %v16670_v2 = vld [vmem:[#allocation13_spill] sm:$0xff]  ;;  %v16672_v25 = vunpack.i.h.s16 %v13299_v24  ;;  %v16675_v35 = vld [vmem:[#allocation8_spill] sm:$0xff] }
 0x1a2   : > { %16668 = vst [vmem:[#allocation4_spill] sm:$0xff] %v14133_v15  ;;  %v7362_v30 = vrot.slane %v7352_v51, %v13102_v38  ;;  %v16674_v0 = vld [vmem:[#allocation9_spill] sm:$0xff]  ;;  %5872 = vmatprep.subr.bf16.mxu0 %v12406_v3  ;;  %8145 = vmatpush1.bf16.msra.mxu1 %v12410_v13 }
 0x1a3   : > { %v5007_v54 = vrot.slane %v4979_v22, %v13102_v38  ;;  %v3443_v22 = vunpack.i.h.s16 %v16670_v2  ;;  %v14146_v26 = vrot.slane %v4978_v46, %v13102_v38  ;;  %v14151_v7 = vpack.i.b16 %v16670_v2, %v16672_v25  ;;  %v16676_v46 = vld [vmem:[#allocation7_spill] sm:$0xff]  ;;  %v12418_v2 = vld [vmem:[%s16453_s1 + $0x414] ss:$8 sps:$4 sm:$0xff]  }
 0x1a4   : > { %v5012_v51 = vcombine.low %v16675_v35, %v16674_v0  ;;  %v7385_v11 = vcombine.high %v7362_v30, %v7369_v34  ;;  %v7387_v50 = vcombine.high %v7376_v31, %v7383_v56  ;;  %v16677_v24 = vcombine.low %v16656_v63, %v16676_v46  ;;  %8146 = vmatprep.subr.bf16.mxu1 %v12418_v2 }
 0x1a5   : > { %v5010_v6 = vcombine.low %v4993_v40, %v5007_v54  ;;  %16671 = vst [vmem:[#allocation17_spill] sm:$0xff] %v14146_v26  ;;  %16673 = vst [vmem:[#allocation22_spill] sm:$0xff] %v14151_v7  ;;  %v11717_v40 = vcombine.high %v16675_v35, %v16674_v0  ;;  %v5008_v3 = vcombine.low %v14133_v15, %v14146_v26  ;;  %5873 = vmatpush1.bf16.msra.mxu0 %v12404_v62 }
 0x1a6   : > { %v5021_v54 = vrot.slane %v16677_v24, %v13102_v38  ;;  %v5014_v25 = vcombine.low %v14139_v61, %v14151_v7  ;;  %v5028_v29 = vrot.slane %v5012_v51, %v13102_v38  ;;  %v7384_v0 = vcombine.low %v7362_v30, %v7369_v34  ;;  %v12407_v34 = vld [vmem:[%s16453_s1 + $0x120] ss:$8 sps:$4 sm:$0xff]   ;;  %5874 = vmatprep.subr.bf16.mxu0 %v12409_v19  ;;  %v16682_v30 = vld [vmem:[#allocation25_spill] sm:$0xff] }
 0x1a7   : > { %5789 = vmatprep.mubr.bf16.mxu0 %v5010_v6  ;;  %v7401_v35 = vrot.slane %v7385_v11, %v13102_v38  ;;  %v7415_v46 = vrot.slane %v7387_v50, %v13102_v38  ;;  %v5035_v13 = vrot.slane %v11717_v40, %v13102_v38  ;;  %v7386_v24 = vcombine.low %v7376_v31, %v7383_v56  ;;  %v16684_v51 = vld [vmem:[#allocation27_spill] sm:$0xff] }
 0x1a8   : > { %v5042_v57 = vrot.slane %v5014_v25, %v13102_v38  ;;  %v5044_v6 = vcombine.high %v5021_v54, %v5028_v29  ;;  %v14177_v63 = vrot.slane %v7384_v0, %v13102_v38  ;;  %v16679_v15 = vunpack.i.h.s16 %v13564_v1  ;;  %5790 = vmatmul.mubr.bf16.gmra.mrb[76].mxu0 %v5008_v3 }
 0x1a9   : > { %v7418_v50 = vcombine.low %v7401_v35, %v7415_v46  ;;  %v14188_v11 = vrot.slane %v7386_v24, %v13102_v38  ;;  %v16681_v31 = vunpack.i.h.s16 %v13567_v58  ;;  %v7421_v1 = vcombine.low %v13623_v27, %v13626_v45  ;;  %v16683_v35 = vld [vmem:[#allocation26_spill] sm:$0xff]  ;;  %v12416_v24 = vld [vmem:[%s16453_s1 + $0x410] ss:$8 sps:$4 sm:$0xff]   ;;  %5875 = vmatpush1.bf16.msra.mxu0 %v12407_v34 }
 0x1aa   : > { %16678 = vst [vmem:[#allocation20_spill] sm:$0xff] %v14177_v63  ;;  %v14182_v26 = vpack.i.b16 %v13567_v58, %v16679_v15  ;;  %v5046_v15 = vcombine.high %v5035_v13, %v5042_v57  ;;  %v5060_v62 = vrot.slane %v5044_v6, %v13102_v38  ;;  %v11778_v0 = vcombine.high %v13623_v27, %v13626_v45  ;;  %v12415_v58 = vld [vmem:[%s16453_s1 + $0x134] ss:$8 sps:$4 sm:$0xff]  }
 0x1ab   : > { %16680 = vst [vmem:[#allocation19_spill] sm:$0xff] %v14188_v11  ;;  %v14193_v56 = vpack.i.b16 %v16682_v30, %v16681_v31  ;;  %v16685_v19 = vcombine.low %v16683_v35, %v16684_v51  ;;  %8083 = vmatprep.mubr.bf16.mxu1 %v7418_v50  ;;  %v7416_v46 = vcombine.low %v14177_v63, %v14188_v11 }
 0x1ac   : > { %v7443_v3 = vrot.slane %v7421_v1, %v13102_v38  ;;  %v5043_v25 = vcombine.low %v5021_v54, %v5028_v29  ;;  %v5074_v6 = vrot.slane %v5046_v15, %v13102_v38  ;;  %v7450_v31 = vrot.slane %v11778_v0, %v13102_v38  ;;  %v16689_v54 = vld [vmem:[#allocation16_spill] sm:$0xff]  ;;  %5876 = vmatprep.subr.bf16.mxu0 %v12415_v58 }
 0x1ad   : > { %v7436_v40 = vrot.slane %v16685_v19, %v13102_v38  ;;  %v7419_v2 = vcombine.low %v14182_v26, %v14193_v56  ;;  %v5045_v30 = vcombine.low %v5035_v13, %v5042_v57  ;;  %v16686_v19 = vld [vmem:[#allocation14_spill] sm:$0xff]  ;;  %8084 = vmatmul.mubr.bf16.gmra.mrb[112].mxu1 %v7416_v46  ;;  %v5079_v29 = vcombine.low %v13352_v4, %v13365_v20  ;;  %v12413_v57 = vld [vmem:[%s16453_s1 + $0x130] ss:$8 sps:$4 sm:$0xff]   ;;  %v16691_v46 = vld [vmem:[#allocation15_spill] sm:$0xff] }
 0x1ae   : > { %v14218_v50 = vpack.i.b16 %v16686_v19, %v3443_v22  ;;  %v14222_v11 = vrot.slane %v5043_v25, %v13102_v38  ;;  %v5080_v1 = vcombine.low %v13368_v12, %v16689_v54  ;;  %v5077_v13 = vcombine.low %v5060_v62, %v5074_v6  ;;  %8147 = vmatpush1.bf16.msra.mxu1 %v12416_v24  ;;  %v12421_v62 = vld [vmem:[%s16453_s1 + $0x424] ss:$8 sps:$4 sm:$0xff]   ;;  %v16692_v19 = vld [vmem:[#allocation29_spill] sm:$0xff] }
 0x1af   : > { %v7429_v63 = vrot.slane %v7419_v2, %v13102_v38  ;;  %v7454_v22 = vcombine.high %v7443_v3, %v7450_v31  ;;  %v14232_v34 = vrot.slane %v5045_v30, %v13102_v38  ;;  %v5081_v4 = vcombine.low %v16691_v46, %v14020_v48  ;;  %v12419_v48 = vld [vmem:[%s16453_s1 + $0x420] ss:$8 sps:$4 sm:$0xff]   ;;  %5877 = vmatpush1.bf16.msra.mxu0 %v12413_v57 }
 0x1b0   : > { %16687 = vst [vmem:[#allocation23_spill] sm:$0xff] %v14218_v50  ;;  %16688 = vst [vmem:[#allocation21_spill] sm:$0xff] %v14222_v11  ;;  %v5078_v15 = vcombine.low %v14218_v50, %v13349_v17  ;;  %v5095_v20 = vrot.slane %v5079_v29, %v13102_v38  ;;  %v5102_v12 = vrot.slane %v5080_v1, %v13102_v38  ;;  %5799 = vmatprep.mubr.bf16.mxu0 %v5077_v13 }
 0x1b1   : > { %16690 = vst [vmem:[#allocation18_spill] sm:$0xff] %v14232_v34  ;;  %v7452_v0 = vcombine.high %v7429_v63, %v7436_v40  ;;  %v7482_v2 = vrot.slane %v7454_v22, %v13102_v38  ;;  %v5075_v17 = vcombine.low %v14222_v11, %v14232_v34  ;;  %v7451_v25 = vcombine.low %v7429_v63, %v7436_v40  ;;  %v16694_v40 = vld [vmem:[#allocation31_spill] sm:$0xff] }
 0x1b2   : > { %v5088_v58 = vrot.slane %v5078_v15, %v13102_v38  ;;  %v5109_v24 = vrot.slane %v5081_v4, %v13102_v38  ;;  %v7453_v30 = vcombine.low %v7443_v3, %v7450_v31  ;;  %v14254_v29 = vpack.i.b16 %v13686_v14, %v16692_v19  ;;  %v16696_v15 = vld [vmem:[#allocation32_spill] sm:$0xff]  ;;  %v12424_v3 = vld [vmem:[%s16453_s1 + $0x144] ss:$8 sps:$4 sm:$0xff]   ;;  %8148 = vmatprep.subr.bf16.mxu1 %v12421_v62 }
 0x1b3   : > { %v7468_v6 = vrot.slane %v7452_v0, %v13102_v38  ;;  %5800 = vmatmul.mubr.bf16.gmra.mrb[80].mxu0 %v5075_v17  ;;  %v14257_v1 = vrot.slane %v7451_v25, %v13102_v38  ;;  %v16693_v63 = vunpack.i.h.s16 %v13686_v14  ;;  %v16695_v22 = vunpack.i.h.s16 %v16694_v40  ;;  %v16697_v4 = vld [vmem:[#allocation35_spill] sm:$0xff]  ;;  %v16698_v17 = vld [vmem:[#allocation34_spill] sm:$0xff]  ;;  %8149 = vmatpush1.bf16.msra.mxu1 %v12419_v48 }
 0x1b4   : > { %v5111_v54 = vcombine.high %v5088_v58, %v5095_v20  ;;  %v5113_v57 = vcombine.high %v5102_v12, %v5109_v24  ;;  %v14273_v46 = vrot.slane %v7453_v30, %v13102_v38  ;;  %v7488_v14 = vcombine.low %v16698_v17, %v16697_v4  ;;  %5878 = vmatprep.subr.bf16.mxu0 %v12424_v3 }
 0x1b5   : > { %v14262_v13 = vpack.i.b16 %v16694_v40, %v16693_v63  ;;  %v14267_v0 = vpack.i.b16 %v16696_v15, %v16695_v22  ;;  %v7485_v31 = vcombine.low %v7468_v6, %v7482_v2  ;;  %v16699_v63 = vld [vmem:[#allocation33_spill] sm:$0xff]  ;;  %v16700_v22 = vld [vmem:[#allocation38_spill] sm:$0xff]  ;;  %v16701_v15 = vld [vmem:[#allocation36_spill] sm:$0xff]  ;;  %v5112_v48 = vcombine.low %v5102_v12, %v5109_v24 }
 0x1b6   : > { %v5127_v25 = vrot.slane %v5111_v54, %v13102_v38  ;;  %v7489_v11 = vcombine.low %v16701_v15, %v16700_v22  ;;  %v12422_v2 = vld [vmem:[%s16453_s1 + $0x140] ss:$8 sps:$4 sm:$0xff]   ;;  %v5141_v6 = vrot.slane %v5113_v57, %v13102_v38  ;;  %v7483_v62 = vcombine.low %v14257_v1, %v14273_v46  ;;  %v12433_v12 = vld [vmem:[%s16453_s1 + $0x154] ss:$8 sps:$4 sm:$0xff]  }
 0x1b7   : > { %v7486_v19 = vcombine.low %v14254_v29, %v14262_v13  ;;  %v7487_v40 = vcombine.low %v14267_v0, %v16699_v63  ;;  %8093 = vmatprep.mubr.bf16.mxu1 %v7485_v31  ;;  %v7510_v30 = vrot.slane %v7488_v14, %v13102_v38  ;;  %v5110_v54 = vcombine.low %v5088_v58, %v5095_v20  ;;  %v12427_v31 = vld [vmem:[%s16453_s1 + $0x434] ss:$8 sps:$4 sm:$0xff]  }
 0x1b8   : > { %v7517_v22 = vrot.slane %v7489_v11, %v13102_v38  ;;  %v5144_v50 = vcombine.low %v5127_v25, %v5141_v6  ;;  %8094 = vmatmul.mubr.bf16.gmra.mrb[116].mxu1 %v7483_v62  ;;  %v5145_v20 = vcombine.low %v14032_v59, %v14106_v49  ;;  %v5147_v58 = vcombine.low %v16662_v8, %v16665_v42  ;;  %v12425_v11 = vld [vmem:[%s16453_s1 + $0x430] ss:$8 sps:$4 sm:$0xff]   ;;  %v12430_v59 = vld [vmem:[%s16453_s1 + $0x444] ss:$8 sps:$4 sm:$0xff]  }
 0x1b9   : > { %v7496_v34 = vrot.slane %v7486_v19, %v13102_v38  ;;  %v7503_v7 = vrot.slane %v7487_v40, %v13102_v38  ;;  %v14298_v57 = vrot.slane %v5110_v54, %v13102_v38  ;;  %v14311_v14 = vrot.slane %v5112_v48, %v13102_v38  ;;  %5879 = vmatpush1.bf16.msra.mxu0 %v12422_v2 }
 0x1ba   : > { %v7521_v3 = vcombine.high %v7510_v30, %v7517_v22  ;;  %v11718_v25 = vcombine.high %v16662_v8, %v16665_v42  ;;  %5809 = vmatprep.mubr.bf16.mxu0 %v5144_v50  ;;  %v5155_v49 = vrot.slane %v5145_v20, %v13102_v38  ;;  %v16702_v19 = vcombine.low %v16666_v28, %v16663_v60  ;;  %v12431_v8 = vld [vmem:[%s16453_s1 + $0x150] ss:$8 sps:$4 sm:$0xff]  }
 0x1bb   : > { %v7519_v24 = vcombine.high %v7496_v34, %v7503_v7  ;;  %v5169_v6 = vrot.slane %v5147_v58, %v13102_v38  ;;  %v7518_v62 = vcombine.low %v7496_v34, %v7503_v7  ;;  %v5142_v50 = vcombine.low %v14298_v57, %v14311_v14  ;;  %8150 = vmatprep.subr.bf16.mxu1 %v12427_v31  ;;  %v12428_v34 = vld [vmem:[%s16453_s1 + $0x440] ss:$8 sps:$4 sm:$0xff]  }
 0x1bc   : > { %v5162_v40 = vrot.slane %v16702_v19, %v13102_v38  ;;  %v7549_v2 = vrot.slane %v7521_v3, %v13102_v38  ;;  %v5176_v54 = vrot.slane %v11718_v25, %v13102_v38  ;;  %v7520_v60 = vcombine.low %v7510_v30, %v7517_v22  ;;  %8151 = vmatpush1.bf16.msra.mxu1 %v12425_v11  ;;  %v16703_v3 = vld [vmem:[#allocation37_spill] sm:$0xff]  ;;  %v16704_v25 = vld [vmem:[#allocation43_spill] sm:$0xff] }
 0x1bd   : > { %v7535_v42 = vrot.slane %v7519_v24, %v13102_v38  ;;  %v14333_v28 = vrot.slane %v7518_v62, %v13102_v38  ;;  %v3513_v7 = vunpack.i.h.s16 %v13808_v44  ;;  %5880 = vmatprep.subr.bf16.mxu0 %v12433_v12  ;;  %5810 = vmatmul.mubr.bf16.gmra.mrb[84].mxu0 %v5142_v50  ;;  %v3515_v24 = vunpack.i.h.s16 %v13811_v43  ;;  %v12436_v30 = vld [vmem:[%s16453_s1 + $0x454] ss:$8 sps:$4 sm:$0xff]  }
 0x1be   : > { %v5178_v48 = vcombine.high %v5155_v49, %v5162_v40  ;;  %v5180_v58 = vcombine.high %v5169_v6, %v5176_v54  ;;  %v14342_v31 = vpack.i.b16 %v13808_v44, %v16703_v3  ;;  %8152 = vmatprep.subr.bf16.mxu1 %v12430_v59  ;;  %v14349_v11 = vrot.slane %v7520_v60, %v13102_v38  ;;  %v16705_v59 = vld [vmem:[#allocation40_spill] sm:$0xff]  ;;  %v16707_v50 = vld [vmem:[#allocation41_spill] sm:$0xff] }
 0x1bf   : > { %v7552_v20 = vcombine.low %v7535_v42, %v7549_v2  ;;  %v14352_v12 = vpack.i.b16 %v13811_v43, %v3513_v7  ;;  %v7556_v19 = vcombine.low %v16704_v25, %v13867_v33  ;;  %5881 = vmatpush1.bf16.msra.mxu0 %v12431_v8  ;;  %v14358_v62 = vpack.i.b16 %v16705_v59, %v3515_v24  ;;  %v16706_v42 = vld [vmem:[#allocation39_spill] sm:$0xff] }
 0x1c0   : > { %v5194_v22 = vrot.slane %v5178_v48, %v13102_v38  ;;  %v5208_v44 = vrot.slane %v5180_v58, %v13102_v38  ;;  %v7553_v2 = vcombine.low %v16706_v42, %v14342_v31  ;;  %v16708_v48 = vld [vmem:[#allocation42_spill] sm:$0xff]  ;;  %v7550_v43 = vcombine.low %v14333_v28, %v14349_v11  ;;  %8153 = vmatpush1.bf16.msra.mxu1 %v12428_v34  ;;  %v12434_v58 = vld [vmem:[%s16453_s1 + $0x450] ss:$8 sps:$4 sm:$0xff]  }
 0x1c1   : > { %8103 = vmatprep.mubr.bf16.mxu1 %v7552_v20  ;;  %v16709_v60 = vcombine.low %v16707_v50, %v16708_v48  ;;  %v7584_v7 = vrot.slane %v7556_v19, %v13102_v38  ;;  %v5177_v8 = vcombine.low %v5155_v49, %v5162_v40  ;;  %v5179_v20 = vcombine.low %v5169_v6, %v5176_v54  ;;  %v12439_v49 = vld [vmem:[%s16453_s1 + $0x464] ss:$8 sps:$4 sm:$0xff]  }
 0x1c2   : > { %v5211_v24 = vcombine.low %v5194_v22, %v5208_v44  ;;  %v7554_v59 = vcombine.low %v14352_v12, %v14358_v62  ;;  %v7563_v42 = vrot.slane %v7553_v2, %v13102_v38  ;;  %8154 = vmatprep.subr.bf16.mxu1 %v12436_v30  ;;  %8104 = vmatmul.mubr.bf16.gmra.mrb[120].mxu1 %v7550_v43  ;;  %v12445_v44 = vld [vmem:[%s16453_s1 + $0x164] ss:$8 sps:$4 sm:$0xff]  }
 0x1c3   : > { %v7577_v3 = vrot.slane %v16709_v60, %v13102_v38  ;;  %v5212_v60 = vcombine.low %v14110_v18, %v14182_v26  ;;  %v14381_v6 = vrot.slane %v5177_v8, %v13102_v38  ;;  %v14384_v54 = vrot.slane %v5179_v20, %v13102_v38  ;;  %v16712_v26 = vld [vmem:[#allocation30_spill] sm:$0xff]  ;;  %5882 = vmatprep.subr.bf16.mxu0 %v12445_v44 }
 0x1c4   : > { %v5213_v34 = vcombine.low %v14193_v56, %v16683_v35  ;;  %5819 = vmatprep.mubr.bf16.mxu0 %v5211_v24  ;;  %v7570_v22 = vrot.slane %v7554_v59, %v13102_v38  ;;  %v5214_v18 = vcombine.low %v16684_v51, %v13623_v27  ;;  %v5215_v30 = vcombine.low %v13626_v45, %v16712_v26  ;;  %v12437_v27 = vld [vmem:[%s16453_s1 + $0x460] ss:$8 sps:$4 sm:$0xff]   ;;  %v12442_v24 = vld [vmem:[%s16453_s1 + $0x474] ss:$8 sps:$4 sm:$0xff]  }
 0x1c5   : > { %v7588_v40 = vcombine.high %v7577_v3, %v7584_v7  ;;  %16710 = vst [vmem:[#allocation24_spill] sm:$0xff] %v14381_v6  ;;  %16711 = vst [vmem:[#allocation10_spill] sm:$0xff] %v14384_v54  ;;  %v5222_v19 = vrot.slane %v5212_v60, %v13102_v38  ;;  %v5209_v56 = vcombine.low %v14381_v6, %v14384_v54  ;;  %8155 = vmatpush1.bf16.msra.mxu1 %v12434_v58  ;;  %v16714_v58 = vld [vmem:[#allocation46_spill] sm:$0xff] }
 0x1c6   : > { %v5229_v35 = vrot.slane %v5213_v34, %v13102_v38  ;;  %v7587_v43 = vcombine.low %v7577_v3, %v7584_v7  ;;  %v7586_v45 = vcombine.high %v7563_v42, %v7570_v22  ;;  %v5236_v51 = vrot.slane %v5214_v18, %v13102_v38  ;;  %8156 = vmatprep.subr.bf16.mxu1 %v12439_v49  ;;  %v16713_v7 = vld [vmem:[#allocation44_spill] sm:$0xff] }
 0x1c7   : > { %v7616_v2 = vrot.slane %v7588_v40, %v13102_v38  ;;  %v5243_v8 = vrot.slane %v5215_v30, %v13102_v38  ;;  %v7585_v20 = vcombine.low %v7563_v42, %v7570_v22  ;;  %5820 = vmatmul.mubr.bf16.gmra.mrb[88].mxu0 %v5209_v56  ;;  %v14414_v60 = vpack.i.b16 %v16714_v58, %v16713_v7  ;;  %v12443_v42 = vld [vmem:[%s16453_s1 + $0x160] ss:$8 sps:$4 sm:$0xff]  }
 0x1c8   : > { %v5245_v59 = vcombine.high %v5222_v19, %v5229_v35  ;;  %v14410_v3 = vrot.slane %v7587_v43, %v13102_v38  ;;  %v16715_v40 = vunpack.i.h.s16 %v16714_v58  ;;  %v7602_v49 = vrot.slane %v7586_v45, %v13102_v38  ;;  %v16717_v45 = vld [vmem:[#allocation48_spill] sm:$0xff]  ;;  %5883 = vmatpush1.bf16.msra.mxu0 %v12443_v42 }
 0x1c9   : > { %v5247_v22 = vcombine.high %v5236_v51, %v5243_v8  ;;  %v14426_v18 = vrot.slane %v7585_v20, %v13102_v38  ;;  %v16716_v26 = vunpack.i.h.s16 %v13893_v9  ;;  %v11779_v43 = vcombine.high %v16704_v25, %v13867_v33  ;;  %8157 = vmatpush1.bf16.msra.mxu1 %v12437_v27 }
 0x1ca   : > { %v14419_v34 = vpack.i.b16 %v13893_v9, %v16715_v40  ;;  %v5261_v56 = vrot.slane %v5245_v59, %v13102_v38  ;;  %v7623_v58 = vcombine.low %v16717_v45, %v13942_v52  ;;  %v7619_v20 = vcombine.low %v7602_v49, %v7616_v2  ;;  %8158 = vmatprep.subr.bf16.mxu1 %v12442_v24  ;;  %v12440_v52 = vld [vmem:[%s16453_s1 + $0x470] ss:$8 sps:$4 sm:$0xff]  }
 0x1cb   : > { %v14431_v30 = vpack.i.b16 %v13903_v37, %v16716_v26  ;;  %v5275_v40 = vrot.slane %v5247_v22, %v13102_v38  ;;  %v7617_v9 = vcombine.low %v14426_v18, %v14410_v3  ;;  %v16718_v37 = vld [vmem:[#allocation47_spill] sm:$0xff]  ;;  %v7630_v59 = vrot.slane %v11779_v43, %v13102_v38  ;;  %v16719_v22 = vld [vmem:[#allocation28_spill] sm:$0xff] }
 0x1cc   : > { %v7621_v7 = vcombine.low %v14414_v60, %v14419_v34  ;;  %v7651_v6 = vrot.slane %v7623_v58, %v13102_v38  ;;  %v5244_v54 = vcombine.low %v5222_v19, %v5229_v35  ;;  %8113 = vmatprep.mubr.bf16.mxu1 %v7619_v20  ;;  %v5246_v49 = vcombine.low %v5236_v51, %v5243_v8  ;;  %v12448_v43 = vld [vmem:[%s16453_s1 + $0x174] ss:$8 sps:$4 sm:$0xff]   ;;  %v12446_v51 = vld [vmem:[%s16453_s1 + $0x170] ss:$8 sps:$4 sm:$0xff]  }
 0x1cd   : > { %v7622_v44 = vcombine.low %v14431_v30, %v16718_v37  ;;  %v5278_v2 = vcombine.low %v5261_v56, %v5275_v40  ;;  %v5279_v24 = vcombine.low %v16719_v22, %v14254_v29  ;;  %8114 = vmatmul.mubr.bf16.gmra.mrb[124].mxu1 %v7617_v9  ;;  %v5280_v35 = vcombine.low %v14262_v13, %v14267_v0 }
 0x1ce   : > { %v7637_v26 = vrot.slane %v7621_v7, %v13102_v38  ;;  %v14458_v19 = vrot.slane %v5244_v54, %v13102_v38  ;;  %v5282_v42 = vcombine.low %v16697_v4, %v16701_v15  ;;  %v14468_v8 = vrot.slane %v5246_v49, %v13102_v38  ;;  %8159 = vmatpush1.bf16.msra.mxu1 %v12440_v52 }
 0x1cf   : > { %v7644_v27 = vrot.slane %v7622_v44, %v13102_v38  ;;  %5829 = vmatprep.mubr.bf16.mxu0 %v5278_v2  ;;  %v5289_v56 = vrot.slane %v5279_v24, %v13102_v38  ;;  %v16720_v54 = vcombine.low %v16699_v63, %v16698_v17  ;;  %v5296_v0 = vrot.slane %v5280_v35, %v13102_v38 }
 0x1d0   : > { %v7653_v7 = vcombine.high %v7630_v59, %v7637_v26  ;;  %v5310_v20 = vrot.slane %v5282_v42, %v13102_v38  ;;  %v7652_v40 = vcombine.low %v7630_v59, %v7637_v26  ;;  %v5276_v44 = vcombine.low %v14458_v19, %v14468_v8  ;;  %5884 = vmatprep.subr.bf16.mxu0 %v12448_v43  ;;  %v16725_v43 = vld [vmem:[#allocation52_spill] sm:$0xff] }
 0x1d1   : > { %v7655_v29 = vcombine.high %v7644_v27, %v7651_v6  ;;  %v5303_v58 = vrot.slane %v16720_v54, %v13102_v38  ;;  %v7654_v2 = vcombine.low %v7644_v27, %v7651_v6  ;;  %v16721_v49 = vunpack.i.h.s16 %v13975_v47  ;;  %5885 = vmatpush1.bf16.msra.mxu0 %v12446_v51  ;;  %v16722_v6 = vld [vmem:[#allocation50_spill] sm:$0xff]  ;;  %v16724_v27 = vld [vmem:[#allocation51_spill] sm:$0xff] }
 0x1d2   : > { %v7669_v13 = vrot.slane %v7653_v7, %v13102_v38  ;;  %v5312_v17 = vcombine.high %v5289_v56, %v5296_v0  ;;  %v14485_v24 = vrot.slane %v7652_v40, %v13102_v38  ;;  %v7687_v59 = vcombine.low %v13945_v16, %v13958_v5  ;;  %5830 = vmatmul.mubr.bf16.gmra.mrb[92].mxu0 %v5276_v44  ;;  %v12454_v51 = vld [vmem:[%s16453_s1 + $0x304] ss:$8 sps:$4 sm:$0xff]  }
 0x1d3   : > { %v7683_v9 = vrot.slane %v7655_v29, %v13102_v38  ;;  %v11773_v22 = vpack.i.b16 %v13984_v23, %v16721_v49  ;;  %v5314_v63 = vcombine.high %v5303_v58, %v5310_v20  ;;  %v14490_v52 = vrot.slane %v7654_v2, %v13102_v38  ;;  %8021 = vmatprep.subr.bf16.mxu0 %v12454_v51 }
 0x1d4   : > { %v16723_v47 = vpack.i.b16 %v13972_v36, %v16722_v6  ;;  %v5328_v35 = vrot.slane %v5312_v17, %v13102_v38  ;;  %v7697_v29 = vrot.slane %v7687_v59, %v13102_v38  ;;  %v16726_v16 = vcombine.low %v14001_v39, %v14023_v53  ;;  %v16727_v6 = vld [vmem:[#allocation49_spill] sm:$0xff] }
 0x1d5   : > { %v7686_v26 = vcombine.low %v7669_v13, %v7683_v9  ;;  %v7689_v7 = vcombine.low %v16725_v43, %v11773_v22  ;;  %v5342_v42 = vrot.slane %v5314_v63, %v13102_v38  ;;  %v7684_v36 = vcombine.low %v14485_v24, %v14490_v52 }
 0x1d6   : > { %v7688_v23 = vcombine.low %v16724_v27, %v16723_v47  ;;  %v7718_v5 = vrot.slane %v16726_v16, %v13102_v38  ;;  %v5311_v40 = vcombine.low %v5289_v56, %v5296_v0  ;;  %v5313_v44 = vcombine.low %v5303_v58, %v5310_v20 }
 0x1d7   : > { %8123 = vmatprep.mubr.bf16.mxu1 %v7686_v26  ;;  %v7711_v13 = vrot.slane %v7689_v7, %v13102_v38  ;;  %v5345_v9 = vcombine.low %v5328_v35, %v5342_v42  ;;  %v11719_v39 = vcombine.high %v16697_v4, %v16701_v15  ;;  %v5347_v53 = vcombine.low %v14342_v31, %v14352_v12  ;;  %v16728_v42 = vld [vmem:[#allocation45_spill] sm:$0xff] }
 0x1d8   : > { %v7704_v54 = vrot.slane %v7688_v23, %v13102_v38  ;;  %8124 = vmatmul.mubr.bf16.gmra.mrb[128].mxu1 %v7684_v36  ;;  %v14516_v22 = vrot.slane %v5311_v40, %v13102_v38  ;;  %v5348_v17 = vcombine.low %v14358_v62, %v16707_v50  ;;  %v14521_v56 = vrot.slane %v5313_v44, %v13102_v38 }
 0x1d9   : > { %v7722_v49 = vcombine.high %v7711_v13, %v7718_v5  ;;  %5839 = vmatprep.mubr.bf16.mxu0 %v5345_v9  ;;  %v5349_v58 = vcombine.low %v16708_v48, %v16704_v25  ;;  %v5356_v4 = vrot.slane %v11719_v39, %v13102_v38  ;;  %v5363_v15 = vrot.slane %v5347_v53, %v13102_v38  ;;  %v16731_v39 = vld [vmem:[#allocation6_spill] sm:$0xff] }
 0x1da   : > { %v7720_v2 = vcombine.high %v7697_v29, %v7704_v54  ;;  %v5370_v0 = vrot.slane %v5348_v17, %v13102_v38  ;;  %v7719_v20 = vcombine.low %v7697_v29, %v7704_v54  ;;  %v5343_v62 = vcombine.low %v14516_v22, %v14521_v56 }
 0x1db   : > { %v7750_v12 = vrot.slane %v7722_v49, %v13102_v38  ;;  %v5377_v50 = vrot.slane %v5349_v58, %v13102_v38  ;;  %v5379_v63 = vcombine.high %v5356_v4, %v5363_v15  ;;  %v7721_v59 = vcombine.low %v7711_v13, %v7718_v5 }
 0x1dc   : > { %v7736_v31 = vrot.slane %v7720_v2, %v13102_v38  ;;  %v14534_v25 = vrot.slane %v7719_v20, %v13102_v38  ;;  %v5378_v48 = vcombine.low %v5356_v4, %v5363_v15  ;;  %v5413_v47 = vcombine.low %v13867_v33, %v16727_v6  ;;  %5840 = vmatmul.mubr.bf16.gmra.mrb[96].mxu0 %v5343_v62  ;;  %v16736_v62 = vld [vmem:[#allocation11_spill] sm:$0xff]  ;;  %v16738_v6 = vld [vmem:[#allocation12_spill] sm:$0xff] }
 0x1dd   : > { %v5381_v27 = vcombine.high %v5370_v0, %v5377_v50  ;;  %v5395_v23 = vrot.slane %v5379_v63, %v13102_v38  ;;  %v14540_v43 = vrot.slane %v7721_v59, %v13102_v38  ;;  %v5380_v7 = vcombine.low %v5370_v0, %v5377_v50  ;;  %v16737_v50 = vld [vmem:[#allocation9_spill] sm:$0xff] }
 0x1de   : > { %v7753_v26 = vcombine.low %v7736_v31, %v7750_v12  ;;  %v14543_v35 = vrot.slane %v5378_v48, %v13102_v38  ;;  %v5414_v29 = vcombine.low %v16728_v42, %v14414_v60  ;;  %v5415_v16 = vcombine.low %v14419_v34, %v14431_v30  ;;  %v16734_v12 = vld [vmem:[#allocation8_spill] sm:$0xff]  ;;  %v16740_v42 = vld [vmem:[#allocation22_spill] sm:$0xff] }
 0x1df   : > { %v5423_v33 = vrot.slane %v5413_v47, %v13102_v38  ;;  %v5409_v5 = vrot.slane %v5381_v27, %v13102_v38  ;;  %v7751_v51 = vcombine.low %v14534_v25, %v14540_v43  ;;  %v14554_v36 = vrot.slane %v5380_v7, %v13102_v38  ;;  %v16739_v7 = vld [vmem:[#allocation23_spill] sm:$0xff] }
 0x1e0   : > { %8133 = vmatprep.mubr.bf16.mxu1 %v7753_v26  ;;  %v16729_v54 = vcombine.low %v16718_v37, %v16717_v45  ;;  %v5430_v60 = vrot.slane %v5414_v29, %v13102_v38  ;;  %v5437_v40 = vrot.slane %v5415_v16, %v13102_v38  ;;  %v7151_v34 = vcombine.low %v13146_v10, %v16654_v41 }
 0x1e1   : > { %v11776_v30 = vcombine.high %v13146_v10, %v16654_v41  ;;  %v5412_v9 = vcombine.low %v5395_v23, %v5409_v5  ;;  %8134 = vmatmul.mubr.bf16.gmra.mrb[132].mxu1 %v7751_v51  ;;  %v5410_v44 = vcombine.low %v14543_v35, %v14554_v36  ;;  %v16730_v45 = vcombine.low %v14060_v55, %v14067_v32  ;;  %v16735_v55 = vld [vmem:[#allocation7_spill] sm:$0xff] }
 0x1e2   : > { %v5444_v13 = vrot.slane %v16729_v54, %v13102_v38  ;;  %v16732_v53 = vcombine.low %v14072_v21, %v16731_v39  ;;  %v16733_v49 = vmov 0   ;;  %v5446_v17 = vcombine.high %v5423_v33, %v5430_v60  ;;  %v16746_v39 = vld [vmem:[#allocation21_spill] sm:$0xff] }
 0x1e3   : > { %v7175_v37 = vrot.slane %v16730_v45, %v13102_v38  ;;  %8176 = vmatprep.mubr.bf16.mxu1 %v16733_v49  ;;  %v7161_v10 = vrot.slane %v7151_v34, %v13102_v38  ;;  %v7168_v41 = vrot.slane %v11776_v30, %v13102_v38  ;;  %5849 = vmatprep.mubr.bf16.mxu0 %v5412_v9  ;;  %v16743_v30 = vld [vmem:[#allocation19_spill] sm:$0xff]  ;;  %v16744_v9 = vld [vmem:[#allocation20_spill] sm:$0xff]  ;;  %v16745_v45 = vld [vmem:[#allocation18_spill] sm:$0xff] }
 0x1e4   : > { %v7182_v2 = vrot.slane %v16732_v53, %v13102_v38  ;;  %v5448_v58 = vcombine.high %v5437_v40, %v5444_v13  ;;  %v5445_v15 = vcombine.low %v5423_v33, %v5430_v60  ;;  %v5447_v31 = vcombine.low %v5437_v40, %v5444_v13  ;;  %5850 = vmatmul.mubr.bf16.gmra.mrb[100].mxu0 %v5410_v44  ;;  %v16741_v13 = vld [vmem:[#allocation17_spill] sm:$0xff]  ;;  %v16742_v60 = vld [vmem:[#allocation4_spill] sm:$0xff] }
 0x1e5   : > { %v7218_v32 = vcombine.low %v16735_v55, %v16734_v12  ;;  %v5462_v0 = vrot.slane %v5446_v17, %v13102_v38  ;;  %v7183_v20 = vcombine.low %v7161_v10, %v7168_v41  ;;  %v7219_v63 = vcombine.low %v16737_v50, %v16736_v62  ;;  %v16748_v12 = vld [vmem:[#allocation24_spill] sm:$0xff] }
 0x1e6   : > { %v7185_v4 = vcombine.low %v7175_v37, %v7182_v2  ;;  %v5476_v21 = vrot.slane %v5448_v58, %v13102_v38  ;;  %v14589_v26 = vrot.slane %v5445_v15, %v13102_v38  ;;  %v14592_v48 = vrot.slane %v5447_v31, %v13102_v38  ;;  %v16747_v31 = vld [vmem:[#allocation10_spill] sm:$0xff] }
 0x1e7   : > { %v7220_v47 = vcombine.low %v16738_v6, %v14139_v61  ;;  %v14597_v23 = vrot.slane %v7183_v20, %v13102_v38  ;;  %v7221_v29 = vcombine.low %v16740_v42, %v16739_v7  ;;  %v7228_v33 = vrot.slane %v7218_v32, %v13102_v38 }
 0x1e8   : > { %v14586_v59 = vrot.slane %v7185_v4, %v13102_v38  ;;  %v5479_v27 = vcombine.low %v5462_v0, %v5476_v21  ;;  %v5477_v16 = vcombine.low %v14589_v26, %v14592_v48  ;;  %v7235_v5 = vrot.slane %v7219_v63, %v13102_v38 }
 0x1e9   : > { %v7242_v61 = vrot.slane %v7220_v47, %v13102_v38  ;;  %v7249_v54 = vrot.slane %v7221_v29, %v13102_v38  ;;  %v5009_v40 = vcombine.high %v16742_v60, %v16741_v13  ;;  %v7417_v44 = vcombine.high %v16744_v9, %v16743_v30  ;;  %v12456_v30 = vld [vmem:[%s16453_s1 + $0x314] ss:$8 sps:$4 sm:$0xff]   ;;  %v16751_v9 = vld [vmem:[#allocation2_spill] sm:$0xff] }
 0x1ea   : > { %5859 = vmatprep.mubr.bf16.mxu0 %v5479_v27  ;;  %v7216_v51 = vcombine.high %v14597_v23, %v14586_v59  ;;  %v7250_v34 = vcombine.low %v7228_v33, %v7235_v5  ;;  %v5076_v53 = vcombine.high %v16746_v39, %v16745_v45  ;;  %v7484_v17 = vcombine.high %v14257_v1, %v14273_v46  ;;  %v12465_v45 = vld [vmem:[%s16453_s1 + $0x350] ss:$8 sps:$4 sm:$0xff]   ;;  %v12467_v1 = vld [vmem:[%s16453_s1 + $0x360] ss:$8 sps:$4 sm:$0xff]   ;;  %v12468_v46 = vld [vmem:[%s16453_s1 + $0x374] ss:$8 sps:$4 sm:$0xff]  }
 0x1eb   : > { %v7252_v58 = vcombine.low %v7242_v61, %v7249_v54  ;;  %v5143_v4 = vcombine.high %v14298_v57, %v14311_v14  ;;  %v7551_v15 = vcombine.high %v14333_v28, %v14349_v11  ;;  %v5210_v55 = vcombine.high %v16748_v12, %v16747_v31  ;;  %v12469_v57 = vld [vmem:[%s16453_s1 + $0x370] ss:$8 sps:$4 sm:$0xff]   ;;  %v12470_v14 = vld [vmem:[%s16453_s1 + $0x384] ss:$8 sps:$4 sm:$0xff]   ;;  %v12471_v28 = vld [vmem:[%s16453_s1 + $0x380] ss:$8 sps:$4 sm:$0xff]  }
 0x1ec   : > { %8177 = vmatmul.mubr.bf16.vlgmr.msra.gmra.mrb[136].mxu1 %v7216_v51  ;;  %v14625_v32 = vrot.slane %v7250_v34, %v13102_v38  ;;  %v7618_v0 = vcombine.high %v14426_v18, %v14410_v3  ;;  %v5277_v21 = vcombine.high %v14458_v19, %v14468_v8  ;;  %v7685_v20 = vcombine.high %v14485_v24, %v14490_v52  ;;  %v12455_v34 = vld [vmem:[%s16453_s1 + $0x300] ss:$8 sps:$4 sm:$0xff]   ;;  %v12472_v11 = vld [vmem:[%s16453_s1 + $0x394] ss:$8 sps:$4 sm:$0xff]   ;;  %v12474_v31 = vld [vmem:[%s16453_s1 + $0x3a4] ss:$8 sps:$4 sm:$0xff]  }
 0x1ed   : > { %8186 = vmatprep.mubr.bf16.mxu1 %v16733_v49  ;;  %v14634_v62 = vrot.slane %v7252_v58, %v13102_v38  ;;  %v5344_v50 = vcombine.high %v14516_v22, %v14521_v56  ;;  %v7752_v63 = vcombine.high %v14534_v25, %v14540_v43  ;;  %v5411_v6 = vcombine.high %v14543_v35, %v14554_v36  ;;  %v16752_v58 = vld [vmem:[#allocation5_spill] sm:$0xff]  ;;  %v12475_v3 = vld [vmem:[%s16453_s1 + $0x3a0] ss:$8 sps:$4 sm:$0xff]   ;;  %v12478_v8 = vld [vmem:[%s16453_s1 + $0x3c4] ss:$8 sps:$4 sm:$0xff]  }
 0x1ee   : > { %5860 = vmatmul.mubr.bf16.gmra.mrb[104].mxu0 %v5477_v16  ;;  %v5478_v47 = vcombine.high %v14589_v26, %v14592_v48  ;;  %v7184_v27 = vcombine.high %v7161_v10, %v7168_v41  ;;  %v7186_v7 = vcombine.high %v7175_v37, %v7182_v2  ;;  %v7215_v42 = vcombine.low %v14597_v23, %v14586_v59  ;;  %v12476_v18 = vld [vmem:[%s16453_s1 + $0x3b4] ss:$8 sps:$4 sm:$0xff]   ;;  %v12477_v19 = vld [vmem:[%s16453_s1 + $0x3b0] ss:$8 sps:$4 sm:$0xff]   ;;  %v12479_v24 = vld [vmem:[%s16453_s1 + $0x3c0] ss:$8 sps:$4 sm:$0xff]  }
 0x1ef   : > { %5902 = vmatprep.mubr.bf16.mxu0 %v16733_v49  ;;  %v7251_v29 = vcombine.high %v7228_v33, %v7235_v5  ;;  %v7253_v51 = vcombine.high %v7242_v61, %v7249_v54  ;;  %v7282_v13 = vcombine.low %v14625_v32, %v14634_v62  ;;  %v7283_v10 = vcombine.high %v14625_v32, %v14634_v62  ;;  %v16749_v5 = vld [vmem:[#allocation53_spill] sm:$0xff]  ;;  %v16750_v61 = vld [vmem:[#allocation3_spill] sm:$0xff] }
 0x1f0   : > { %v14650_v60 = vrot.slane %v7184_v27, %v13102_v38  ;;  %v14653_v16 = vrot.slane %v7186_v7, %v13102_v38  ;;  %v4942_v54 = vcombine.high %v16750_v61, %v16749_v5  ;;  %v7350_v27 = vcombine.high %v16752_v58, %v16751_v9  ;;  %v12464_v9 = vld [vmem:[%s16453_s1 + $0x354] ss:$8 sps:$4 sm:$0xff]   ;;  %v12481_v22 = vld [vmem:[%s16453_s1 + $0x3d0] ss:$8 sps:$4 sm:$0xff]   ;;  %v12483_v25 = vld [vmem:[%s16453_s1 + $0x3e0] ss:$8 sps:$4 sm:$0xff]  }
 0x1f1   : > { %v14658_v37 = vrot.slane %v7251_v29, %v13102_v38  ;;  %v14661_v2 = vrot.slane %v7253_v51, %v13102_v38  ;;  %v14679_v7 = vpop.f32.mrb[72].mxu1  ;;  %v12457_v29 = vld [vmem:[%s16453_s1 + $0x310] ss:$8 sps:$4 sm:$0xff]   ;;  %v12480_v52 = vld [vmem:[%s16453_s1 + $0x3d4] ss:$8 sps:$4 sm:$0xff]  }
 0x1f2   : > { %v7217_v41 = vcombine.low %v14650_v60, %v14653_v16  ;;  %v14684_v51 = vpop.f32.mrb[73].mxu1  ;;  %v12484_v43 = vld [vmem:[%s16453_s1 + $0x3f4] ss:$8 sps:$4 sm:$0xff]  }
 0x1f3   : > { %v7284_v33 = vcombine.low %v14658_v37, %v14661_v2  ;;  %v14690_v5 = vpop.f32.mrb[74].mxu1 }
 0x1f4   : > { %8187 = vmatmul.mubr.bf16.gmra.mrb[140].mxu1 %v7283_v10  ;;  %v12458_v10 = vld [vmem:[%s16453_s1 + $0x324] ss:$8 sps:$4 sm:$0xff]   ;;  %v14692_v61 = vpop.f32.mrb[75].mxu1 }
 0x1f5   : > { %8196 = vmatprep.mubr.bf16.mxu1 %v16733_v49 }
 0x1f6   : > { %5903 = vmatmul.mubr.bf16.vlgmr.msra.gmra.mrb[72].mxu0 %v4942_v54  ;;  %v12459_v54 = vld [vmem:[%s16453_s1 + $0x320] ss:$8 sps:$4 sm:$0xff]  }
 0x1f7   : > { %8022 = vmatpush1.bf16.msra.mxu0 %v12455_v34  ;;  %5912 = vmatprep.mubr.bf16.mxu0 %v16733_v49  ;;  %v12460_v34 = vld [vmem:[%s16453_s1 + $0x334] ss:$8 sps:$4 sm:$0xff]  }
 0x1f8   : > { %8023 = vmatprep.subr.bf16.mxu0 %v12456_v30  ;;  %v12461_v30 = vld [vmem:[%s16453_s1 + $0x330] ss:$8 sps:$4 sm:$0xff]  }
 0x1fb   : > { %8024 = vmatpush1.bf16.msra.mxu0 %v12457_v29 }
 0x1fc   : > { %8197 = vmatmul.mubr.bf16.gmra.mrb[108].mxu1 %v7350_v27  ;;  %8025 = vmatprep.subr.bf16.mxu0 %v12458_v10 }
 0x1fd   : > { %8206 = vmatprep.mubr.bf16.mxu1 %v16733_v49 }
 0x1fe   : > { %5913 = vmatmul.mubr.bf16.gmra.mrb[76].mxu0 %v5009_v40  ;;  %v12462_v40 = vld [vmem:[%s16453_s1 + $0x344] ss:$8 sps:$4 sm:$0xff]  }
 0x1ff   : > { %8026 = vmatpush1.bf16.msra.mxu0 %v12459_v54  ;;  %5922 = vmatprep.mubr.bf16.mxu0 %v16733_v49 }
 0x200   : > { %8027 = vmatprep.subr.bf16.mxu0 %v12460_v34 }
 0x202   : > { %v14718_v58 = vpop.f32.mrb[76].mxu1 }
 0x203   : > { %8028 = vmatpush1.bf16.msra.mxu0 %v12461_v30  ;;  %v14726_v39 = vpop.f32.mrb[77].mxu1 }
 0x204   : > { %8207 = vmatmul.mubr.bf16.gmra.mrb[112].mxu1 %v7417_v44  ;;  %8029 = vmatprep.subr.bf16.mxu0 %v12462_v40  ;;  %v12463_v44 = vld [vmem:[%s16453_s1 + $0x340] ss:$8 sps:$4 sm:$0xff]   ;;  %v14732_v27 = vpop.f32.mrb[78].mxu1 }
 0x205   : > { %8216 = vmatprep.mubr.bf16.mxu1 %v16733_v49  ;;  %v14734_v29 = vpop.f32.mrb[79].mxu1 }
 0x206   : > { %5923 = vmatmul.mubr.bf16.gmra.mrb[80].mxu0 %v5076_v53  ;;  %v12466_v53 = vld [vmem:[%s16453_s1 + $0x364] ss:$8 sps:$4 sm:$0xff]  }
 0x207   : > { %8030 = vmatpush1.bf16.msra.mxu0 %v12463_v44  ;;  %5932 = vmatprep.mubr.bf16.mxu0 %v16733_v49 }
 0x208   : > { %8031 = vmatprep.subr.bf16.mxu0 %v12464_v9  ;;  %v12449_v9 = vld [vmem:[%s16455_s3] ss:$8 sps:$4 sm:$0xff]  }
 0x20b   : > { %8032 = vmatpush1.bf16.msra.mxu0 %v12465_v45  ;;  %v12451_v45 = vld [vmem:[%s16455_s3 + $0x4] ss:$8 sps:$4 sm:$0xff]  }
 0x20c   : > { %8217 = vmatmul.mubr.bf16.gmra.mrb[116].mxu1 %v7484_v17  ;;  %8033 = vmatprep.subr.bf16.mxu0 %v12466_v53 }
 0x20d   : > { %8226 = vmatprep.mubr.bf16.mxu1 %v16733_v49 }
 0x20e   : > { %5933 = vmatmul.mubr.bf16.gmra.mrb[84].mxu0 %v5143_v4  ;;  %v12473_v4 = vld [vmem:[%s16453_s1 + $0x390] ss:$8 sps:$4 sm:$0xff]  }
 0x20f   : > { %8034 = vmatpush1.bf16.msra.mxu0 %v12467_v1  ;;  %5942 = vmatprep.mubr.bf16.mxu0 %v16733_v49 }
 0x210   : > { %8035 = vmatprep.subr.bf16.mxu0 %v12468_v46 }
 0x213   : > { %8036 = vmatpush1.bf16.msra.mxu0 %v12469_v57  ;;  %v14766_v17 = vpop.f32.mrb[80].mxu1 }
 0x214   : > { %8227 = vmatmul.mubr.bf16.gmra.mrb[120].mxu1 %v7551_v15  ;;  %8037 = vmatprep.subr.bf16.mxu0 %v12470_v14  ;;  %v14774_v15 = vpop.f32.mrb[81].mxu1 }
 0x215   : > { %8236 = vmatprep.mubr.bf16.mxu1 %v16733_v49  ;;  %v14780_v12 = vpop.f32.mrb[82].mxu1 }
 0x216   : > { %5943 = vmatmul.mubr.bf16.gmra.mrb[88].mxu0 %v5210_v55  ;;  %v14782_v55 = vpop.f32.mrb[83].mxu1 }
 0x217   : > { %8038 = vmatpush1.bf16.msra.mxu0 %v12471_v28  ;;  %5952 = vmatprep.mubr.bf16.mxu0 %v16733_v49 }
 0x218   : > { %8039 = vmatprep.subr.bf16.mxu0 %v12472_v11  ;;  %v9507_v11 = vrot.slane %v12449_v9, %v13102_v38 }
 0x21b   : > { %8040 = vmatpush1.bf16.msra.mxu0 %v12473_v4  ;;  %v9514_v4 = vrot.slane %v12451_v45, %v13102_v38 }
 0x21c   : > { %8237 = vmatmul.mubr.bf16.gmra.mrb[124].mxu1 %v7618_v0  ;;  %8041 = vmatprep.subr.bf16.mxu0 %v12474_v31 }
 0x21d   : > { %8246 = vmatprep.mubr.bf16.mxu1 %v16733_v49 }
 0x21e   : > { %5953 = vmatmul.mubr.bf16.gmra.mrb[92].mxu0 %v5277_v21  ;;  %v12482_v21 = vld [vmem:[%s16453_s1 + $0x3e4] ss:$8 sps:$4 sm:$0xff]  }
 0x21f   : > { %8042 = vmatpush1.bf16.msra.mxu0 %v12475_v3  ;;  %5962 = vmatprep.mubr.bf16.mxu0 %v16733_v49 }
 0x220   : > { %8043 = vmatprep.subr.bf16.mxu0 %v12476_v18 }
 0x223   : > { %8044 = vmatpush1.bf16.msra.mxu0 %v12477_v19  ;;  %v14814_v0 = vpop.f32.mrb[84].mxu1 }
 0x224   : > { %8247 = vmatmul.mubr.bf16.gmra.mrb[128].mxu1 %v7685_v20  ;;  %8045 = vmatprep.subr.bf16.mxu0 %v12478_v8  ;;  %v14822_v56 = vpop.f32.mrb[85].mxu1  ;;  %v12452_v8 = vld [vmem:[%s16455_s3 + $0x10] ss:$8 sps:$4 sm:$0x11]  }
 0x225   : > { %8256 = vmatprep.mubr.bf16.mxu1 %v16733_v49  ;;  %v14827_v20 = vpop.f32.mrb[86].mxu1 }
 0x226   : > { %5963 = vmatmul.mubr.bf16.gmra.mrb[96].mxu0 %v5344_v50  ;;  %v14829_v50 = vpop.f32.mrb[87].mxu1 }
 0x227   : > { %5972 = vmatprep.mubr.bf16.mxu0 %v16733_v49  ;;  %8046 = vmatpush1.bf16.msra.mxu0 %v12479_v24 }
 0x228   : > { %8047 = vmatprep.subr.bf16.mxu0 %v12480_v52 }
 0x22b   : > { %8048 = vmatpush1.bf16.msra.mxu0 %v12481_v22 }
 0x22c   : > { %8257 = vmatmul.mubr.bf16.gmra.mrb[132].mxu1 %v7752_v63  ;;  %8049 = vmatprep.subr.bf16.mxu0 %v12482_v21  ;;  %v12485_v63 = vld [vmem:[%s16453_s1 + $0x3f0] ss:$8 sps:$4 sm:$0xff]   ;;  %v9515_v21 = vcombine.high %v9507_v11, %v9507_v11 }
 0x22e   : > { %5973 = vmatmul.mubr.bf16.gmra.mrb[100].mxu0 %v5411_v6 }
 0x22f   : > { %5982 = vmatprep.mubr.bf16.mxu0 %v16733_v49  ;;  %8050 = vmatpush1.bf16.msra.mxu0 %v12483_v25  ;;  %v9516_v25 = vcombine.high %v9514_v4, %v9514_v4 }
 0x230   : > { %8051 = vmatprep.subr.bf16.mxu0 %v12484_v43 }
 0x231   : > { %v14850_v35 = vpop.f32.mrb[88].mxu1 }
 0x232   : > { %v14852_v36 = vpop.f32.mrb[89].mxu1 }
 0x233   : > { %8052 = vmatpush1.bf16.msra.mxu0 %v12485_v63  ;;  %16753 = vst [vmem:[#allocation13_spill] sm:$0xff] %v14852_v36  ;;  %v14854_v49 = vpop.f32.mrb[90].mxu1 }
 0x234   : > { %16754 = vst [vmem:[#allocation25_spill] sm:$0xff] %v14854_v49  ;;  %v14856_v6 = vpop.f32.mrb[91].mxu1 }
 0x235   : > { %16755 = vst [vmem:[#allocation26_spill] sm:$0xff] %v14856_v6 }
 0x236   : > { %5983 = vmatmul.mubr.bf16.gmra.mrb[104].mxu0 %v5478_v47 }
 0x237   : > { %8053 = vmatprep.mubr.bf16.mxu0 %v7217_v41 }
 0x23e   : > { %8054 = vmatmul.mubr.bf16.vlgmr.msra.gmra.mrb[108].mxu0 %v7215_v42 }
 0x23f   : > { %8063 = vmatprep.mubr.bf16.mxu0 %v7284_v33 }
 0x242   : > { %v14867_v26 = vpop.f32.mrb[92].mxu1 }
 0x243   : > { %16756 = vst [vmem:[#allocation27_spill] sm:$0xff] %v14867_v26  ;;  %v14869_v48 = vpop.f32.mrb[93].mxu1 }
 0x244   : > { %16757 = vst [vmem:[#allocation14_spill] sm:$0xff] %v14869_v48  ;;  %v14871_v47 = vpop.f32.mrb[94].mxu1 }
 0x245   : > { %16758 = vst [vmem:[#allocation16_spill] sm:$0xff] %v14871_v47  ;;  %v14873_v60 = vpop.f32.mrb[95].mxu1 }
 0x246   : > { %8064 = vmatmul.mubr.bf16.gmra.mrb[112].mxu0 %v7282_v13  ;;  %16759 = vst [vmem:[#allocation15_spill] sm:$0xff] %v14873_v60 }
 0x251   : > { %v14875_v16 = vpop.f32.mrb[96].mxu1 }
 0x252   : > { %16760 = vst [vmem:[#allocation29_spill] sm:$0xff] %v14875_v16  ;;  %v14877_v59 = vpop.f32.mrb[97].mxu1 }
 0x253   : > { %16761 = vst [vmem:[#allocation31_spill] sm:$0xff] %v14877_v59  ;;  %v14879_v23 = vpop.f32.mrb[98].mxu1 }
 0x254   : > { %16762 = vst [vmem:[#allocation32_spill] sm:$0xff] %v14879_v23  ;;  %v14881_v42 = vpop.f32.mrb[99].mxu1 }
 0x255   : > { %16763 = vst [vmem:[#allocation35_spill] sm:$0xff] %v14881_v42 }
 0x263   : > { %v14883_v37 = vpop.f32.mrb[100].mxu1 }
 0x264   : > { %16764 = vst [vmem:[#allocation34_spill] sm:$0xff] %v14883_v37  ;;  %v14885_v32 = vpop.f32.mrb[101].mxu1 }
 0x265   : > { %16765 = vst [vmem:[#allocation33_spill] sm:$0xff] %v14885_v32  ;;  %v14887_v62 = vpop.f32.mrb[102].mxu1 }
 0x266   : > { %16766 = vst [vmem:[#allocation38_spill] sm:$0xff] %v14887_v62  ;;  %v14889_v13 = vpop.f32.mrb[103].mxu1 }
 0x267   : > { %16767 = vst [vmem:[#allocation36_spill] sm:$0xff] %v14889_v13 }
 0x26c   : > { %v14891_v2 = vpop.f32.mrb[104].mxu1 }
 0x26d   : > { %16768 = vst [vmem:[#allocation37_spill] sm:$0xff] %v14891_v2  ;;  %v14893_v41 = vpop.f32.mrb[105].mxu1 }
 0x26e   : > { %16769 = vst [vmem:[#allocation43_spill] sm:$0xff] %v14893_v41  ;;  %v14895_v33 = vpop.f32.mrb[106].mxu1 }
 0x26f   : > { %16770 = vst [vmem:[#allocation40_spill] sm:$0xff] %v14895_v33  ;;  %v14897_v10 = vpop.f32.mrb[107].mxu1 }
 0x270   : > { %16771 = vst [vmem:[#allocation39_spill] sm:$0xff] %v14897_v10 }
 0x2bf   : > { %v14899_v54 = vpop.f32.mrb[136].mxu1 }
 0x2c0   : > { %16772 = vst [vmem:[#allocation41_spill] sm:$0xff] %v14899_v54  ;;  %v14901_v34 = vpop.f32.mrb[137].mxu1 }
 0x2c1   : > { %16773 = vst [vmem:[#allocation42_spill] sm:$0xff] %v14901_v34  ;;  %v14903_v30 = vpop.f32.mrb[138].mxu1 }
 0x2c2   : > { %16774 = vst [vmem:[#allocation30_spill] sm:$0xff] %v14903_v30  ;;  %v14905_v40 = vpop.f32.mrb[139].mxu1 }
 0x2c3   : > { %16775 = vst [vmem:[#allocation44_spill] sm:$0xff] %v14905_v40 }
 0x2c7   : > { %v14907_v44 = vpop.f32.mrb[140].mxu1 }
 0x2c8   : > { %16776 = vst [vmem:[#allocation46_spill] sm:$0xff] %v14907_v44  ;;  %v14915_v53 = vpop.f32.mrb[141].mxu1 }
 0x2c9   : > { %16777 = vst [vmem:[#allocation48_spill] sm:$0xff] %v14915_v53  ;;  %v14917_v1 = vpop.f32.mrb[142].mxu1  ;;  %v5904_v57 = vpop.f32.mrb[72].mxu0 }
 0x2ca   : > { %16778 = vst [vmem:[#allocation47_spill] sm:$0xff] %v14917_v1  ;;  %v14919_v46 = vpop.f32.mrb[143].mxu1  ;;  %v12039_v14 = vadd.f32 %v5904_v57, %v14679_v7  ;;  %v5906_v28 = vpop.f32.mrb[73].mxu0 }
 0x2cb   : > { %16779 = vst [vmem:[#allocation28_spill] sm:$0xff] %v14919_v46  ;;  %v12040_v31 = vadd.f32 %v5906_v28, %v14684_v51  ;;  %v5908_v3 = vpop.f32.mrb[74].mxu0 }
 0x2cc   : > { %v12041_v18 = vadd.f32 %v5908_v3, %v14690_v5  ;;  %v5910_v19 = vpop.f32.mrb[75].mxu0  ;;  %v9556_v3 = vrot.slane %v12452_v8, %v13102_v38  ;;  %v14945_v8 = vrot.slane %v9516_v25, %v13102_v38 }
 0x2cd   : > { %v6029_v24 = vcombine.low %v12039_v14, %v12040_v31  ;;  %v6030_v52 = vcombine.high %v12039_v14, %v12040_v31  ;;  %v12042_v22 = vadd.f32 %v5910_v19, %v14692_v61  ;;  %v14934_v61 = vrot.slane %v9507_v11, %v13102_v38 }
 0x2ce   : > { %v14937_v19 = vrot.slane %v9514_v4, %v13102_v38 }
 0x2cf   : > { %v8198_v7 = vpop.f32.mrb[108].mxu1  ;;  %v6037_v43 = vrot.slane %v6029_v24, %v13102_v38  ;;  %v6044_v63 = vrot.slane %v6030_v52, %v13102_v38  ;;  %v6079_v9 = vcombine.low %v12041_v18, %v12042_v22  ;;  %v6080_v45 = vcombine.high %v12041_v18, %v12042_v22 }
 0x2d0   : > { %v8200_v51 = vpop.f32.mrb[109].mxu1  ;;  %v14942_v22 = vrot.slane %v9515_v21, %v13102_v38  ;;  %v14959_v21 = vrot.slane %v9556_v3, %v13102_v38 }
 0x2d1   : > { %v8503_v5 = vcombine.low %v8198_v7, %v8200_v51  ;;  %v8504_v57 = vcombine.high %v8198_v7, %v8200_v51  ;;  %v8202_v28 = vpop.f32.mrb[110].mxu1  ;;  %v6045_v46 = vcombine.high %v6037_v43, %v6037_v43  ;;  %v6046_v1 = vcombine.high %v6044_v63, %v6044_v63  ;;  %v5914_v31 = vpop.f32.mrb[76].mxu0 }
 0x2d2   : > { %v8204_v14 = vpop.f32.mrb[111].mxu1  ;;  %v5916_v18 = vpop.f32.mrb[77].mxu0  ;;  %v14948_v7 = vrot.slane %v6037_v43, %v13102_v38  ;;  %v14951_v11 = vrot.slane %v6044_v63, %v13102_v38 }
 0x2d3   : > { %v8511_v24 = vrot.slane %v8503_v5, %v13102_v38  ;;  %v8518_v52 = vrot.slane %v8504_v57, %v13102_v38  ;;  %v14954_v4 = vrot.slane %v6045_v46, %v13102_v38  ;;  %v5918_v51 = vpop.f32.mrb[78].mxu0  ;;  %v6087_v5 = vrot.slane %v6079_v9, %v13102_v38 }
 0x2d4   : > { %16780 = vst [vmem:[#allocation50_spill] sm:$0xff] %v14948_v7  ;;  %16781 = vst [vmem:[#allocation51_spill] sm:$0xff] %v14951_v11  ;;  %v6094_v57 = vrot.slane %v6080_v45, %v13102_v38  ;;  %v5920_v53 = vpop.f32.mrb[79].mxu0  ;;  %v14962_v25 = vrot.slane %v6046_v1, %v13102_v38  ;;  %v14969_v46 = vcombine.high %v14934_v61, %v14934_v61 }
 0x2d5   : > { %16782 = vst [vmem:[#allocation52_spill] sm:$0xff] %v14954_v4  ;;  %v8519_v43 = vcombine.high %v8511_v24, %v8511_v24  ;;  %v8520_v44 = vcombine.high %v8518_v52, %v8518_v52  ;;  %v14965_v63 = vrot.slane %v8511_v24, %v13102_v38  ;;  %v14973_v9 = vcombine.high %v14937_v19, %v14937_v19 }
 0x2d6   : > { %16783 = vst [vmem:[#allocation49_spill] sm:$0xff] %v14962_v25  ;;  %v14977_v45 = vcombine.high %v14942_v22, %v14942_v22  ;;  %v14981_v1 = vcombine.high %v14945_v8, %v14945_v8  ;;  %v14990_v34 = vrot.slane %v8518_v52, %v13102_v38  ;;  %v6095_v10 = vcombine.high %v6087_v5, %v6087_v5 }
 0x2d7   : > { %v8208_v40 = vpop.f32.mrb[112].mxu1  ;;  %v6096_v33 = vcombine.high %v6094_v57, %v6094_v57  ;;  %v8553_v41 = vcombine.low %v8202_v28, %v8204_v14  ;;  %v8554_v2 = vcombine.high %v8202_v28, %v8204_v14  ;;  %v14997_v3 = vrot.slane %v8519_v43, %v13102_v38 }
 0x2d8   : > { %v8210_v54 = vpop.f32.mrb[113].mxu1  ;;  %v15000_v24 = vrot.slane %v8520_v44, %v13102_v38  ;;  %v12043_v14 = vadd.f32 %v5914_v31, %v14718_v58  ;;  %v12044_v62 = vadd.f32 %v5916_v18, %v14726_v39  ;;  %v15011_v43 = vadd.f32 %v5918_v51, %v14732_v27 }
 0x2d9   : > { %v14992_v13 = vpop.f32.mrb[114].mxu1  ;;  %v5924_v4 = vpop.f32.mrb[80].mxu0  ;;  %v8561_v11 = vrot.slane %v8553_v41, %v13102_v38  ;;  %v8568_v28 = vrot.slane %v8554_v2, %v13102_v38  ;;  %v8603_v44 = vcombine.low %v8208_v40, %v8210_v54  ;;  %v8604_v7 = vcombine.high %v8208_v40, %v8210_v54 }
 0x2da   : > { %v15004_v30 = vpop.f32.mrb[115].mxu1  ;;  %v5926_v25 = vpop.f32.mrb[81].mxu0  ;;  %v15014_v32 = vadd.f32 %v5920_v53, %v14734_v29  ;;  %v15017_v37 = vrot.slane %v6087_v5, %v13102_v38  ;;  %v15020_v41 = vrot.slane %v6094_v57, %v13102_v38  ;;  %v15023_v58 = vrot.slane %v6095_v10, %v13102_v38 }
 0x2db   : > { %v5928_v52 = vpop.f32.mrb[82].mxu0  ;;  %v15026_v39 = vrot.slane %v6096_v33, %v13102_v38  ;;  %v6129_v2 = vcombine.low %v12043_v14, %v12044_v62  ;;  %v6130_v54 = vcombine.high %v12043_v14, %v12044_v62  ;;  %v8611_v29 = vrot.slane %v8603_v44, %v13102_v38 }
 0x2dc   : > { %16784 = vst [vmem:[#allocation45_spill] sm:$0xff] %v15017_v37  ;;  %16785 = vst [vmem:[#allocation6_spill] sm:$0xff] %v15020_v41  ;;  %v15028_v27 = vpop.f32.mrb[83].mxu0  ;;  %v8618_v40 = vrot.slane %v8604_v7, %v13102_v38  ;;  %v8569_v31 = vcombine.high %v8561_v11, %v8561_v11  ;;  %v8570_v18 = vcombine.high %v8568_v28, %v8568_v28 }
 0x2dd   : > { %16786 = vst [vmem:[#allocation8_spill] sm:$0xff] %v15023_v58  ;;  %16787 = vst [vmem:[#allocation7_spill] sm:$0xff] %v15026_v39  ;;  %v15035_v51 = vrot.slane %v8561_v11, %v13102_v38  ;;  %v15042_v5 = vrot.slane %v8568_v28, %v13102_v38  ;;  %v6137_v62 = vrot.slane %v6129_v2, %v13102_v38 }
 0x2de   : > { %v6144_v7 = vrot.slane %v6130_v54, %v13102_v38  ;;  %v8619_v53 = vcombine.high %v8611_v29, %v8611_v29  ;;  %v8620_v42 = vcombine.high %v8618_v40, %v8618_v40  ;;  %v15065_v11 = vrot.slane %v8569_v31, %v13102_v38 }
 0x2df   : > { %v15037_v10 = vpop.f32.mrb[116].mxu1  ;;  %v6145_v54 = vcombine.high %v6137_v62, %v6137_v62  ;;  %v15068_v44 = vrot.slane %v8570_v18, %v13102_v38  ;;  %v15077_v39 = vrot.slane %v6137_v62, %v13102_v38  ;;  %v15080_v58 = vrot.slane %v8611_v29, %v13102_v38 }
 0x2e0   : > { %v15046_v57 = vpop.f32.mrb[117].mxu1  ;;  %v6146_v37 = vcombine.high %v6144_v7, %v6144_v7  ;;  %v15083_v31 = vrot.slane %v8618_v40, %v13102_v38  ;;  %v15088_v59 = vrot.slane %v6144_v7, %v13102_v38  ;;  %v15091_v41 = vrot.slane %v8619_v53, %v13102_v38 }
 0x2e1   : > { %v15054_v33 = vpop.f32.mrb[118].mxu1  ;;  %v15062_v14 = vpop.f32.mrb[84].mxu0  ;;  %16788 = vst [vmem:[#allocation11_spill] sm:$0xff] %v15077_v39  ;;  %v6179_v2 = vcombine.low %v15011_v43, %v15014_v32  ;;  %v6180_v62 = vcombine.high %v15011_v43, %v15014_v32  ;;  %v15100_v29 = vrot.slane %v6145_v54, %v13102_v38  ;;  %v15103_v40 = vrot.slane %v8620_v42, %v13102_v38 }
 0x2e2   : > { %v15060_v23 = vpop.f32.mrb[119].mxu1  ;;  %v15072_v28 = vpop.f32.mrb[85].mxu0  ;;  %16789 = vst [vmem:[#allocation9_spill] sm:$0xff] %v15088_v59  ;;  %v8653_v7 = vcombine.low %v14992_v13, %v15004_v30  ;;  %v8654_v53 = vcombine.high %v14992_v13, %v15004_v30  ;;  %v15110_v60 = vrot.slane %v6146_v37, %v13102_v38  ;;  %v12047_v32 = vadd.f32 %v5924_v4, %v14766_v17 }
 0x2e3   : > { %v15085_v18 = vpop.f32.mrb[86].mxu0  ;;  %16790 = vst [vmem:[#allocation12_spill] sm:$0xff] %v15100_v29  ;;  %v15113_v47 = vrot.slane %v6179_v2, %v13102_v38  ;;  %v12048_v43 = vadd.f32 %v5926_v25, %v14774_v15  ;;  %v15122_v26 = vadd.f32 %v5928_v52, %v14780_v12  ;;  %v8703_v37 = vcombine.low %v15037_v10, %v15046_v57 }
 0x2e4   : > { %v15097_v16 = vpop.f32.mrb[87].mxu0  ;;  %16791 = vst [vmem:[#allocation23_spill] sm:$0xff] %v15110_v60  ;;  %v8661_v42 = vrot.slane %v8653_v7, %v13102_v38  ;;  %v8668_v48 = vrot.slane %v8654_v53, %v13102_v38  ;;  %v15163_v36 = vrot.slane %v6180_v62, %v13102_v38  ;;  %v8704_v4 = vcombine.high %v15037_v10, %v15046_v57 }
 0x2e5   : > { %16792 = vst [vmem:[#allocation22_spill] sm:$0xff] %v15113_v47  ;;  %v6229_v59 = vcombine.low %v12047_v32, %v12048_v43  ;;  %v6230_v39 = vcombine.high %v12047_v32, %v12048_v43  ;;  %v8711_v60 = vrot.slane %v8703_v37, %v13102_v38  ;;  %v15188_v32 = vadd.f32 %v15028_v27, %v14782_v55 }
 0x2e6   : > { %v8669_v12 = vcombine.high %v8661_v42, %v8661_v42  ;;  %v8670_v52 = vcombine.high %v8668_v48, %v8668_v48  ;;  %v15139_v2 = vrot.slane %v8661_v42, %v13102_v38  ;;  %v15142_v7 = vrot.slane %v8668_v48, %v13102_v38  ;;  %16794 = vst [vmem:[#allocation4_spill] sm:$0xff] %v15163_v36 }
 0x2e7   : > { %v15117_v54 = vpop.f32.mrb[120].mxu1  ;;  %v8753_v43 = vcombine.low %v15054_v33, %v15060_v23  ;;  %v8718_v62 = vrot.slane %v8704_v4, %v13102_v38  ;;  %v8719_v47 = vcombine.high %v8711_v60, %v8711_v60  ;;  %v15196_v10 = vrot.slane %v8711_v60, %v13102_v38 }
 0x2e8   : > { %v15126_v13 = vpop.f32.mrb[121].mxu1  ;;  %v15170_v17 = vrot.slane %v8669_v12, %v13102_v38  ;;  %v15173_v42 = vrot.slane %v8670_v52, %v13102_v38  ;;  %v6237_v12 = vrot.slane %v6229_v59, %v13102_v38  ;;  %v6244_v52 = vrot.slane %v6230_v39, %v13102_v38 }
 0x2e9   : > { %v15136_v25 = vpop.f32.mrb[122].mxu1  ;;  %v15146_v30 = vpop.f32.mrb[88].mxu0  ;;  %v8754_v59 = vcombine.high %v15054_v33, %v15060_v23  ;;  %v8720_v36 = vcombine.high %v8718_v62, %v8718_v62 }
 0x2ea   : > { %v15144_v53 = vpop.f32.mrb[123].mxu1  ;;  %v15156_v6 = vpop.f32.mrb[89].mxu0  ;;  %v6245_v39 = vcombine.high %v6237_v12, %v6237_v12  ;;  %v6246_v37 = vcombine.high %v6244_v52, %v6244_v52  ;;  %v6253_v55 = vrot.slane %v6237_v12, %v13102_v38  ;;  %v6260_v27 = vrot.slane %v6244_v52, %v13102_v38 }
 0x2eb   : > { %16793 = vst [vmem:[#allocation17_spill] sm:$0xff] %v15156_v6  ;;  %v15167_v15 = vpop.f32.mrb[90].mxu0 }
 0x2ec   : > { %16795 = vst [vmem:[#allocation19_spill] sm:$0xff] %v15167_v15  ;;  %v15175_v48 = vpop.f32.mrb[91].mxu0  ;;  %v6267_v12 = vrot.slane %v6245_v39, %v13102_v38  ;;  %v6274_v52 = vrot.slane %v6246_v37, %v13102_v38  ;;  %v15222_v4 = vadd.f32 %v14965_v63, %v6253_v55  ;;  %v9383_v60 = vadd.f32 %v14990_v34, %v6260_v27 }
 0x2ed   : > { %16796 = vst [vmem:[#allocation20_spill] sm:$0xff] %v15175_v48  ;;  %v15211_v48 = vrot.slane %v8718_v62, %v13102_v38  ;;  %v15226_v62 = vrot.slane %v8719_v47, %v13102_v38  ;;  %v16807_v47 = vcombine.high %v14990_v34, %v14990_v34 }
 0x2ee   : > { %16803 = vst [vmem:[#allocation2_spill] sm:$0xff] %v15222_v4  ;;  %v6277_v39 = vcombine.high %v6267_v12, %v6267_v12  ;;  %v6278_v15 = vcombine.high %v6274_v52, %v6274_v52  ;;  %v9380_v37 = vadd.f32 %v14997_v3, %v6267_v12  ;;  %v16808_v12 = vcombine.high %v14997_v3, %v14997_v3 }
 0x2ef   : > { %v15192_v49 = vpop.f32.mrb[124].mxu1 }
 0x2f0   : > { %16797 = vst [vmem:[#allocation18_spill] sm:$0xff] %v15192_v49  ;;  %v15200_v57 = vpop.f32.mrb[125].mxu1  ;;  %v6275_v49 = vcombine.high %v6253_v55, %v6253_v55 }
 0x2f1   : > { %16798 = vst [vmem:[#allocation21_spill] sm:$0xff] %v15200_v57  ;;  %v15204_v29 = vpop.f32.mrb[126].mxu1  ;;  %v15215_v33 = vpop.f32.mrb[92].mxu0 }
 0x2f2   : > { %16799 = vst [vmem:[#allocation10_spill] sm:$0xff] %v15204_v29  ;;  %v15213_v23 = vpop.f32.mrb[127].mxu1  ;;  %16801 = vst [vmem:[#allocation53_spill] sm:$0xff] %v15215_v33  ;;  %v6276_v29 = vcombine.high %v6260_v27, %v6260_v27  ;;  %v15219_v57 = vpop.f32.mrb[93].mxu0  ;;  %v9384_v27 = vadd.f32 %v15000_v24, %v6274_v52  ;;  %v15254_v52 = vadd.f32 %v14973_v9, %v9380_v37 }
 0x2f3   : > { %16800 = vst [vmem:[#allocation24_spill] sm:$0xff] %v15213_v23  ;;  %16802 = vst [vmem:[#allocation3_spill] sm:$0xff] %v15219_v57  ;;  %v15230_v33 = vpop.f32.mrb[94].mxu0  ;;  %v16805_v57 = vcombine.high %v14965_v63, %v14965_v63  ;;  %v15243_v23 = vrot.slane %v8720_v36, %v13102_v38  ;;  %v9382_v63 = vadd.f32 %v16808_v12, %v6277_v39 }
 0x2f4   : > { %16804 = vst [vmem:[#allocation5_spill] sm:$0xff] %v15230_v33  ;;  %v15236_v55 = vpop.f32.mrb[95].mxu0  ;;  %v9385_v4 = vadd.f32 %v16807_v47, %v6276_v29  ;;  %16810 = vst [vmem:[#allocation55_spill] sm:$0xff] %v15254_v52  ;;  %v9609_v36 = vadd.f32 %v14934_v61, %v9383_v60  ;;  %v9610_v47 = vadd.f32 %v14942_v22, %v9384_v27 }
 0x2f5   : > { %v9381_v6 = vadd.f32 %v16805_v57, %v6275_v49  ;;  %16806 = vst [vmem:[#allocation54_spill] sm:$0xff] %v15236_v55  ;;  %v16809_v49 = vcombine.high %v15000_v24, %v15000_v24  ;;  %v9608_v24 = vadd.f32 %v14959_v21, %v9382_v63  ;;  %v6279_v60 = vcombine.low %v15122_v26, %v15188_v32 }
 0x2f6   : > { %v9611_v33 = vadd.f32 %v14969_v46, %v9385_v4  ;;  %v10213_v27 = vcombine.low %v9609_v36, %v9610_v47  ;;  %v6280_v4 = vcombine.high %v15122_v26, %v15188_v32  ;;  %v8761_v12 = vrot.slane %v8753_v43, %v13102_v38 }
 0x2f7   : > { %v9386_v57 = vadd.f32 %v16809_v49, %v6278_v15  ;;  %v15257_v34 = vadd.f32 %v14981_v1, %v9381_v6  ;;  %v15259_v29 = vpop.f32.mrb[128].mxu1  ;;  %v8768_v49 = vrot.slane %v8754_v59, %v13102_v38  ;;  %v6287_v52 = vrot.slane %v6279_v60, %v13102_v38 }
 0x2f8   : > { %16812 = vst [vmem:[#allocation57_spill] sm:$0xff] %v15259_v29  ;;  %v15266_v39 = vpop.f32.mrb[129].mxu1  ;;  %v10223_v26 = vrot.slane %v10213_v27, %v13102_v38  ;;  %v6294_v32 = vrot.slane %v6280_v4, %v13102_v38  ;;  %v8769_v43 = vcombine.high %v8761_v12, %v8761_v12 }
 0x2f9   : > { %16811 = vst [vmem:[#allocation56_spill] sm:$0xff] %v15257_v34  ;;  %16813 = vst [vmem:[#allocation58_spill] sm:$0xff] %v15266_v39  ;;  %v9612_v15 = vadd.f32 %v14977_v45, %v9386_v57  ;;  %v15275_v37 = vpop.f32.mrb[130].mxu1  ;;  %v15283_v63 = vpop.f32.mrb[96].mxu0  ;;  %v10197_v57 = vrot.slane %v9608_v24, %v13102_v38  ;;  %v8770_v59 = vcombine.high %v8768_v49, %v8768_v49 }
 0x2fa   : > { %16814 = vst [vmem:[#allocation59_spill] sm:$0xff] %v15275_v37  ;;  %v15281_v3 = vpop.f32.mrb[131].mxu1  ;;  %16816 = vst [vmem:[#allocation61_spill] sm:$0xff] %v15283_v63  ;;  %v15289_v36 = vpop.f32.mrb[97].mxu0  ;;  %v6295_v24 = vcombine.high %v6287_v52, %v6287_v52  ;;  %v6296_v60 = vcombine.high %v6294_v32, %v6294_v32  ;;  %v6310_v34 = vrot.slane %v6294_v32, %v13102_v38 }
 0x2fb   : > { %16815 = vst [vmem:[#allocation60_spill] sm:$0xff] %v15281_v3  ;;  %v10214_v6 = vcombine.low %v9611_v33, %v9612_v15  ;;  %16817 = vst [vmem:[#allocation62_spill] sm:$0xff] %v15289_v36  ;;  %v10198_v33 = vcombine.high %v10197_v57, %v10197_v57  ;;  %v6303_v15 = vrot.slane %v6287_v52, %v13102_v38  ;;  %v15308_v63 = vpop.f32.mrb[98].mxu0 }
 0x2fc   : > { %11834 = vst.sshfl [vmem:[%s15294_s25 + $0x70] sm:$0x1 pattern:$0x73625140] %v10197_v57  ;;  %v15303_v36 = vrot.slane %v8761_v12, %v13102_v38  ;;  %v15306_v27 = vrot.slane %v8768_v49, %v13102_v38  ;;  %16818 = vst [vmem:[#allocation63_spill] sm:$0xff] %v15308_v63  ;;  %v15314_v52 = vpop.f32.mrb[99].mxu0  ;;  %v6324_v32 = vrot.slane %v6296_v60, %v13102_v38 }
 0x2fd   : > { %v10230_v47 = vrot.slane %v10214_v6, %v13102_v38  ;;  %11835 = vst.sshfl [vmem:[%s15294_s25 + $0x78] sm:$0x1 pattern:$0x73625140] %v10198_v33  ;;  %v6317_v6 = vrot.slane %v6295_v24, %v13102_v38  ;;  %v6325_v57 = vcombine.high %v6303_v15, %v6303_v15  ;;  %16820 = vst [vmem:[#allocation65_spill] sm:$0xff] %v15314_v52 }
 0x2fe   : > { %v6326_v55 = vcombine.high %v6310_v34, %v6310_v34  ;;  %v9387_v12 = vadd.f32 %v15035_v51, %v6303_v15  ;;  %v9391_v49 = vadd.f32 %v15042_v5, %v6310_v34  ;;  %v6328_v24 = vcombine.high %v6324_v32, %v6324_v32 }
 0x2ff   : > { %v10245_v4 = vcombine.low %v10223_v26, %v10230_v47  ;;  %v10246_v37 = vcombine.high %v10223_v26, %v10230_v47  ;;  %v15312_v3 = vpop.f32.mrb[132].mxu1  ;;  %v6327_v33 = vcombine.high %v6317_v6, %v6317_v6  ;;  %v9388_v47 = vadd.f32 %v15065_v11, %v6317_v6 }
 0x300   : > { %16819 = vst [vmem:[#allocation64_spill] sm:$0xff] %v15312_v3  ;;  %v15319_v29 = vpop.f32.mrb[133].mxu1  ;;  %v16822_v60 = vcombine.high %v15035_v51, %v15035_v51  ;;  %v9392_v15 = vadd.f32 %v15068_v44, %v6324_v32  ;;  %v16823_v34 = vcombine.high %v15042_v5, %v15042_v5  ;;  %v9617_v6 = vadd.f32 %v14959_v21, %v9391_v49 }
 0x301   : > { %16821 = vst [vmem:[#allocation66_spill] sm:$0xff] %v15319_v29  ;;  %v15322_v63 = vrot.slane %v10245_v4, %v13102_v38  ;;  %v15325_v26 = vrot.slane %v10246_v37, %v13102_v38  ;;  %v16824_v4 = vcombine.high %v15065_v11, %v15065_v11  ;;  %v9613_v37 = vadd.f32 %v14937_v19, %v9387_v12 }
 0x302   : > { %v9389_v52 = vadd.f32 %v16822_v60, %v6325_v57  ;;  %v9393_v3 = vadd.f32 %v16823_v34, %v6326_v55  ;;  %v9614_v39 = vadd.f32 %v14945_v8, %v9388_v47  ;;  %v16825_v51 = vcombine.high %v15068_v44, %v15068_v44 }
 0x303   : > { %v9390_v29 = vadd.f32 %v16824_v4, %v6327_v33  ;;  %v9618_v5 = vadd.f32 %v14934_v61, %v9392_v15  ;;  %v10285_v12 = vrot.slane %v9617_v6, %v13102_v38  ;;  %v15350_v47 = vrot.slane %v8769_v43, %v13102_v38 }
 0x304   : > { %v9394_v57 = vadd.f32 %v16825_v51, %v6328_v24  ;;  %v9615_v32 = vadd.f32 %v14973_v9, %v9389_v52  ;;  %v9619_v55 = vadd.f32 %v14942_v22, %v9393_v3  ;;  %v10215_v33 = vcombine.low %v9613_v37, %v9614_v39 }
 0x305   : > { %v9616_v11 = vadd.f32 %v14981_v1, %v9390_v29  ;;  %v15353_v44 = vrot.slane %v8770_v59, %v13102_v38  ;;  %v10286_v39 = vcombine.high %v10285_v12, %v10285_v12  ;;  %11836 = vst.sshfl [vmem:[%s15294_s25 + $0x90] sm:$0x1 pattern:$0x73625140] %v10285_v12  ;;  %v12051_v15 = vadd.f32 %v15062_v14, %v14814_v0 }
 0x306   : > { %v10301_v49 = vcombine.low %v9618_v5, %v9619_v55  ;;  %v10237_v29 = vrot.slane %v10215_v33, %v13102_v38  ;;  %v12052_v34 = vadd.f32 %v15072_v28, %v14822_v56  ;;  %v9620_v37 = vadd.f32 %v14969_v46, %v9394_v57 }
 0x307   : > { %v10216_v3 = vcombine.low %v9615_v32, %v9616_v11  ;;  %11837 = vst.sshfl [vmem:[%s15294_s25 + $0x98] sm:$0x1 pattern:$0x73625140] %v10286_v39  ;;  %v15377_v6 = vadd.f32 %v15085_v18, %v14827_v20  ;;  %v8803_v51 = vcombine.low %v15117_v54, %v15126_v13  ;;  %v8804_v0 = vcombine.high %v15117_v54, %v15126_v13 }
 0x308   : > { %v15364_v43 = vrot.slane %v10301_v49, %v13102_v38  ;;  %v6329_v32 = vcombine.low %v12051_v15, %v12052_v34  ;;  %v6330_v5 = vcombine.high %v12051_v15, %v12052_v34  ;;  %v15385_v56 = vadd.f32 %v15097_v16, %v14829_v50 }
 0x309   : > { %v10244_v4 = vrot.slane %v10216_v3, %v13102_v38  ;;  %v8811_v57 = vrot.slane %v8803_v51, %v13102_v38  ;;  %v8853_v20 = vcombine.low %v15136_v25, %v15144_v53  ;;  %v8818_v11 = vrot.slane %v8804_v0, %v13102_v38  ;;  %v15407_v51 = vpop.f32.mrb[134].mxu1 }
 0x30a   : > { %v6337_v18 = vrot.slane %v6329_v32, %v13102_v38  ;;  %v6344_v55 = vrot.slane %v6330_v5, %v13102_v38  ;;  %v6379_v54 = vcombine.low %v15377_v6, %v15385_v56  ;;  %v15409_v32 = vpop.f32.mrb[100].mxu0 }
 0x30b   : > { %v10247_v14 = vcombine.low %v10237_v29, %v10244_v4  ;;  %v10248_v28 = vcombine.high %v10237_v29, %v10244_v4  ;;  %v8819_v16 = vcombine.high %v8811_v57, %v8811_v57  ;;  %v15398_v33 = vrot.slane %v8811_v57, %v13102_v38  ;;  %v15413_v57 = vpop.f32.mrb[135].mxu1 }
 0x30c   : > { %v6345_v12 = vcombine.high %v6337_v18, %v6337_v18  ;;  %v6346_v49 = vcombine.high %v6344_v55, %v6344_v55  ;;  %v6353_v3 = vrot.slane %v6337_v18, %v13102_v38  ;;  %v6360_v29 = vrot.slane %v6344_v55, %v13102_v38  ;;  %v15415_v18 = vpop.f32.mrb[101].mxu0 }
 0x30d   : > { %v10269_v13 = vrot.slane %v10247_v14, %v13102_v38  ;;  %v10276_v50 = vrot.slane %v10248_v28, %v13102_v38  ;;  %v8820_v34 = vcombine.high %v8818_v11, %v8818_v11  ;;  %v15405_v4 = vrot.slane %v8818_v11, %v13102_v38 }
 0x30e   : > { %v6367_v5 = vrot.slane %v6345_v12, %v13102_v38  ;;  %v6374_v0 = vrot.slane %v6346_v49, %v13102_v38  ;;  %v6375_v14 = vcombine.high %v6353_v3, %v6353_v3  ;;  %v6376_v28 = vcombine.high %v6360_v29, %v6360_v29 }
 0x30f   : > { %v10277_v39 = vcombine.low %v15322_v63, %v10269_v13  ;;  %v10278_v15 = vcombine.low %v15325_v26, %v10276_v50  ;;  %v9395_v63 = vadd.f32 %v15080_v58, %v6353_v3  ;;  %v9399_v26 = vadd.f32 %v15083_v31, %v6360_v29 }
 0x310   : > { %v15422_v55 = vrot.slane %v8819_v16, %v13102_v38  ;;  %v15425_v11 = vrot.slane %v8820_v34, %v13102_v38  ;;  %v6377_v13 = vcombine.high %v6367_v5, %v6367_v5  ;;  %v6378_v50 = vcombine.high %v6374_v0, %v6374_v0 }
 0x311   : > { %11349 = vst [vmem:[%s15294_s25 + $0x80] sm:$0xff] %v10277_v39  ;;  %11350 = vst [vmem:[%s15294_s25 + $0x88] sm:$0xff] %v10278_v15  ;;  %v9396_v12 = vadd.f32 %v15091_v41, %v6367_v5  ;;  %v16826_v49 = vcombine.high %v15080_v58, %v15080_v58  ;;  %v9400_v39 = vadd.f32 %v15103_v40, %v6374_v0 }
 0x312   : > { %v16827_v3 = vcombine.high %v15083_v31, %v15083_v31  ;;  %v9621_v16 = vadd.f32 %v14977_v45, %v9395_v63  ;;  %v9625_v15 = vadd.f32 %v14981_v1, %v9399_v26  ;;  %v16828_v34 = vcombine.high %v15091_v41, %v15091_v41 }
 0x313   : > { %v9397_v59 = vadd.f32 %v16826_v49, %v6375_v14  ;;  %v16829_v5 = vcombine.high %v15103_v40, %v15103_v40  ;;  %v9622_v58 = vadd.f32 %v14937_v19, %v9396_v12  ;;  %v9626_v14 = vadd.f32 %v14959_v21, %v9400_v39 }
 0x314   : > { %v9401_v29 = vadd.f32 %v16827_v3, %v6376_v28  ;;  %v9398_v24 = vadd.f32 %v16828_v34, %v6377_v13  ;;  %v10302_v28 = vcombine.low %v9620_v37, %v9621_v16  ;;  %v6387_v34 = vrot.slane %v6379_v54, %v13102_v38 }
 0x315   : > { %v9402_v60 = vadd.f32 %v16829_v5, %v6378_v50  ;;  %v9623_v0 = vadd.f32 %v14945_v8, %v9397_v59  ;;  %v10373_v59 = vrot.slane %v9626_v14, %v13102_v38  ;;  %v16845_v12 = vcombine.high %v15211_v48, %v15211_v48 }
 0x316   : > { %v9627_v31 = vadd.f32 %v14934_v61, %v9401_v29  ;;  %v9624_v41 = vadd.f32 %v14973_v9, %v9398_v24  ;;  %v10318_v50 = vrot.slane %v10302_v28, %v13102_v38  ;;  %v6403_v14 = vrot.slane %v6387_v34, %v13102_v38 }
 0x317   : > { %v9628_v26 = vadd.f32 %v14942_v22, %v9402_v60  ;;  %v10303_v13 = vcombine.low %v9622_v58, %v9623_v0  ;;  %v6380_v60 = vcombine.high %v15377_v6, %v15385_v56  ;;  %v10374_v16 = vcombine.high %v10373_v59, %v10373_v59  ;;  %11838 = vst.sshfl [vmem:[%s15294_s25 + $0xb0] sm:$0x1 pattern:$0x73625140] %v10373_v59 }
 0x318   : > { %v10304_v49 = vcombine.low %v9624_v41, %v9625_v15  ;;  %v10333_v3 = vcombine.low %v15364_v43, %v10318_v50  ;;  %v10334_v29 = vcombine.high %v15364_v43, %v10318_v50  ;;  %v8854_v0 = vcombine.high %v15136_v25, %v15144_v53 }
 0x319   : > { %v10325_v24 = vrot.slane %v10303_v13, %v13102_v38  ;;  %v10389_v39 = vcombine.low %v9627_v31, %v9628_v26  ;;  %v6394_v15 = vrot.slane %v6380_v60, %v13102_v38  ;;  %11839 = vst.sshfl [vmem:[%s15294_s25 + $0xb8] sm:$0x1 pattern:$0x73625140] %v10374_v16  ;;  %v6395_v43 = vcombine.high %v6387_v34, %v6387_v34 }
 0x31a   : > { %v10332_v5 = vrot.slane %v10304_v49, %v13102_v38  ;;  %v10343_v6 = vrot.slane %v10333_v3, %v13102_v38  ;;  %v10350_v56 = vrot.slane %v10334_v29, %v13102_v38  ;;  %v6425_v13 = vcombine.high %v6403_v14, %v6403_v14 }
 0x31b   : > { %v15468_v58 = vrot.slane %v10389_v39, %v13102_v38  ;;  %v6396_v28 = vcombine.high %v6394_v15, %v6394_v15  ;;  %v6410_v41 = vrot.slane %v6394_v15, %v13102_v38  ;;  %v6417_v26 = vrot.slane %v6395_v43, %v13102_v38 }
 0x31c   : > { %v10335_v31 = vcombine.low %v10325_v24, %v10332_v5  ;;  %v10336_v54 = vcombine.high %v10325_v24, %v10332_v5  ;;  %v9403_v50 = vadd.f32 %v15139_v2, %v6403_v14  ;;  %v8861_v59 = vrot.slane %v8853_v20, %v13102_v38 }
 0x31d   : > { %v6424_v24 = vrot.slane %v6396_v28, %v13102_v38  ;;  %v6426_v60 = vcombine.high %v6410_v41, %v6410_v41  ;;  %v6427_v3 = vcombine.high %v6417_v26, %v6417_v26  ;;  %v9404_v29 = vadd.f32 %v15170_v17, %v6417_v26 }
 0x31e   : > { %v10357_v49 = vrot.slane %v10335_v31, %v13102_v38  ;;  %v10364_v39 = vrot.slane %v10336_v54, %v13102_v38  ;;  %v16830_v16 = vcombine.high %v15139_v2, %v15139_v2  ;;  %v9407_v5 = vadd.f32 %v15142_v7, %v6410_v41 }
 0x31f   : > { %v6428_v20 = vcombine.high %v6424_v24, %v6424_v24  ;;  %v9408_v15 = vadd.f32 %v15173_v42, %v6424_v24  ;;  %v16831_v43 = vcombine.high %v15170_v17, %v15170_v17  ;;  %v16832_v31 = vcombine.high %v15142_v7, %v15142_v7 }
 0x320   : > { %v9405_v34 = vadd.f32 %v16830_v16, %v6425_v13  ;;  %v10365_v25 = vcombine.low %v10343_v6, %v10357_v49  ;;  %v10366_v53 = vcombine.low %v10350_v56, %v10364_v39  ;;  %v9629_v28 = vadd.f32 %v14969_v46, %v9403_v50  ;;  %v15509_v13 = vpop.f32.mrb[102].mxu0 }
 0x321   : > { %v9406_v14 = vadd.f32 %v16831_v43, %v6427_v3  ;;  %v9409_v54 = vadd.f32 %v16832_v31, %v6426_v60  ;;  %v9630_v2 = vadd.f32 %v14977_v45, %v9404_v29  ;;  %v16833_v6 = vcombine.high %v15173_v42, %v15173_v42  ;;  %v15514_v24 = vpop.f32.mrb[103].mxu0 }
 0x322   : > { %11353 = vst [vmem:[%s15294_s25 + $0xa0] sm:$0xff] %v10365_v25  ;;  %11354 = vst [vmem:[%s15294_s25 + $0xa8] sm:$0xff] %v10366_v53  ;;  %v9631_v41 = vadd.f32 %v14937_v19, %v9405_v34  ;;  %v9633_v26 = vadd.f32 %v14973_v9, %v9407_v5  ;;  %v9634_v17 = vadd.f32 %v14981_v1, %v9408_v15 }
 0x323   : > { %v9410_v56 = vadd.f32 %v16833_v6, %v6428_v20  ;;  %v9632_v7 = vadd.f32 %v14945_v8, %v9406_v14  ;;  %v9635_v50 = vadd.f32 %v14959_v21, %v9409_v54  ;;  %v10390_v49 = vcombine.low %v9629_v28, %v9630_v2  ;;  %v16834_v28 = vld [vmem:[#allocation13_spill] sm:$0xff]  ;;  %v16842_v54 = vld [vmem:[#allocation24_spill] sm:$0xff] }
 0x324   : > { %v8868_v39 = vrot.slane %v8854_v0, %v13102_v38  ;;  %v10392_v60 = vcombine.low %v9633_v26, %v9634_v17  ;;  %v8869_v42 = vcombine.high %v8861_v59, %v8861_v59  ;;  %v15517_v3 = vrot.slane %v8861_v59, %v13102_v38  ;;  %v16835_v2 = vld [vmem:[#allocation17_spill] sm:$0xff] }
 0x325   : > { %v12055_v29 = vadd.f32 %v15146_v30, %v14850_v35  ;;  %v10391_v16 = vcombine.low %v9631_v41, %v9632_v7  ;;  %v10406_v34 = vrot.slane %v10390_v49, %v13102_v38  ;;  %v10461_v5 = vrot.slane %v9635_v50, %v13102_v38  ;;  %v15545_v41 = vpop.f32.mrb[104].mxu0 }
 0x326   : > { %v8870_v25 = vcombine.high %v8868_v39, %v8868_v39  ;;  %v10420_v53 = vrot.slane %v10392_v60, %v13102_v38  ;;  %v15525_v0 = vrot.slane %v8868_v39, %v13102_v38  ;;  %v15528_v20 = vrot.slane %v8869_v42, %v13102_v38  ;;  %v15550_v50 = vpop.f32.mrb[105].mxu0 }
 0x327   : > { %v10413_v35 = vrot.slane %v10391_v16, %v13102_v38  ;;  %v10421_v30 = vcombine.low %v15468_v58, %v10406_v34  ;;  %v10422_v15 = vcombine.high %v15468_v58, %v10406_v34  ;;  %v10462_v43 = vcombine.high %v10461_v5, %v10461_v5  ;;  %11840 = vst.sshfl [vmem:[%s15294_s25 + $0xd0] sm:$0x1 pattern:$0x73625140] %v10461_v5  ;;  %v16836_v5 = vld [vmem:[#allocation25_spill] sm:$0xff] }
 0x328   : > { %v15537_v14 = vrot.slane %v8870_v25, %v13102_v38  ;;  %v12056_v6 = vadd.f32 %v16835_v2, %v16834_v28  ;;  %v9636_v42 = vadd.f32 %v14934_v61, %v9410_v56  ;;  %v16837_v25 = vld [vmem:[#allocation19_spill] sm:$0xff]  ;;  %v16841_v2 = vld [vmem:[#allocation20_spill] sm:$0xff] }
 0x329   : > { %v10423_v26 = vcombine.low %v10413_v35, %v10420_v53  ;;  %v10424_v17 = vcombine.high %v10413_v35, %v10420_v53  ;;  %v10431_v58 = vrot.slane %v10421_v30, %v13102_v38  ;;  %v10438_v7 = vrot.slane %v10422_v15, %v13102_v38  ;;  %11841 = vst.sshfl [vmem:[%s15294_s25 + $0xd8] sm:$0x1 pattern:$0x73625140] %v10462_v43  ;;  %v16838_v35 = vld [vmem:[#allocation21_spill] sm:$0xff]  ;;  %v16839_v30 = vld [vmem:[#allocation18_spill] sm:$0xff] }
 0x32a   : > { %v6429_v39 = vcombine.low %v12055_v29, %v12056_v6  ;;  %v6430_v60 = vcombine.high %v12055_v29, %v12056_v6  ;;  %v15559_v53 = vadd.f32 %v16837_v25, %v16836_v5  ;;  %v8903_v15 = vcombine.low %v16839_v30, %v16838_v35  ;;  %v16840_v29 = vld [vmem:[#allocation26_spill] sm:$0xff] }
 0x32b   : > { %v10445_v16 = vrot.slane %v10423_v26, %v13102_v38  ;;  %v10452_v34 = vrot.slane %v10424_v17, %v13102_v38  ;;  %v8904_v56 = vcombine.high %v16839_v30, %v16838_v35  ;;  %v12058_v6 = vadd.f32 %v16841_v2, %v16840_v29  ;;  %v16843_v5 = vld [vmem:[#allocation10_spill] sm:$0xff] }
 0x32c   : > { %v6437_v43 = vrot.slane %v6429_v39, %v13102_v38  ;;  %v6444_v28 = vrot.slane %v6430_v60, %v13102_v38  ;;  %v8911_v49 = vrot.slane %v8903_v15, %v13102_v38  ;;  %v8953_v25 = vcombine.low %v16843_v5, %v16842_v54 }
 0x32d   : > { %v10453_v26 = vcombine.low %v10431_v58, %v10445_v16  ;;  %v10454_v17 = vcombine.low %v10438_v7, %v10452_v34  ;;  %v8918_v60 = vrot.slane %v8904_v56, %v13102_v38  ;;  %v6479_v58 = vcombine.low %v15559_v53, %v12058_v6 }
 0x32e   : > { %v6445_v31 = vcombine.high %v6437_v43, %v6437_v43  ;;  %v6446_v59 = vcombine.high %v6444_v28, %v6444_v28  ;;  %v6453_v37 = vrot.slane %v6437_v43, %v13102_v38  ;;  %v6460_v39 = vrot.slane %v6444_v28, %v13102_v38 }
 0x32f   : > { %11357 = vst [vmem:[%s15294_s25 + $0xc0] sm:$0xff] %v10453_v26  ;;  %11358 = vst [vmem:[%s15294_s25 + $0xc8] sm:$0xff] %v10454_v17  ;;  %v8919_v35 = vcombine.high %v8911_v49, %v8911_v49  ;;  %v15578_v30 = vrot.slane %v8911_v49, %v13102_v38  ;;  %v8920_v29 = vcombine.high %v8918_v60, %v8918_v60 }
 0x330   : > { %v6467_v7 = vrot.slane %v6445_v31, %v13102_v38  ;;  %v6474_v16 = vrot.slane %v6446_v59, %v13102_v38  ;;  %v6475_v34 = vcombine.high %v6453_v37, %v6453_v37  ;;  %v6476_v15 = vcombine.high %v6460_v39, %v6460_v39 }
 0x331   : > { %v9411_v43 = vadd.f32 %v15196_v10, %v6453_v37  ;;  %v9415_v28 = vadd.f32 %v15211_v48, %v6460_v39  ;;  %v15586_v2 = vrot.slane %v8918_v60, %v13102_v38  ;;  %v16844_v17 = vcombine.high %v15196_v10, %v15196_v10 }
 0x332   : > { %v6477_v56 = vcombine.high %v6467_v7, %v6467_v7  ;;  %v6478_v26 = vcombine.high %v6474_v16, %v6474_v16  ;;  %v9412_v49 = vadd.f32 %v15226_v62, %v6467_v7  ;;  %v9416_v59 = vadd.f32 %v15243_v23, %v6474_v16 }
 0x333   : > { %v9413_v31 = vadd.f32 %v16844_v17, %v6475_v34  ;;  %v9417_v37 = vadd.f32 %v16845_v12, %v6476_v15  ;;  %v9637_v39 = vadd.f32 %v14942_v22, %v9411_v43  ;;  %v9641_v40 = vadd.f32 %v14945_v8, %v9415_v28 }
 0x334   : > { %v16846_v60 = vcombine.high %v15226_v62, %v15226_v62  ;;  %v16847_v7 = vcombine.high %v15243_v23, %v15243_v23  ;;  %v9638_v10 = vadd.f32 %v14969_v46, %v9412_v49  ;;  %v9642_v34 = vadd.f32 %v14973_v9, %v9416_v59 }
 0x335   : > { %v9639_v16 = vadd.f32 %v14977_v45, %v9413_v31  ;;  %v9643_v48 = vadd.f32 %v14981_v1, %v9417_v37  ;;  %v10477_v12 = vcombine.low %v9636_v42, %v9637_v39  ;;  %v15609_v15 = vrot.slane %v8919_v35, %v13102_v38 }
 0x336   : > { %v9414_v63 = vadd.f32 %v16846_v60, %v6477_v56  ;;  %v9418_v52 = vadd.f32 %v16847_v7, %v6478_v26  ;;  %v15614_v23 = vrot.slane %v8920_v29, %v13102_v38  ;;  %v6480_v59 = vcombine.high %v15559_v53, %v12058_v6 }
 0x337   : > { %v10478_v28 = vcombine.low %v9638_v10, %v9639_v16  ;;  %v10480_v56 = vcombine.low %v9642_v34, %v9643_v48  ;;  %v10487_v26 = vrot.slane %v10477_v12, %v13102_v38  ;;  %v6487_v37 = vrot.slane %v6479_v58, %v13102_v38  ;;  %v15636_v12 = vpop.f32.mrb[106].mxu0 }
 0x338   : > { %v9640_v43 = vadd.f32 %v14937_v19, %v9414_v63  ;;  %v9644_v62 = vadd.f32 %v14959_v21, %v9418_v52  ;;  %v6494_v10 = vrot.slane %v6480_v59, %v13102_v38  ;;  %v8954_v48 = vcombine.high %v16843_v5, %v16842_v54 }
 0x339   : > { %v10494_v17 = vrot.slane %v10478_v28, %v13102_v38  ;;  %v10508_v29 = vrot.slane %v10480_v56, %v13102_v38  ;;  %v6495_v16 = vcombine.high %v6487_v37, %v6487_v37  ;;  %v6503_v34 = vrot.slane %v6487_v37, %v13102_v38 }
 0x33a   : > { %v10479_v35 = vcombine.low %v9640_v43, %v9641_v40  ;;  %v10549_v63 = vrot.slane %v9644_v62, %v13102_v38  ;;  %v15641_v62 = vpop.f32.mrb[107].mxu0  ;;  %v6496_v28 = vcombine.high %v6494_v10, %v6494_v10  ;;  %v6510_v56 = vrot.slane %v6494_v10, %v13102_v38 }
 0x33b   : > { %v10509_v40 = vcombine.low %v10487_v26, %v10494_v17  ;;  %v10510_v60 = vcombine.high %v10487_v26, %v10494_v17  ;;  %16848 = vst [vmem:[#allocation13_spill] sm:$0xff] %v15641_v62  ;;  %v6517_v26 = vrot.slane %v6495_v16, %v13102_v38  ;;  %v8961_v59 = vrot.slane %v8953_v25, %v13102_v38 }
 0x33c   : > { %v10501_v39 = vrot.slane %v10479_v35, %v13102_v38  ;;  %v10550_v7 = vcombine.high %v10549_v63, %v10549_v63  ;;  %11842 = vst.sshfl [vmem:[%s15294_s25 + $0xf0] sm:$0x1 pattern:$0x73625140] %v10549_v63  ;;  %v6525_v35 = vcombine.high %v6503_v34, %v6503_v34  ;;  %v6524_v37 = vrot.slane %v6496_v28, %v13102_v38 }
 0x33d   : > { %v10519_v58 = vrot.slane %v10509_v40, %v13102_v38  ;;  %v10526_v43 = vrot.slane %v10510_v60, %v13102_v38  ;;  %v6527_v40 = vcombine.high %v6517_v26, %v6517_v26  ;;  %v9420_v60 = vadd.f32 %v15350_v47, %v6517_v26 }
 0x33e   : > { %v10511_v53 = vcombine.low %v10501_v39, %v10508_v29  ;;  %v10512_v6 = vcombine.high %v10501_v39, %v10508_v29  ;;  %11843 = vst.sshfl [vmem:[%s15294_s25 + $0xf8] sm:$0x1 pattern:$0x73625140] %v10550_v7  ;;  %v9419_v29 = vadd.f32 %v15303_v36, %v6503_v34  ;;  %v6526_v39 = vcombine.high %v6510_v56, %v6510_v56 }
 0x33f   : > { %v16849_v16 = vcombine.high %v15303_v36, %v15303_v36  ;;  %v6528_v34 = vcombine.high %v6524_v37, %v6524_v37  ;;  %v16850_v31 = vcombine.high %v15350_v47, %v15350_v47  ;;  %v9424_v5 = vadd.f32 %v15353_v44, %v6524_v37 }
 0x340   : > { %v10533_v17 = vrot.slane %v10511_v53, %v13102_v38  ;;  %v10540_v63 = vrot.slane %v10512_v6, %v13102_v38  ;;  %v9423_v6 = vadd.f32 %v15306_v27, %v6510_v56  ;;  %v16851_v25 = vcombine.high %v15306_v27, %v15306_v27 }
 0x341   : > { %v9421_v53 = vadd.f32 %v16849_v16, %v6525_v35  ;;  %v9422_v54 = vadd.f32 %v16850_v31, %v6527_v40  ;;  %v9646_v36 = vadd.f32 %v14942_v22, %v9420_v60  ;;  %v16852_v47 = vcombine.high %v15353_v44, %v15353_v44  ;;  %v16856_v16 = vld [vmem:[#allocation53_spill] sm:$0xff] }
 0x342   : > { %v10541_v7 = vcombine.low %v10519_v58, %v10533_v17  ;;  %v10542_v10 = vcombine.low %v10526_v43, %v10540_v63  ;;  %v9425_v28 = vadd.f32 %v16851_v25, %v6526_v39  ;;  %v9645_v58 = vadd.f32 %v14934_v61, %v9419_v29  ;;  %v15677_v17 = vpop.f32.mrb[108].mxu0 }
 0x343   : > { %v9647_v43 = vadd.f32 %v14969_v46, %v9421_v53  ;;  %v9649_v56 = vadd.f32 %v14937_v19, %v9423_v6  ;;  %v9426_v31 = vadd.f32 %v16852_v47, %v6528_v34  ;;  %v9648_v26 = vadd.f32 %v14977_v45, %v9422_v54  ;;  %16853 = vst [vmem:[#allocation17_spill] sm:$0xff] %v15677_v17  ;;  %v15683_v40 = vpop.f32.mrb[109].mxu0  ;;  %v16858_v47 = vld [vmem:[#allocation3_spill] sm:$0xff] }
 0x344   : > { %11361 = vst [vmem:[%s15294_s25 + $0xe0] sm:$0xff] %v10541_v7  ;;  %11362 = vst [vmem:[%s15294_s25 + $0xe8] sm:$0xff] %v10542_v10  ;;  %v9650_v35 = vadd.f32 %v14945_v8, %v9424_v5  ;;  %v9651_v27 = vadd.f32 %v14973_v9, %v9425_v28  ;;  %v10565_v63 = vcombine.low %v9645_v58, %v9646_v36  ;;  %v16855_v10 = vld [vmem:[#allocation27_spill] sm:$0xff] }
 0x345   : > { %v8968_v29 = vrot.slane %v8954_v48, %v13102_v38  ;;  %v8969_v37 = vcombine.high %v8961_v59, %v8961_v59  ;;  %v15681_v39 = vrot.slane %v8961_v59, %v13102_v38  ;;  %16854 = vst [vmem:[#allocation25_spill] sm:$0xff] %v15683_v40  ;;  %v9652_v44 = vadd.f32 %v14981_v1, %v9426_v31 }
 0x346   : > { %v10566_v60 = vcombine.low %v9647_v43, %v9648_v26  ;;  %v10567_v7 = vcombine.low %v9649_v56, %v9650_v35  ;;  %v12059_v53 = vadd.f32 %v16856_v16, %v16855_v10  ;;  %v10575_v6 = vrot.slane %v10565_v63, %v13102_v38  ;;  %v16857_v56 = vld [vmem:[#allocation14_spill] sm:$0xff]  ;;  %v16859_v63 = vld [vmem:[#allocation16_spill] sm:$0xff]  ;;  %v16862_v16 = vld [vmem:[#allocation57_spill] sm:$0xff] }
 0x347   : > { %v8970_v34 = vcombine.high %v8968_v29, %v8968_v29  ;;  %v15690_v54 = vrot.slane %v8968_v29, %v13102_v38  ;;  %v15693_v48 = vrot.slane %v8969_v37, %v13102_v38  ;;  %v10568_v59 = vcombine.low %v9651_v27, %v9652_v44  ;;  %v16860_v29 = vld [vmem:[#allocation5_spill] sm:$0xff]  ;;  %v16861_v10 = vld [vmem:[#allocation58_spill] sm:$0xff] }
 0x348   : > { %v10582_v5 = vrot.slane %v10566_v60, %v13102_v38  ;;  %v10589_v25 = vrot.slane %v10567_v7, %v13102_v38  ;;  %v12060_v31 = vadd.f32 %v16858_v47, %v16857_v56  ;;  %v15711_v37 = vadd.f32 %v16860_v29, %v16859_v63  ;;  %v16863_v29 = vld [vmem:[#allocation15_spill] sm:$0xff] }
 0x349   : > { %v15700_v58 = vrot.slane %v8970_v34, %v13102_v38  ;;  %v10596_v26 = vrot.slane %v10568_v59, %v13102_v38  ;;  %v9003_v34 = vcombine.low %v16862_v16, %v16861_v10  ;;  %v9004_v47 = vcombine.high %v16862_v16, %v16861_v10 }
 0x34a   : > { %v10597_v35 = vcombine.low %v10575_v6, %v10582_v5  ;;  %v10598_v27 = vcombine.high %v10575_v6, %v10582_v5  ;;  %v6529_v60 = vcombine.low %v12059_v53, %v12060_v31  ;;  %v6530_v7 = vcombine.high %v12059_v53, %v12060_v31 }
 0x34b   : > { %v10599_v43 = vcombine.low %v10589_v25, %v10596_v26  ;;  %v10600_v36 = vcombine.high %v10589_v25, %v10596_v26  ;;  %v9011_v63 = vrot.slane %v9003_v34, %v13102_v38  ;;  %v16864_v25 = vld [vmem:[#allocation54_spill] sm:$0xff]  ;;  %v16884_v62 = vcombine.high %v15528_v20, %v15528_v20 }
 0x34c   : > { %v10607_v56 = vrot.slane %v10597_v35, %v13102_v38  ;;  %v10614_v59 = vrot.slane %v10598_v27, %v13102_v38  ;;  %v6537_v6 = vrot.slane %v6529_v60, %v13102_v38  ;;  %v6544_v5 = vrot.slane %v6530_v7, %v13102_v38  ;;  %v16865_v35 = vld [vmem:[#allocation60_spill] sm:$0xff]  ;;  %v16866_v27 = vld [vmem:[#allocation59_spill] sm:$0xff] }
 0x34d   : > { %v10621_v53 = vrot.slane %v10599_v43, %v13102_v38  ;;  %v10628_v31 = vrot.slane %v10600_v36, %v13102_v38  ;;  %v15728_v26 = vadd.f32 %v16864_v25, %v16863_v29  ;;  %v9053_v60 = vcombine.low %v16866_v27, %v16865_v35 }
 0x34e   : > { %v6545_v44 = vcombine.high %v6537_v6, %v6537_v6  ;;  %v6546_v7 = vcombine.high %v6544_v5, %v6544_v5  ;;  %v6553_v28 = vrot.slane %v6537_v6, %v13102_v38  ;;  %v6560_v10 = vrot.slane %v6544_v5, %v13102_v38 }
 0x34f   : > { %v10629_v16 = vcombine.low %v10607_v56, %v10621_v53  ;;  %v10630_v34 = vcombine.low %v10614_v59, %v10628_v31  ;;  %v9018_v43 = vrot.slane %v9004_v47, %v13102_v38  ;;  %v9019_v52 = vcombine.high %v9011_v63, %v9011_v63  ;;  %v15748_v31 = vpop.f32.mrb[110].mxu0 }
 0x350   : > { %v6567_v36 = vrot.slane %v6545_v44, %v13102_v38  ;;  %v6574_v42 = vrot.slane %v6546_v7, %v13102_v38  ;;  %v6575_v29 = vcombine.high %v6553_v28, %v6553_v28  ;;  %v6576_v25 = vcombine.high %v6560_v10, %v6560_v10  ;;  %16868 = vst [vmem:[#allocation19_spill] sm:$0xff] %v15748_v31 }
 0x351   : > { %11365 = vst [vmem:[%s15294_s25 + $0x100] sm:$0xff] %v10629_v16  ;;  %11366 = vst [vmem:[%s15294_s25 + $0x108] sm:$0xff] %v10630_v34  ;;  %v9427_v49 = vadd.f32 %v15398_v33, %v6553_v28  ;;  %v9431_v40 = vadd.f32 %v15405_v4, %v6560_v10  ;;  %v9020_v6 = vcombine.high %v9018_v43, %v9018_v43  ;;  %v15756_v34 = vpop.f32.mrb[111].mxu0 }
 0x352   : > { %v15742_v5 = vrot.slane %v9011_v63, %v13102_v38  ;;  %v6577_v56 = vcombine.high %v6567_v36, %v6567_v36  ;;  %v6578_v59 = vcombine.high %v6574_v42, %v6574_v42  ;;  %v9428_v47 = vadd.f32 %v15422_v55, %v6567_v36  ;;  %16870 = vst [vmem:[#allocation21_spill] sm:$0xff] %v15756_v34 }
 0x353   : > { %v16867_v44 = vcombine.high %v15398_v33, %v15398_v33  ;;  %v9432_v7 = vadd.f32 %v15425_v11, %v6574_v42  ;;  %v16869_v28 = vcombine.high %v15405_v4, %v15405_v4  ;;  %v9653_v16 = vadd.f32 %v14959_v21, %v9427_v49 }
 0x354   : > { %v9657_v63 = vadd.f32 %v14977_v45, %v9431_v40  ;;  %v16871_v36 = vcombine.high %v15422_v55, %v15422_v55  ;;  %v9654_v42 = vadd.f32 %v14934_v61, %v9428_v47 }
 0x355   : > { %v9429_v53 = vadd.f32 %v16867_v44, %v6575_v29  ;;  %v9433_v10 = vadd.f32 %v16869_v28, %v6576_v25  ;;  %v16872_v29 = vcombine.high %v15425_v11, %v15425_v11  ;;  %v9658_v25 = vadd.f32 %v14937_v19, %v9432_v7 }
 0x356   : > { %v9430_v33 = vadd.f32 %v16871_v36, %v6577_v56  ;;  %v10637_v40 = vrot.slane %v9653_v16, %v13102_v38  ;;  %v15770_v28 = vrot.slane %v9018_v43, %v13102_v38  ;;  %v15774_v11 = vrot.slane %v9019_v52, %v13102_v38  ;;  %v16879_v52 = vld [vmem:[#allocation63_spill] sm:$0xff] }
 0x357   : > { %v9434_v44 = vadd.f32 %v16872_v29, %v6578_v59  ;;  %v9655_v4 = vadd.f32 %v14942_v22, %v9429_v53  ;;  %v9659_v49 = vadd.f32 %v14945_v8, %v9433_v10  ;;  %v15777_v59 = vrot.slane %v9020_v6, %v13102_v38 }
 0x358   : > { %v9656_v55 = vadd.f32 %v14969_v46, %v9430_v33  ;;  %v10638_v47 = vcombine.high %v10637_v40, %v10637_v40  ;;  %11844 = vst.sshfl [vmem:[%s15294_s25 + $0x110] sm:$0x1 pattern:$0x73625140] %v10637_v40  ;;  %v6579_v33 = vcombine.low %v15711_v37, %v15728_v26  ;;  %v6580_v29 = vcombine.high %v15711_v37, %v15728_v26  ;;  %v16874_v40 = vld [vmem:[#allocation61_spill] sm:$0xff]  ;;  %v16876_v37 = vld [vmem:[#allocation31_spill] sm:$0xff] }
 0x359   : > { %v10653_v56 = vcombine.low %v9654_v42, %v9655_v4  ;;  %v10655_v53 = vcombine.low %v9658_v25, %v9659_v49  ;;  %v9054_v4 = vcombine.high %v16866_v27, %v16865_v35  ;;  %v9061_v25 = vrot.slane %v9053_v60, %v13102_v38  ;;  %v16873_v49 = vld [vmem:[#allocation29_spill] sm:$0xff]  ;;  %v16877_v26 = vld [vmem:[#allocation62_spill] sm:$0xff] }
 0x35a   : > { %v10654_v43 = vcombine.low %v9656_v55, %v9657_v63  ;;  %11845 = vst.sshfl [vmem:[%s15294_s25 + $0x118] sm:$0x1 pattern:$0x73625140] %v10638_v47  ;;  %v9660_v63 = vadd.f32 %v14973_v9, %v9434_v44  ;;  %v15804_v55 = vadd.f32 %v16874_v40, %v16873_v49  ;;  %v6587_v47 = vrot.slane %v6579_v33, %v13102_v38 }
 0x35b   : > { %v10663_v16 = vrot.slane %v10653_v56, %v13102_v38  ;;  %v15790_v6 = vrot.slane %v10655_v53, %v13102_v38  ;;  %v15806_v56 = vpop.f32.mrb[112].mxu0  ;;  %v6594_v53 = vrot.slane %v6580_v29, %v13102_v38  ;;  %v15812_v44 = vadd.f32 %v16877_v26, %v16876_v37 }
 0x35c   : > { %v10670_v42 = vrot.slane %v10654_v43, %v13102_v38  ;;  %16875 = vst [vmem:[#allocation18_spill] sm:$0xff] %v15806_v56  ;;  %v16878_v43 = vld [vmem:[#allocation32_spill] sm:$0xff]  ;;  %v15818_v35 = vpop.f32.mrb[113].mxu0  ;;  %v9068_v49 = vrot.slane %v9054_v4, %v13102_v38  ;;  %v9069_v40 = vcombine.high %v9061_v25, %v9061_v25  ;;  %v6595_v10 = vcombine.high %v6587_v47, %v6587_v47 }
 0x35d   : > { %v15816_v36 = vadd.f32 %v16879_v52, %v16878_v43  ;;  %16880 = vst [vmem:[#allocation26_spill] sm:$0xff] %v15818_v35  ;;  %v6596_v7 = vcombine.high %v6594_v53, %v6594_v53  ;;  %v6603_v33 = vrot.slane %v6587_v47, %v13102_v38  ;;  %v6610_v29 = vrot.slane %v6594_v53, %v13102_v38  ;;  %v15842_v56 = vpop.f32.mrb[114].mxu0 }
 0x35e   : > { %v10685_v27 = vcombine.low %v10663_v16, %v10670_v42  ;;  %v10686_v60 = vcombine.high %v10663_v16, %v10670_v42  ;;  %v9070_v52 = vcombine.high %v9068_v49, %v9068_v49  ;;  %v15830_v43 = vrot.slane %v9061_v25, %v13102_v38  ;;  %16881 = vst [vmem:[#allocation20_spill] sm:$0xff] %v15842_v56  ;;  %v15848_v17 = vpop.f32.mrb[115].mxu0 }
 0x35f   : > { %v6617_v16 = vrot.slane %v6595_v10, %v13102_v38  ;;  %v6624_v42 = vrot.slane %v6596_v7, %v13102_v38  ;;  %v6625_v4 = vcombine.high %v6603_v33, %v6603_v33  ;;  %v6626_v35 = vcombine.high %v6610_v29, %v6610_v29 }
 0x360   : > { %v15824_v37 = vrot.slane %v10685_v27, %v13102_v38  ;;  %v15827_v26 = vrot.slane %v10686_v60, %v13102_v38  ;;  %v9435_v47 = vadd.f32 %v15517_v3, %v6603_v33  ;;  %v9439_v53 = vadd.f32 %v15525_v0, %v6610_v29 }
 0x361   : > { %v15837_v27 = vrot.slane %v9068_v49, %v13102_v38  ;;  %v15840_v60 = vrot.slane %v9069_v40, %v13102_v38  ;;  %v6627_v25 = vcombine.high %v6617_v16, %v6617_v16  ;;  %v6628_v34 = vcombine.high %v6624_v42, %v6624_v42 }
 0x362   : > { %v9436_v10 = vadd.f32 %v15528_v20, %v6617_v16  ;;  %v16882_v7 = vcombine.high %v15517_v3, %v15517_v3  ;;  %v9440_v33 = vadd.f32 %v15537_v14, %v6624_v42  ;;  %v16883_v49 = vcombine.high %v15525_v0, %v15525_v0 }
 0x363   : > { %v9661_v40 = vadd.f32 %v14981_v1, %v9435_v47  ;;  %v9665_v56 = vadd.f32 %v14969_v46, %v9439_v53  ;;  %v9438_v16 = vadd.f32 %v16884_v62, %v6627_v25  ;;  %v16885_v3 = vcombine.high %v15537_v14, %v15537_v14 }
 0x364   : > { %v9437_v31 = vadd.f32 %v16882_v7, %v6625_v4  ;;  %v9441_v29 = vadd.f32 %v16883_v49, %v6626_v35  ;;  %v9662_v7 = vadd.f32 %v14959_v21, %v9436_v10  ;;  %v9666_v0 = vadd.f32 %v14977_v45, %v9440_v33 }
 0x365   : > { %v9442_v4 = vadd.f32 %v16885_v3, %v6628_v34  ;;  %v10656_v47 = vcombine.low %v9660_v63, %v9661_v40  ;;  %v15867_v53 = vrot.slane %v9070_v52, %v13102_v38  ;;  %v9664_v20 = vadd.f32 %v14942_v22, %v9438_v16 }
 0x366   : > { %v9663_v42 = vadd.f32 %v14934_v61, %v9437_v31  ;;  %v9667_v35 = vadd.f32 %v14937_v19, %v9441_v29  ;;  %v10725_v14 = vrot.slane %v9662_v7, %v13102_v38  ;;  %v9099_v34 = vcombine.high %v15830_v43, %v15830_v43 }
 0x367   : > { %v9668_v62 = vadd.f32 %v14945_v8, %v9442_v4  ;;  %v10684_v31 = vrot.slane %v10656_v47, %v13102_v38  ;;  %v10742_v25 = vcombine.low %v9665_v56, %v9666_v0  ;;  %v9100_v10 = vcombine.high %v15837_v27, %v15837_v27  ;;  %v16886_v0 = vld [vmem:[#allocation66_spill] sm:$0xff] }
 0x368   : > { %v9101_v63 = vcombine.high %v15840_v60, %v15840_v60  ;;  %v10726_v52 = vcombine.high %v10725_v14, %v10725_v14  ;;  %v10741_v33 = vcombine.low %v9663_v42, %v9664_v20  ;;  %11846 = vst.sshfl [vmem:[%s15294_s25 + $0x130] sm:$0x1 pattern:$0x73625140] %v10725_v14  ;;  %v6629_v56 = vcombine.low %v15804_v55, %v15812_v44 }
 0x369   : > { %v10743_v49 = vcombine.low %v9667_v35, %v9668_v62  ;;  %v10687_v40 = vcombine.low %v15790_v6, %v10684_v31  ;;  %v10688_v16 = vcombine.high %v15790_v6, %v10684_v31  ;;  %v10758_v3 = vrot.slane %v10742_v25, %v13102_v38  ;;  %v16887_v35 = vld [vmem:[#allocation64_spill] sm:$0xff] }
 0x36a   : > { %v10751_v4 = vrot.slane %v10741_v33, %v13102_v38  ;;  %11847 = vst.sshfl [vmem:[%s15294_s25 + $0x138] sm:$0x1 pattern:$0x73625140] %v10726_v52  ;;  %v6630_v42 = vcombine.high %v15804_v55, %v15812_v44  ;;  %v9103_v47 = vcombine.low %v16887_v35, %v16886_v0  ;;  %v6637_v62 = vrot.slane %v6629_v56, %v13102_v38 }
 0x36b   : > { %v15889_v7 = vrot.slane %v10743_v49, %v13102_v38  ;;  %v10709_v20 = vrot.slane %v10687_v40, %v13102_v38  ;;  %v10716_v6 = vrot.slane %v10688_v16, %v13102_v38  ;;  %v9104_v14 = vcombine.high %v16887_v35, %v16886_v0 }
 0x36c   : > { %v10773_v31 = vcombine.low %v10751_v4, %v10758_v3  ;;  %v10774_v25 = vcombine.high %v10751_v4, %v10758_v3  ;;  %v6644_v52 = vrot.slane %v6630_v42, %v13102_v38  ;;  %v9111_v55 = vrot.slane %v9103_v47, %v13102_v38 }
 0x36d   : > { %v10717_v44 = vcombine.low %v15824_v37, %v10709_v20  ;;  %v10718_v33 = vcombine.low %v15827_v26, %v10716_v6  ;;  %v6645_v49 = vcombine.high %v6637_v62, %v6637_v62  ;;  %v6653_v40 = vrot.slane %v6637_v62, %v13102_v38 }
 0x36e   : > { %v15907_v16 = vrot.slane %v10773_v31, %v13102_v38  ;;  %v15910_v56 = vrot.slane %v10774_v25, %v13102_v38  ;;  %v6646_v0 = vcombine.high %v6644_v52, %v6644_v52  ;;  %v6660_v3 = vrot.slane %v6644_v52, %v13102_v38 }
 0x36f   : > { %11369 = vst [vmem:[%s15294_s25 + $0x120] sm:$0xff] %v10717_v44  ;;  %11370 = vst [vmem:[%s15294_s25 + $0x128] sm:$0xff] %v10718_v33  ;;  %v6667_v4 = vrot.slane %v6645_v49, %v13102_v38  ;;  %v6675_v42 = vcombine.high %v6653_v40, %v6653_v40  ;;  %v9443_v37 = vadd.f32 %v15578_v30, %v6653_v40 }
 0x370   : > { %v9118_v26 = vrot.slane %v9104_v14, %v13102_v38  ;;  %v6674_v35 = vrot.slane %v6646_v0, %v13102_v38  ;;  %v6676_v47 = vcombine.high %v6660_v3, %v6660_v3  ;;  %v9447_v20 = vadd.f32 %v15586_v2, %v6660_v3 }
 0x371   : > { %v9119_v6 = vcombine.high %v9111_v55, %v9111_v55  ;;  %v6677_v62 = vcombine.high %v6667_v4, %v6667_v4  ;;  %v9444_v31 = vadd.f32 %v15609_v15, %v6667_v4  ;;  %v16888_v25 = vcombine.high %v15578_v30, %v15578_v30 }
 0x372   : > { %v9669_v44 = vadd.f32 %v14973_v9, %v9443_v37  ;;  %v6678_v33 = vcombine.high %v6674_v35, %v6674_v35  ;;  %v9448_v49 = vadd.f32 %v15614_v23, %v6674_v35  ;;  %v16889_v14 = vcombine.high %v15586_v2, %v15586_v2 }
 0x373   : > { %v9445_v52 = vadd.f32 %v16888_v25, %v6675_v42  ;;  %v9673_v0 = vadd.f32 %v14942_v22, %v9447_v20  ;;  %v16890_v3 = vcombine.high %v15609_v15, %v15609_v15  ;;  %v9670_v4 = vadd.f32 %v14981_v1, %v9444_v31 }
 0x374   : > { %v9449_v40 = vadd.f32 %v16889_v14, %v6676_v47  ;;  %v9120_v42 = vcombine.high %v9118_v26, %v9118_v26  ;;  %v16891_v37 = vcombine.high %v15614_v23, %v15614_v23  ;;  %v9674_v25 = vadd.f32 %v14969_v46, %v9448_v49 }
 0x375   : > { %v9446_v29 = vadd.f32 %v16890_v3, %v6677_v62  ;;  %v9671_v30 = vadd.f32 %v14959_v21, %v9445_v52  ;;  %v15941_v47 = vrot.slane %v9111_v55, %v13102_v38  ;;  %v10744_v20 = vcombine.low %v9669_v44, %v9670_v4  ;;  %v16892_v3 = vld [vmem:[#allocation35_spill] sm:$0xff]  ;;  %v16893_v4 = vld [vmem:[#allocation65_spill] sm:$0xff] }
 0x376   : > { %v9450_v35 = vadd.f32 %v16891_v37, %v6678_v33  ;;  %v9675_v2 = vadd.f32 %v14977_v45, %v9449_v40  ;;  %v15946_v31 = vrot.slane %v9118_v26, %v13102_v38  ;;  %v15949_v23 = vrot.slane %v9119_v6, %v13102_v38 }
 0x377   : > { %v9672_v15 = vadd.f32 %v14934_v61, %v9446_v29  ;;  %v10813_v62 = vrot.slane %v9671_v30, %v13102_v38  ;;  %v15952_v33 = vrot.slane %v9120_v42, %v13102_v38  ;;  %v9149_v55 = vcombine.high %v15941_v47, %v15941_v47 }
 0x378   : > { %v10830_v52 = vcombine.low %v9674_v25, %v9675_v2  ;;  %v10772_v49 = vrot.slane %v10744_v20, %v13102_v38  ;;  %v12066_v30 = vadd.f32 %v16893_v4, %v16892_v3  ;;  %v9676_v25 = vadd.f32 %v14937_v19, %v9450_v35 }
 0x379   : > { %v10814_v29 = vcombine.high %v10813_v62, %v10813_v62  ;;  %v10829_v44 = vcombine.low %v9672_v15, %v9673_v0  ;;  %11848 = vst.sshfl [vmem:[%s15294_s25 + $0x150] sm:$0x1 pattern:$0x73625140] %v10813_v62  ;;  %v9153_v20 = vcombine.low %v15407_v51, %v15413_v57  ;;  %v9154_v62 = vcombine.high %v15407_v51, %v15413_v57 }
 0x37a   : > { %v10846_v14 = vrot.slane %v10830_v52, %v13102_v38  ;;  %v10775_v42 = vcombine.low %v15889_v7, %v10772_v49  ;;  %v10776_v37 = vcombine.high %v15889_v7, %v10772_v49  ;;  %v6679_v2 = vcombine.low %v15816_v36, %v12066_v30 }
 0x37b   : > { %v10839_v0 = vrot.slane %v10829_v44, %v13102_v38  ;;  %11849 = vst.sshfl [vmem:[%s15294_s25 + $0x158] sm:$0x1 pattern:$0x73625140] %v10814_v29  ;;  %v6680_v15 = vcombine.high %v15816_v36, %v12066_v30  ;;  %v9161_v36 = vrot.slane %v9153_v20, %v13102_v38  ;;  %v9168_v3 = vrot.slane %v9154_v62, %v13102_v38 }
 0x37c   : > { %v10797_v52 = vrot.slane %v10775_v42, %v13102_v38  ;;  %v10804_v7 = vrot.slane %v10776_v37, %v13102_v38  ;;  %v6687_v35 = vrot.slane %v6679_v2, %v13102_v38 }
 0x37d   : > { %v10861_v49 = vcombine.low %v10839_v0, %v10846_v14  ;;  %v10862_v29 = vcombine.high %v10839_v0, %v10846_v14  ;;  %v6694_v44 = vrot.slane %v6680_v15, %v13102_v38  ;;  %v9169_v2 = vcombine.high %v9161_v36, %v9161_v36 }
 0x37e   : > { %v10805_v4 = vcombine.low %v15907_v16, %v10797_v52  ;;  %v10806_v51 = vcombine.low %v15910_v56, %v10804_v7  ;;  %v6695_v42 = vcombine.high %v6687_v35, %v6687_v35  ;;  %v6703_v37 = vrot.slane %v6687_v35, %v13102_v38 }
 0x37f   : > { %v15987_v57 = vrot.slane %v10861_v49, %v13102_v38  ;;  %v15990_v30 = vrot.slane %v10862_v29, %v13102_v38  ;;  %v6696_v14 = vcombine.high %v6694_v44, %v6694_v44  ;;  %v6710_v0 = vrot.slane %v6694_v44, %v13102_v38 }
 0x380   : > { %11373 = vst [vmem:[%s15294_s25 + $0x140] sm:$0xff] %v10805_v4  ;;  %11374 = vst [vmem:[%s15294_s25 + $0x148] sm:$0xff] %v10806_v51  ;;  %v9170_v15 = vcombine.high %v9168_v3, %v9168_v3  ;;  %v15997_v16 = vrot.slane %v9161_v36, %v13102_v38  ;;  %v16000_v56 = vrot.slane %v9168_v3, %v13102_v38 }
 0x381   : > { %v6717_v20 = vrot.slane %v6695_v42, %v13102_v38  ;;  %v6724_v62 = vrot.slane %v6696_v14, %v13102_v38  ;;  %v6725_v52 = vcombine.high %v6703_v37, %v6703_v37  ;;  %v6726_v7 = vcombine.high %v6710_v0, %v6710_v0 }
 0x382   : > { %v9451_v49 = vadd.f32 %v15681_v39, %v6703_v37  ;;  %v9455_v29 = vadd.f32 %v15690_v54, %v6710_v0  ;;  %v16007_v35 = vrot.slane %v9169_v2, %v13102_v38  ;;  %v16010_v44 = vrot.slane %v9170_v15, %v13102_v38 }
 0x383   : > { %v6727_v36 = vcombine.high %v6717_v20, %v6717_v20  ;;  %v6728_v4 = vcombine.high %v6724_v62, %v6724_v62  ;;  %v9452_v3 = vadd.f32 %v15693_v48, %v6717_v20  ;;  %v16894_v51 = vcombine.high %v15681_v39, %v15681_v39 }
 0x384   : > { %v9456_v14 = vadd.f32 %v15700_v58, %v6724_v62  ;;  %v16895_v37 = vcombine.high %v15690_v54, %v15690_v54  ;;  %v9677_v2 = vadd.f32 %v14945_v8, %v9451_v49  ;;  %v9681_v40 = vadd.f32 %v14934_v61, %v9455_v29 }
 0x385   : > { %v9453_v42 = vadd.f32 %v16894_v51, %v6725_v52  ;;  %v16896_v15 = vcombine.high %v15693_v48, %v15693_v48  ;;  %v16897_v20 = vcombine.high %v15700_v58, %v15700_v58  ;;  %v9678_v39 = vadd.f32 %v14973_v9, %v9452_v3 }
 0x386   : > { %v9457_v0 = vadd.f32 %v16895_v37, %v6726_v7  ;;  %v9682_v52 = vadd.f32 %v14942_v22, %v9456_v14  ;;  %v10831_v7 = vcombine.low %v9676_v25, %v9677_v2  ;;  %v9199_v49 = vcombine.high %v15997_v16, %v15997_v16  ;;  %v16899_v2 = vld [vmem:[#allocation33_spill] sm:$0xff] }
 0x387   : > { %v9454_v6 = vadd.f32 %v16896_v15, %v6727_v36  ;;  %v9458_v26 = vadd.f32 %v16897_v20, %v6728_v4  ;;  %v9679_v62 = vadd.f32 %v14981_v1, %v9453_v42  ;;  %v9200_v58 = vcombine.high %v16000_v56, %v16000_v56 }
 0x388   : > { %v9683_v54 = vadd.f32 %v14969_v46, %v9457_v0  ;;  %v10853_v4 = vrot.slane %v10831_v7, %v13102_v38  ;;  %v10917_v3 = vcombine.low %v9681_v40, %v9682_v52  ;;  %v9201_v51 = vcombine.high %v16007_v35, %v16007_v35  ;;  %v16900_v40 = vld [vmem:[#allocation38_spill] sm:$0xff] }
 0x389   : > { %v9680_v29 = vadd.f32 %v14959_v21, %v9454_v6  ;;  %v9684_v48 = vadd.f32 %v14977_v45, %v9458_v26  ;;  %v10832_v36 = vcombine.low %v9678_v39, %v9679_v62  ;;  %v9202_v25 = vcombine.high %v16010_v44, %v16010_v44  ;;  %v16898_v26 = vld [vmem:[#allocation34_spill] sm:$0xff]  ;;  %v16901_v39 = vld [vmem:[#allocation36_spill] sm:$0xff] }
 0x38a   : > { %v12067_v37 = vadd.f32 %v15409_v32, %v16898_v26  ;;  %v10927_v0 = vrot.slane %v10917_v3, %v13102_v38  ;;  %v12068_v15 = vadd.f32 %v15415_v18, %v16899_v2  ;;  %v12069_v20 = vadd.f32 %v15509_v13, %v16900_v40 }
 0x38b   : > { %v10860_v42 = vrot.slane %v10832_v36, %v13102_v38  ;;  %v10901_v6 = vrot.slane %v9680_v29, %v13102_v38  ;;  %v10918_v14 = vcombine.low %v9683_v54, %v9684_v48  ;;  %v12070_v62 = vadd.f32 %v15514_v24, %v16901_v39 }
 0x38c   : > { %v6729_v29 = vcombine.low %v12067_v37, %v12068_v15  ;;  %v6730_v32 = vcombine.high %v12067_v37, %v12068_v15 }
 0x38d   : > { %v10863_v52 = vcombine.low %v10853_v4, %v10860_v42  ;;  %v10864_v7 = vcombine.high %v10853_v4, %v10860_v42  ;;  %v10902_v36 = vcombine.high %v10901_v6, %v10901_v6  ;;  %v10934_v54 = vrot.slane %v10918_v14, %v13102_v38  ;;  %11850 = vst.sshfl [vmem:[%s15294_s25 + $0x170] sm:$0x1 pattern:$0x73625140] %v10901_v6 }
 0x38e   : > { %v6779_v48 = vcombine.low %v12069_v20, %v12070_v62  ;;  %v6780_v3 = vcombine.high %v12069_v20, %v12070_v62  ;;  %v6737_v24 = vrot.slane %v6729_v29, %v13102_v38  ;;  %v6744_v4 = vrot.slane %v6730_v32, %v13102_v38 }
 0x38f   : > { %v10885_v26 = vrot.slane %v10863_v52, %v13102_v38  ;;  %v10892_v18 = vrot.slane %v10864_v7, %v13102_v38  ;;  %v10949_v2 = vcombine.low %v10927_v0, %v10934_v54  ;;  %v10950_v13 = vcombine.high %v10927_v0, %v10934_v54  ;;  %11851 = vst.sshfl [vmem:[%s15294_s25 + $0x178] sm:$0x1 pattern:$0x73625140] %v10902_v36 }
 0x390   : > { %v6787_v42 = vrot.slane %v6779_v48, %v13102_v38  ;;  %v6794_v6 = vrot.slane %v6780_v3, %v13102_v38  ;;  %v6745_v0 = vcombine.high %v6737_v24, %v6737_v24  ;;  %v6746_v20 = vcombine.high %v6744_v4, %v6744_v4 }
 0x391   : > { %v10893_v14 = vcombine.low %v15987_v57, %v10885_v26  ;;  %v10894_v37 = vcombine.low %v15990_v30, %v10892_v18  ;;  %v16066_v15 = vrot.slane %v10949_v2, %v13102_v38  ;;  %v16069_v40 = vrot.slane %v10950_v13, %v13102_v38 }
 0x392   : > { %v6753_v39 = vrot.slane %v6737_v24, %v13102_v38  ;;  %v6760_v62 = vrot.slane %v6744_v4, %v13102_v38  ;;  %v6795_v52 = vcombine.high %v6787_v42, %v6787_v42  ;;  %v6796_v7 = vcombine.high %v6794_v6, %v6794_v6 }
 0x393   : > { %11377 = vst [vmem:[%s15294_s25 + $0x160] sm:$0xff] %v10893_v14  ;;  %11378 = vst [vmem:[%s15294_s25 + $0x168] sm:$0xff] %v10894_v37  ;;  %v6803_v57 = vrot.slane %v6787_v42, %v13102_v38  ;;  %v6810_v30 = vrot.slane %v6794_v6, %v13102_v38  ;;  %v6767_v36 = vrot.slane %v6745_v0, %v13102_v38 }
 0x394   : > { %v6774_v54 = vrot.slane %v6746_v20, %v13102_v38  ;;  %v6775_v29 = vcombine.high %v6753_v39, %v6753_v39  ;;  %v6776_v32 = vcombine.high %v6760_v62, %v6760_v62  ;;  %v9459_v48 = vadd.f32 %v15742_v5, %v6753_v39 }
 0x395   : > { %v9463_v3 = vadd.f32 %v15770_v28, %v6760_v62  ;;  %v6817_v26 = vrot.slane %v6795_v52, %v13102_v38  ;;  %v6824_v18 = vrot.slane %v6796_v7, %v13102_v38  ;;  %v6777_v2 = vcombine.high %v6767_v36, %v6767_v36 }
 0x396   : > { %v6778_v13 = vcombine.high %v6774_v54, %v6774_v54  ;;  %v9460_v24 = vadd.f32 %v15774_v11, %v6767_v36  ;;  %v16902_v4 = vcombine.high %v15742_v5, %v15742_v5  ;;  %v9464_v6 = vadd.f32 %v15777_v59, %v6774_v54 }
 0x397   : > { %v16903_v14 = vcombine.high %v15770_v28, %v15770_v28  ;;  %v9685_v0 = vadd.f32 %v14937_v19, %v9459_v48  ;;  %v9689_v20 = vadd.f32 %v14959_v21, %v9463_v3  ;;  %v16904_v39 = vcombine.high %v15774_v11, %v15774_v11 }
 0x398   : > { %v9461_v42 = vadd.f32 %v16902_v4, %v6775_v29  ;;  %v16905_v52 = vcombine.high %v15777_v59, %v15777_v59  ;;  %v9686_v7 = vadd.f32 %v14945_v8, %v9460_v24  ;;  %v9690_v28 = vadd.f32 %v14934_v61, %v9464_v6 }
 0x399   : > { %v9465_v37 = vadd.f32 %v16903_v14, %v6776_v32  ;;  %v9462_v62 = vadd.f32 %v16904_v39, %v6777_v2  ;;  %v10989_v29 = vrot.slane %v9689_v20, %v13102_v38  ;;  %v6825_v32 = vcombine.high %v6803_v57, %v6803_v57 }
 0x39a   : > { %v9466_v5 = vadd.f32 %v16905_v52, %v6778_v13  ;;  %v9687_v36 = vadd.f32 %v14973_v9, %v9461_v42  ;;  %v10919_v11 = vcombine.low %v9685_v0, %v9686_v7  ;;  %v6826_v3 = vcombine.high %v6810_v30, %v6810_v30 }
 0x39b   : > { %v9691_v54 = vadd.f32 %v14942_v22, %v9465_v37  ;;  %v9688_v48 = vadd.f32 %v14981_v1, %v9462_v62  ;;  %v6827_v2 = vcombine.high %v6817_v26, %v6817_v26  ;;  %v10990_v4 = vcombine.high %v10989_v29, %v10989_v29  ;;  %11852 = vst.sshfl [vmem:[%s15294_s25 + $0x190] sm:$0x1 pattern:$0x73625140] %v10989_v29 }
 0x39c   : > { %v6828_v13 = vcombine.high %v6824_v18, %v6824_v18  ;;  %v9467_v24 = vadd.f32 %v15830_v43, %v6803_v57  ;;  %v10941_v6 = vrot.slane %v10919_v11, %v13102_v38  ;;  %v9468_v14 = vadd.f32 %v15840_v60, %v6817_v26 }
 0x39d   : > { %v11005_v59 = vcombine.low %v9690_v28, %v9691_v54  ;;  %v10920_v42 = vcombine.low %v9687_v36, %v9688_v48  ;;  %v9469_v37 = vadd.f32 %v9099_v34, %v6825_v32  ;;  %11853 = vst.sshfl [vmem:[%s15294_s25 + $0x198] sm:$0x1 pattern:$0x73625140] %v10990_v4  ;;  %v9470_v0 = vadd.f32 %v9101_v63, %v6827_v2 }
 0x39e   : > { %v9471_v39 = vadd.f32 %v15837_v27, %v6810_v30  ;;  %v9472_v57 = vadd.f32 %v15867_v53, %v6824_v18  ;;  %v9473_v26 = vadd.f32 %v9100_v10, %v6826_v3  ;;  %v16906_v43 = vcombine.high %v15867_v53, %v15867_v53 }
 0x39f   : > { %v11015_v20 = vrot.slane %v11005_v59, %v13102_v38  ;;  %v10948_v62 = vrot.slane %v10920_v42, %v13102_v38  ;;  %v9692_v52 = vadd.f32 %v14969_v46, %v9466_v5  ;;  %v9693_v7 = vadd.f32 %v14977_v45, %v9467_v24  ;;  %v16907_v59 = vld [vmem:[#allocation37_spill] sm:$0xff] }
 0x3a0   : > { %v9474_v34 = vadd.f32 %v16906_v43, %v6828_v13  ;;  %v9694_v60 = vadd.f32 %v14937_v19, %v9468_v14  ;;  %v9695_v63 = vadd.f32 %v14945_v8, %v9469_v37  ;;  %v9696_v30 = vadd.f32 %v14973_v9, %v9470_v0  ;;  %v16910_v43 = vld [vmem:[#allocation39_spill] sm:$0xff] }
 0x3a1   : > { %v10951_v18 = vcombine.low %v10941_v6, %v10948_v62  ;;  %v10952_v36 = vcombine.high %v10941_v6, %v10948_v62  ;;  %v9697_v28 = vadd.f32 %v14981_v1, %v9471_v39  ;;  %v9698_v27 = vadd.f32 %v14959_v21, %v9472_v57  ;;  %v16908_v57 = vld [vmem:[#allocation43_spill] sm:$0xff] }
 0x3a2   : > { %v9699_v10 = vadd.f32 %v14934_v61, %v9473_v26  ;;  %v9700_v53 = vadd.f32 %v14942_v22, %v9474_v34  ;;  %v11006_v5 = vcombine.low %v9692_v52, %v9693_v7  ;;  %v11007_v54 = vcombine.low %v9694_v60, %v9695_v63  ;;  %v16911_v34 = vld [vmem:[#allocation13_spill] sm:$0xff] }
 0x3a3   : > { %v10973_v29 = vrot.slane %v10951_v18, %v13102_v38  ;;  %v10980_v32 = vrot.slane %v10952_v36, %v13102_v38  ;;  %v11008_v48 = vcombine.low %v9696_v30, %v9697_v28  ;;  %v11077_v11 = vrot.slane %v9698_v27, %v13102_v38  ;;  %v16912_v27 = vld [vmem:[#allocation17_spill] sm:$0xff] }
 0x3a4   : > { %v11022_v3 = vrot.slane %v11006_v5, %v13102_v38  ;;  %v11029_v2 = vrot.slane %v11007_v54, %v13102_v38  ;;  %v11093_v4 = vcombine.low %v9699_v10, %v9700_v53  ;;  %v12071_v13 = vadd.f32 %v15545_v41, %v16907_v59  ;;  %v16913_v10 = vld [vmem:[#allocation41_spill] sm:$0xff]  ;;  %v16915_v54 = vld [vmem:[#allocation42_spill] sm:$0xff] }
 0x3a5   : > { %v10981_v24 = vcombine.low %v16066_v15, %v10973_v29  ;;  %v10982_v42 = vcombine.low %v16069_v40, %v10980_v32  ;;  %v11036_v6 = vrot.slane %v11008_v48, %v13102_v38  ;;  %v11078_v14 = vcombine.high %v11077_v11, %v11077_v11  ;;  %11854 = vst.sshfl [vmem:[%s15294_s25 + $0x1b0] sm:$0x1 pattern:$0x73625140] %v11077_v11  ;;  %v16909_v15 = vld [vmem:[#allocation40_spill] sm:$0xff]  ;;  %v16914_v5 = vld [vmem:[#allocation25_spill] sm:$0xff] }
 0x3a6   : > { %v11037_v37 = vcombine.low %v11015_v20, %v11022_v3  ;;  %v11038_v0 = vcombine.high %v11015_v20, %v11022_v3  ;;  %v16147_v39 = vrot.slane %v11093_v4, %v13102_v38  ;;  %v12072_v62 = vadd.f32 %v15550_v50, %v16908_v57 }
 0x3a7   : > { %11381 = vst [vmem:[%s15294_s25 + $0x180] sm:$0xff] %v10981_v24  ;;  %11382 = vst [vmem:[%s15294_s25 + $0x188] sm:$0xff] %v10982_v42  ;;  %v11039_v26 = vcombine.low %v11029_v2, %v11036_v6  ;;  %v11040_v41 = vcombine.high %v11029_v2, %v11036_v6  ;;  %v12073_v40 = vadd.f32 %v15636_v12, %v16909_v15 }
 0x3a8   : > { %11855 = vst.sshfl [vmem:[%s15294_s25 + $0x1b8] sm:$0x1 pattern:$0x73625140] %v11078_v14  ;;  %v12074_v52 = vadd.f32 %v16911_v34, %v16910_v43  ;;  %v11047_v7 = vrot.slane %v11037_v37, %v13102_v38  ;;  %v11054_v20 = vrot.slane %v11038_v0, %v13102_v38  ;;  %v6829_v60 = vcombine.low %v12071_v13, %v12072_v62 }
 0x3a9   : > { %v6830_v63 = vcombine.high %v12071_v13, %v12072_v62  ;;  %v11061_v30 = vrot.slane %v11039_v26, %v13102_v38  ;;  %v11068_v50 = vrot.slane %v11040_v41, %v13102_v38  ;;  %v16166_v53 = vadd.f32 %v16913_v10, %v16912_v27 }
 0x3aa   : > { %v6879_v18 = vcombine.low %v12073_v40, %v12074_v52  ;;  %v6880_v36 = vcombine.high %v12073_v40, %v12074_v52  ;;  %v6837_v28 = vrot.slane %v6829_v60, %v13102_v38  ;;  %v16170_v29 = vadd.f32 %v16915_v54, %v16914_v5 }
 0x3ab   : > { %v6844_v12 = vrot.slane %v6830_v63, %v13102_v38  ;;  %v11069_v32 = vcombine.low %v11047_v7, %v11061_v30  ;;  %v11070_v48 = vcombine.low %v11054_v20, %v11068_v50  ;;  %v16916_v60 = vcombine.high %v15946_v31, %v15946_v31 }
 0x3ac   : > { %v6887_v11 = vrot.slane %v6879_v18, %v13102_v38  ;;  %v6894_v3 = vrot.slane %v6880_v36, %v13102_v38  ;;  %v6845_v2 = vcombine.high %v6837_v28, %v6837_v28  ;;  %v6853_v59 = vrot.slane %v6837_v28, %v13102_v38 }
 0x3ad   : > { %v6846_v4 = vcombine.high %v6844_v12, %v6844_v12  ;;  %v6860_v13 = vrot.slane %v6844_v12, %v13102_v38  ;;  %11385 = vst [vmem:[%s15294_s25 + $0x1a0] sm:$0xff] %v11069_v32  ;;  %11386 = vst [vmem:[%s15294_s25 + $0x1a8] sm:$0xff] %v11070_v48  ;;  %v16917_v18 = vcombine.high %v15949_v23, %v15949_v23 }
 0x3ae   : > { %v6895_v24 = vcombine.high %v6887_v11, %v6887_v11  ;;  %v6896_v42 = vcombine.high %v6894_v3, %v6894_v3  ;;  %v6903_v6 = vrot.slane %v6887_v11, %v13102_v38  ;;  %v6910_v14 = vrot.slane %v6894_v3, %v13102_v38 }
 0x3af   : > { %v6867_v37 = vrot.slane %v6845_v2, %v13102_v38  ;;  %v6874_v0 = vrot.slane %v6846_v4, %v13102_v38  ;;  %v6875_v57 = vcombine.high %v6853_v59, %v6853_v59  ;;  %v6876_v62 = vcombine.high %v6860_v13, %v6860_v13 }
 0x3b0   : > { %v9475_v26 = vadd.f32 %v15941_v47, %v6853_v59  ;;  %v9479_v41 = vadd.f32 %v15946_v31, %v6860_v13  ;;  %v6917_v15 = vrot.slane %v6895_v24, %v13102_v38  ;;  %v6924_v40 = vrot.slane %v6896_v42, %v13102_v38 }
 0x3b1   : > { %v6877_v43 = vcombine.high %v6867_v37, %v6867_v37  ;;  %v6878_v34 = vcombine.high %v6874_v0, %v6874_v0  ;;  %v9476_v52 = vadd.f32 %v15949_v23, %v6867_v37  ;;  %v9477_v7 = vadd.f32 %v9149_v55, %v6875_v57 }
 0x3b2   : > { %v9480_v20 = vadd.f32 %v15952_v33, %v6874_v0  ;;  %v9481_v63 = vadd.f32 %v16916_v60, %v6876_v62  ;;  %v9701_v30 = vadd.f32 %v14969_v46, %v9475_v26  ;;  %v9705_v50 = vadd.f32 %v14973_v9, %v9479_v41 }
 0x3b3   : > { %v9478_v36 = vadd.f32 %v16917_v18, %v6877_v43  ;;  %v16918_v28 = vcombine.high %v15952_v33, %v15952_v33  ;;  %v9702_v47 = vadd.f32 %v14977_v45, %v9476_v52  ;;  %v9703_v55 = vadd.f32 %v14937_v19, %v9477_v7 }
 0x3b4   : > { %v9706_v27 = vadd.f32 %v14981_v1, %v9480_v20  ;;  %v9707_v31 = vadd.f32 %v14959_v21, %v9481_v63  ;;  %v6925_v10 = vcombine.high %v6903_v6, %v6903_v6  ;;  %v6926_v5 = vcombine.high %v6910_v14, %v6910_v14 }
 0x3b5   : > { %v9482_v12 = vadd.f32 %v16918_v28, %v6878_v34  ;;  %v9704_v54 = vadd.f32 %v14945_v8, %v9478_v36  ;;  %v11094_v32 = vcombine.low %v9701_v30, %v9702_v47  ;;  %v6927_v23 = vcombine.high %v6917_v15, %v6917_v15 }
 0x3b6   : > { %v6928_v48 = vcombine.high %v6924_v40, %v6924_v40  ;;  %v11096_v11 = vcombine.low %v9705_v50, %v9706_v27  ;;  %v11165_v33 = vrot.slane %v9707_v31, %v13102_v38  ;;  %v9483_v3 = vadd.f32 %v15997_v16, %v6903_v6 }
 0x3b7   : > { %v9484_v2 = vadd.f32 %v16007_v35, %v6917_v15  ;;  %v11095_v4 = vcombine.low %v9703_v55, %v9704_v54  ;;  %v11110_v59 = vrot.slane %v11094_v32, %v13102_v38  ;;  %v9485_v13 = vadd.f32 %v9199_v49, %v6925_v10  ;;  %v16919_v54 = vld [vmem:[#allocation19_spill] sm:$0xff]  ;;  %v16920_v32 = vld [vmem:[#allocation30_spill] sm:$0xff] }
 0x3b8   : > { %v9486_v24 = vadd.f32 %v9201_v51, %v6927_v23  ;;  %v11124_v42 = vrot.slane %v11096_v11, %v13102_v38  ;;  %v11166_v37 = vcombine.high %v11165_v33, %v11165_v33  ;;  %11856 = vst.sshfl [vmem:[%s15294_s25 + $0x1d0] sm:$0x1 pattern:$0x73625140] %v11165_v33  ;;  %v9487_v0 = vadd.f32 %v16000_v56, %v6910_v14 }
 0x3b9   : > { %v9488_v6 = vadd.f32 %v16010_v44, %v6924_v40  ;;  %v11117_v57 = vrot.slane %v11095_v4, %v13102_v38  ;;  %v11125_v62 = vcombine.low %v16147_v39, %v11110_v59  ;;  %v11126_v26 = vcombine.high %v16147_v39, %v11110_v59 }
 0x3ba   : > { %v9489_v16 = vadd.f32 %v9200_v58, %v6926_v5  ;;  %11857 = vst.sshfl [vmem:[%s15294_s25 + $0x1d8] sm:$0x1 pattern:$0x73625140] %v11166_v37  ;;  %v9490_v35 = vadd.f32 %v9202_v25, %v6928_v48  ;;  %v9708_v49 = vadd.f32 %v14934_v61, %v9482_v12  ;;  %v9709_v51 = vadd.f32 %v14942_v22, %v9483_v3  ;;  %v16921_v3 = vld [vmem:[#allocation21_spill] sm:$0xff] }
 0x3bb   : > { %v9710_v14 = vadd.f32 %v14969_v46, %v9484_v2  ;;  %v11127_v41 = vcombine.low %v11117_v57, %v11124_v42  ;;  %v11128_v15 = vcombine.high %v11117_v57, %v11124_v42  ;;  %v11135_v40 = vrot.slane %v11125_v62, %v13102_v38  ;;  %v16922_v2 = vld [vmem:[#allocation44_spill] sm:$0xff] }
 0x3bc   : > { %v11142_v39 = vrot.slane %v11126_v26, %v13102_v38  ;;  %v9711_v56 = vadd.f32 %v14977_v45, %v9485_v13  ;;  %v9712_v58 = vadd.f32 %v14937_v19, %v9486_v24  ;;  %v9713_v43 = vadd.f32 %v14945_v8, %v9487_v0 }
 0x3bd   : > { %v9714_v44 = vadd.f32 %v14973_v9, %v9488_v6  ;;  %v11149_v25 = vrot.slane %v11127_v41, %v13102_v38  ;;  %v11156_v34 = vrot.slane %v11128_v15, %v13102_v38  ;;  %v9715_v52 = vadd.f32 %v14981_v1, %v9489_v16 }
 0x3be   : > { %v9716_v7 = vadd.f32 %v14959_v21, %v9490_v35  ;;  %v11181_v20 = vcombine.low %v9708_v49, %v9709_v51  ;;  %v11182_v60 = vcombine.low %v9710_v14, %v9711_v56  ;;  %v11183_v63 = vcombine.low %v9712_v58, %v9713_v43  ;;  %v16923_v49 = vld [vmem:[#allocation50_spill] sm:$0xff]  ;;  %v16924_v14 = vld [vmem:[#allocation51_spill] sm:$0xff]  ;;  %v16925_v56 = vld [vmem:[#allocation52_spill] sm:$0xff] }
 0x3bf   : > { %v8303_v30 = vcombine.low %v16166_v53, %v16170_v29  ;;  %v11157_v50 = vcombine.low %v11135_v40, %v11149_v25  ;;  %v11158_v18 = vcombine.low %v11142_v39, %v11156_v34  ;;  %v11184_v36 = vcombine.low %v9714_v44, %v9715_v52  ;;  %v16927_v34 = vld [vmem:[#allocation49_spill] sm:$0xff] }
 0x3c0   : > { %v11253_v28 = vrot.slane %v9716_v7, %v13102_v38  ;;  %v11191_v12 = vrot.slane %v11181_v20, %v13102_v38  ;;  %v11198_v47 = vrot.slane %v11182_v60, %v13102_v38  ;;  %v11205_v55 = vrot.slane %v11183_v63, %v13102_v38 }
 0x3c1   : > { %v8304_v27 = vcombine.high %v16166_v53, %v16170_v29  ;;  %11389 = vst [vmem:[%s15294_s25 + $0x1c0] sm:$0xff] %v11157_v50  ;;  %11390 = vst [vmem:[%s15294_s25 + $0x1c8] sm:$0xff] %v11158_v18  ;;  %v11212_v31 = vrot.slane %v11184_v36, %v13102_v38  ;;  %v8311_v5 = vrot.slane %v8303_v30, %v13102_v38 }
 0x3c2   : > { %v11254_v10 = vcombine.high %v11253_v28, %v11253_v28  ;;  %11858 = vst.sshfl [vmem:[%s15294_s25 + $0x1f0] sm:$0x1 pattern:$0x73625140] %v11253_v28  ;;  %v8183_v23 = vadd.f32 %v16920_v32, %v16919_v54  ;;  %v11213_v48 = vcombine.low %v11191_v12, %v11198_v47  ;;  %v11214_v11 = vcombine.high %v11191_v12, %v11198_v47 }
 0x3c3   : > { %v8318_v33 = vrot.slane %v8304_v27, %v13102_v38  ;;  %v8185_v4 = vadd.f32 %v16922_v2, %v16921_v3  ;;  %v11215_v59 = vcombine.low %v11205_v55, %v11212_v31  ;;  %v11216_v53 = vcombine.high %v11205_v55, %v11212_v31  ;;  %v16933_v3 = vld [vmem:[#allocation26_spill] sm:$0xff]  ;;  %v16934_v2 = vld [vmem:[#allocation48_spill] sm:$0xff] }
 0x3c4   : > { %11859 = vst.sshfl [vmem:[%s15294_s25 + $0x1f8] sm:$0x1 pattern:$0x73625140] %v11254_v10  ;;  %v8319_v29 = vcombine.high %v8311_v5, %v8311_v5  ;;  %v8327_v13 = vrot.slane %v8311_v5, %v13102_v38  ;;  %v11223_v24 = vrot.slane %v11213_v48, %v13102_v38  ;;  %v11230_v42 = vrot.slane %v11214_v11, %v13102_v38  ;;  %v16931_v48 = vld [vmem:[#allocation18_spill] sm:$0xff] }
 0x3c5   : > { %v8320_v37 = vcombine.high %v8318_v33, %v8318_v33  ;;  %v8334_v0 = vrot.slane %v8318_v33, %v13102_v38  ;;  %v11237_v6 = vrot.slane %v11215_v59, %v13102_v38  ;;  %v11244_v57 = vrot.slane %v11216_v53, %v13102_v38  ;;  %v16932_v11 = vld [vmem:[#allocation46_spill] sm:$0xff] }
 0x3c6   : > { %v8341_v62 = vrot.slane %v8319_v29, %v13102_v38  ;;  %v8349_v26 = vcombine.high %v8327_v13, %v8327_v13  ;;  %v9347_v51 = vadd.f32 %v8327_v13, %v16923_v49  ;;  %v16926_v44 = vcombine.high %v16923_v49, %v16923_v49 }
 0x3c7   : > { %v8348_v16 = vrot.slane %v8320_v37, %v13102_v38  ;;  %v8350_v35 = vcombine.high %v8334_v0, %v8334_v0  ;;  %v9351_v41 = vadd.f32 %v8334_v0, %v16924_v14  ;;  %v11245_v15 = vcombine.low %v11223_v24, %v11237_v6 }
 0x3c8   : > { %v11246_v40 = vcombine.low %v11230_v42, %v11244_v57  ;;  %v8351_v39 = vcombine.high %v8341_v62, %v8341_v62  ;;  %v9348_v58 = vadd.f32 %v8341_v62, %v16925_v56  ;;  %v9349_v25 = vadd.f32 %v8349_v26, %v16926_v44 }
 0x3c9   : > { %v8352_v43 = vcombine.high %v8348_v16, %v8348_v16  ;;  %v9352_v52 = vadd.f32 %v8348_v16, %v16927_v34  ;;  %v16928_v7 = vcombine.high %v16924_v14, %v16924_v14  ;;  %11393 = vst [vmem:[%s15294_s25 + $0x1e0] sm:$0xff] %v11245_v15  ;;  %v16929_v60 = vcombine.high %v16925_v56, %v16925_v56 }
 0x3ca   : > { %11394 = vst [vmem:[%s15294_s25 + $0x1e8] sm:$0xff] %v11246_v40  ;;  %v9573_v30 = vadd.f32 %v14934_v61, %v9347_v51  ;;  %v9574_v50 = vadd.f32 %v14942_v22, %v9348_v58  ;;  %v9577_v18 = vadd.f32 %v14937_v19, %v9351_v41  ;;  %v16930_v36 = vcombine.high %v16927_v34, %v16927_v34 }
 0x3cb   : > { %v9353_v20 = vadd.f32 %v8350_v35, %v16928_v7  ;;  %v9350_v63 = vadd.f32 %v8351_v39, %v16929_v60  ;;  %v9575_v12 = vadd.f32 %v14969_v46, %v9349_v25  ;;  %v9578_v47 = vadd.f32 %v14945_v8, %v9352_v52 }
 0x3cc   : > { %v9354_v28 = vadd.f32 %v8352_v43, %v16930_v36  ;;  %v9861_v31 = vcombine.low %v9573_v30, %v9574_v50  ;;  %v8353_v10 = vcombine.low %v8183_v23, %v8185_v4  ;;  %v8354_v5 = vcombine.high %v8183_v23, %v8185_v4 }
 0x3cd   : > { %v9579_v55 = vadd.f32 %v14973_v9, %v9353_v20  ;;  %v9576_v27 = vadd.f32 %v14977_v45, %v9350_v63  ;;  %v9863_v32 = vcombine.low %v9577_v18, %v9578_v47  ;;  %v8189_v33 = vadd.f32 %v16932_v11, %v16931_v48  ;;  %v16935_v20 = vld [vmem:[#allocation45_spill] sm:$0xff]  ;;  %v16936_v63 = vld [vmem:[#allocation8_spill] sm:$0xff] }
 0x3ce   : > { %v9580_v54 = vadd.f32 %v14981_v1, %v9354_v28  ;;  %v8191_v59 = vadd.f32 %v16934_v2, %v16933_v3  ;;  %v9871_v29 = vrot.slane %v9861_v31, %v13102_v38  ;;  %v8361_v13 = vrot.slane %v8353_v10, %v13102_v38 }
 0x3cf   : > { %v9862_v53 = vcombine.low %v9575_v12, %v9576_v27  ;;  %v8368_v24 = vrot.slane %v8354_v5, %v13102_v38  ;;  %v9885_v37 = vrot.slane %v9863_v32, %v13102_v38  ;;  %v16937_v50 = vcombine.high %v16935_v20, %v16935_v20  ;;  %v16939_v12 = vld [vmem:[#allocation6_spill] sm:$0xff] }
 0x3d0   : > { %v9864_v42 = vcombine.low %v9579_v55, %v9580_v54  ;;  %v8403_v23 = vcombine.low %v8189_v33, %v8191_v59  ;;  %v8404_v4 = vcombine.high %v8189_v33, %v8191_v59  ;;  %v8369_v6 = vcombine.high %v8361_v13, %v8361_v13  ;;  %v16940_v55 = vld [vmem:[#allocation7_spill] sm:$0xff] }
 0x3d1   : > { %v9878_v0 = vrot.slane %v9862_v53, %v13102_v38  ;;  %v8370_v57 = vcombine.high %v8368_v24, %v8368_v24  ;;  %v8377_v62 = vrot.slane %v8361_v13, %v13102_v38  ;;  %v8384_v16 = vrot.slane %v8368_v24, %v13102_v38 }
 0x3d2   : > { %v9892_v26 = vrot.slane %v9864_v42, %v13102_v38  ;;  %v8411_v35 = vrot.slane %v8403_v23, %v13102_v38  ;;  %v8418_v49 = vrot.slane %v8404_v4, %v13102_v38  ;;  %v8391_v41 = vrot.slane %v8369_v6, %v13102_v38 }
 0x3d3   : > { %v9893_v51 = vcombine.low %v9871_v29, %v9878_v0  ;;  %v9894_v14 = vcombine.high %v9871_v29, %v9878_v0  ;;  %v8398_v15 = vrot.slane %v8370_v57, %v13102_v38  ;;  %v8399_v56 = vcombine.high %v8377_v62, %v8377_v62 }
 0x3d4   : > { %v9895_v40 = vcombine.low %v9885_v37, %v9892_v26  ;;  %v9896_v39 = vcombine.high %v9885_v37, %v9892_v26  ;;  %v8400_v58 = vcombine.high %v8384_v16, %v8384_v16  ;;  %v8401_v25 = vcombine.high %v8391_v41, %v8391_v41 }
 0x3d5   : > { %v9903_v43 = vrot.slane %v9893_v51, %v13102_v38  ;;  %v9910_v44 = vrot.slane %v9894_v14, %v13102_v38  ;;  %v8402_v34 = vcombine.high %v8398_v15, %v8398_v15  ;;  %v9355_v60 = vadd.f32 %v8377_v62, %v16935_v20  ;;  %v16943_v62 = vld [vmem:[#allocation4_spill] sm:$0xff] }
 0x3d6   : > { %v9917_v52 = vrot.slane %v9895_v40, %v13102_v38  ;;  %v9924_v7 = vrot.slane %v9896_v39, %v13102_v38  ;;  %v9356_v30 = vadd.f32 %v8391_v41, %v16936_v63  ;;  %v9357_v18 = vadd.f32 %v8399_v56, %v16937_v50  ;;  %v16944_v56 = vld [vmem:[#allocation11_spill] sm:$0xff] }
 0x3d7   : > { %v16938_v36 = vcombine.high %v16936_v63, %v16936_v63  ;;  %v9359_v47 = vadd.f32 %v8384_v16, %v16939_v12  ;;  %v9360_v27 = vadd.f32 %v8398_v15, %v16940_v55  ;;  %v16941_v5 = vcombine.high %v16939_v12, %v16939_v12 }
 0x3d8   : > { %v9925_v31 = vcombine.low %v9903_v43, %v9917_v52  ;;  %v9926_v10 = vcombine.low %v9910_v44, %v9924_v7  ;;  %v16942_v32 = vcombine.high %v16940_v55, %v16940_v55  ;;  %v9581_v11 = vadd.f32 %v14959_v21, %v9355_v60  ;;  %v16948_v60 = vld [vmem:[#allocation9_spill] sm:$0xff] }
 0x3d9   : > { %v9358_v28 = vadd.f32 %v8401_v25, %v16938_v36  ;;  %v9361_v54 = vadd.f32 %v8400_v58, %v16941_v5  ;;  %v9582_v33 = vadd.f32 %v14934_v61, %v9356_v30  ;;  %v9583_v3 = vadd.f32 %v14942_v22, %v9357_v18  ;;  %v16945_v58 = vld [vmem:[#allocation12_spill] sm:$0xff]  ;;  %v16949_v30 = vld [vmem:[#allocation22_spill] sm:$0xff]  ;;  %v16950_v18 = vld [vmem:[#allocation23_spill] sm:$0xff] }
 0x3da   : > { %v9362_v48 = vadd.f32 %v8402_v34, %v16942_v32  ;;  %11333 = vst [vmem:[%s15294_s25] sm:$0xff] %v9925_v31  ;;  %11334 = vst [vmem:[%s15294_s25 + $0x8] sm:$0xff] %v9926_v10  ;;  %v9585_v59 = vadd.f32 %v14977_v45, %v9359_v47  ;;  %v9586_v53 = vadd.f32 %v14937_v19, %v9360_v27 }
 0x3db   : > { %v9584_v2 = vadd.f32 %v14969_v46, %v9358_v28  ;;  %v9587_v29 = vadd.f32 %v14945_v8, %v9361_v54  ;;  %v8419_v13 = vcombine.high %v8411_v35, %v8411_v35  ;;  %v9933_v24 = vrot.slane %v9581_v11, %v13102_v38 }
 0x3dc   : > { %v9949_v42 = vcombine.low %v9582_v33, %v9583_v3  ;;  %v8420_v37 = vcombine.high %v8418_v49, %v8418_v49  ;;  %v8427_v23 = vrot.slane %v8411_v35, %v13102_v38  ;;  %v8434_v6 = vrot.slane %v8418_v49, %v13102_v38 }
 0x3dd   : > { %v9950_v4 = vcombine.low %v9584_v2, %v9585_v59  ;;  %v9951_v0 = vcombine.low %v9586_v53, %v9587_v29  ;;  %v8441_v57 = vrot.slane %v8419_v13, %v13102_v38  ;;  %v6196_v26 = vcombine.high %v16943_v62, %v16943_v62  ;;  %11828 = vst.sshfl [vmem:[%s15294_s25 + $0x10] sm:$0x1 pattern:$0x73625140] %v9933_v24  ;;  %v16953_v13 = vld [vmem:[#allocation20_spill] sm:$0xff] }
 0x3de   : > { %v9934_v16 = vcombine.high %v9933_v24, %v9933_v24  ;;  %v8448_v51 = vrot.slane %v8420_v37, %v13102_v38  ;;  %v8449_v14 = vcombine.high %v8427_v23, %v8427_v23  ;;  %v9959_v41 = vrot.slane %v9949_v42, %v13102_v38  ;;  %v16954_v24 = vld [vmem:[#allocation47_spill] sm:$0xff]  ;;  %v16955_v37 = vld [vmem:[#allocation28_spill] sm:$0xff] }
 0x3df   : > { %v9966_v15 = vrot.slane %v9950_v4, %v13102_v38  ;;  %v8450_v40 = vcombine.high %v8434_v6, %v8434_v6  ;;  %v8451_v35 = vcombine.high %v8441_v57, %v8441_v57  ;;  %v9363_v49 = vadd.f32 %v8427_v23, %v16944_v56 }
 0x3e0   : > { %11829 = vst.sshfl [vmem:[%s15294_s25 + $0x18] sm:$0x1 pattern:$0x73625140] %v9934_v16  ;;  %v8452_v39 = vcombine.high %v8448_v51, %v8448_v51  ;;  %v9364_v43 = vadd.f32 %v8441_v57, %v16945_v58  ;;  %v16946_v44 = vcombine.high %v16944_v56, %v16944_v56  ;;  %v16947_v7 = vcombine.high %v16945_v58, %v16945_v58 }
 0x3e1   : > { %v9981_v34 = vcombine.low %v9959_v41, %v9966_v15  ;;  %v9982_v52 = vcombine.high %v9959_v41, %v9966_v15  ;;  %v9367_v63 = vadd.f32 %v8434_v6, %v16948_v60  ;;  %v16364_v50 = vrot.slane %v16949_v30, %v13102_v38 }
 0x3e2   : > { %v9365_v25 = vadd.f32 %v8449_v14, %v16946_v44  ;;  %v9366_v20 = vadd.f32 %v8451_v35, %v16947_v7  ;;  %v9368_v36 = vadd.f32 %v8448_v51, %v16950_v18  ;;  %v16951_v28 = vcombine.high %v16948_v60, %v16948_v60 }
 0x3e3   : > { %v16952_v47 = vcombine.high %v16950_v18, %v16950_v18  ;;  %v6210_v27 = vrot.slane %v16943_v62, %v13102_v38  ;;  %v9588_v31 = vadd.f32 %v14973_v9, %v9362_v48  ;;  %v9589_v10 = vadd.f32 %v14981_v1, %v9363_v49 }
 0x3e4   : > { %v9369_v12 = vadd.f32 %v8450_v40, %v16951_v28  ;;  %v9590_v5 = vadd.f32 %v14959_v21, %v9364_v43  ;;  %v9591_v54 = vadd.f32 %v14934_v61, %v9365_v25  ;;  %v9592_v32 = vadd.f32 %v14942_v22, %v9366_v20 }
 0x3e5   : > { %v9370_v55 = vadd.f32 %v8452_v39, %v16952_v47  ;;  %v9593_v11 = vadd.f32 %v14969_v46, %v9367_v63  ;;  %v9594_v33 = vadd.f32 %v14977_v45, %v9368_v36  ;;  %v9952_v59 = vcombine.low %v9588_v31, %v9589_v10 }
 0x3e6   : > { %v9595_v3 = vadd.f32 %v14937_v19, %v9369_v12  ;;  %v10021_v48 = vrot.slane %v9590_v5, %v13102_v38  ;;  %v10037_v53 = vcombine.low %v9591_v54, %v9592_v32  ;;  %v8193_v42 = vadd.f32 %v16954_v24, %v16953_v13  ;;  %v16957_v24 = vld [vmem:[#allocation2_spill] sm:$0xff] }
 0x3e7   : > { %v9596_v2 = vadd.f32 %v14945_v8, %v9370_v55  ;;  %v10038_v29 = vcombine.low %v9593_v11, %v9594_v33  ;;  %v8195_v23 = vadd.f32 %v16955_v37, %v15848_v17  ;;  %v9973_v4 = vrot.slane %v9951_v0, %v13102_v38 }
 0x3e8   : > { %v9980_v6 = vrot.slane %v9952_v59, %v13102_v38  ;;  %v10022_v57 = vcombine.high %v10021_v48, %v10021_v48  ;;  %11830 = vst.sshfl [vmem:[%s15294_s25 + $0x30] sm:$0x1 pattern:$0x73625140] %v10021_v48  ;;  %v10047_v16 = vrot.slane %v10037_v53, %v13102_v38  ;;  %v16956_v15 = vcombine.high %v16949_v30, %v16949_v30 }
 0x3e9   : > { %v10039_v62 = vcombine.low %v9595_v3, %v9596_v2  ;;  %v10054_v51 = vrot.slane %v10038_v29, %v13102_v38  ;;  %v8453_v14 = vcombine.low %v8193_v42, %v8195_v23  ;;  %v8454_v41 = vcombine.high %v8193_v42, %v8195_v23 }
 0x3ea   : > { %v6217_v40 = vrot.slane %v16956_v15, %v13102_v38  ;;  %v6224_v17 = vrot.slane %v6196_v26, %v13102_v38  ;;  %v9983_v35 = vcombine.low %v9973_v4, %v9980_v6  ;;  %v9984_v0 = vcombine.high %v9973_v4, %v9980_v6  ;;  %11831 = vst.sshfl [vmem:[%s15294_s25 + $0x38] sm:$0x1 pattern:$0x73625140] %v10022_v57  ;;  %v16959_v15 = vld [vmem:[#allocation56_spill] sm:$0xff] }
 0x3eb   : > { %v10069_v39 = vcombine.low %v10047_v16, %v10054_v51  ;;  %v10070_v56 = vcombine.high %v10047_v16, %v10054_v51  ;;  %v8461_v49 = vrot.slane %v8453_v14, %v13102_v38  ;;  %v8468_v58 = vrot.slane %v8454_v41, %v13102_v38  ;;  %v16958_v41 = vld [vmem:[#allocation55_spill] sm:$0xff] }
 0x3ec   : > { %v9991_v43 = vrot.slane %v9981_v34, %v13102_v38  ;;  %v9998_v44 = vrot.slane %v9982_v52, %v13102_v38  ;;  %v10005_v25 = vrot.slane %v9983_v35, %v13102_v38  ;;  %v10012_v7 = vrot.slane %v9984_v0, %v13102_v38 }
 0x3ed   : > { %v6225_v26 = vcombine.high %v16364_v50, %v16364_v50  ;;  %v6226_v20 = vcombine.high %v6210_v27, %v6210_v27  ;;  %v8469_v60 = vcombine.high %v8461_v49, %v8461_v49  ;;  %v8470_v63 = vcombine.high %v8468_v58, %v8468_v58 }
 0x3ee   : > { %v10013_v30 = vcombine.low %v9991_v43, %v10005_v25  ;;  %v10014_v18 = vcombine.low %v9998_v44, %v10012_v7  ;;  %v8477_v36 = vrot.slane %v8461_v49, %v13102_v38  ;;  %v8484_v34 = vrot.slane %v8468_v58, %v13102_v38 }
 0x3ef   : > { %v6227_v28 = vcombine.high %v6217_v40, %v6217_v40  ;;  %v6228_v12 = vcombine.high %v6224_v17, %v6224_v17  ;;  %v8491_v52 = vrot.slane %v8469_v60, %v13102_v38  ;;  %v8498_v47 = vrot.slane %v8470_v63, %v13102_v38 }
 0x3f0   : > { %11337 = vst [vmem:[%s15294_s25 + $0x20] sm:$0xff] %v10013_v30  ;;  %11338 = vst [vmem:[%s15294_s25 + $0x28] sm:$0xff] %v10014_v18  ;;  %v8499_v55 = vcombine.high %v8477_v36, %v8477_v36  ;;  %v8500_v31 = vcombine.high %v8484_v34, %v8484_v34  ;;  %v9371_v10 = vadd.f32 %v8477_v36, %v16364_v50 }
 0x3f1   : > { %v9375_v5 = vadd.f32 %v8484_v34, %v6210_v27  ;;  %v8501_v54 = vcombine.high %v8491_v52, %v8491_v52  ;;  %v8502_v32 = vcombine.high %v8498_v47, %v8498_v47  ;;  %v9372_v11 = vadd.f32 %v8491_v52, %v6217_v40 }
 0x3f2   : > { %v9376_v33 = vadd.f32 %v8498_v47, %v6224_v17  ;;  %v9373_v3 = vadd.f32 %v8499_v55, %v6225_v26  ;;  %v9377_v2 = vadd.f32 %v8500_v31, %v6226_v20  ;;  %v9597_v59 = vadd.f32 %v14973_v9, %v9371_v10 }
 0x3f3   : > { %v9374_v48 = vadd.f32 %v8501_v54, %v6227_v28  ;;  %v9378_v53 = vadd.f32 %v8502_v32, %v6228_v12  ;;  %v9598_v29 = vadd.f32 %v14981_v1, %v9372_v11  ;;  %v9605_v42 = vadd.f32 %v14945_v8, %v16957_v24 }
 0x3f4   : > { %v9602_v13 = vadd.f32 %v14969_v46, %v9376_v33  ;;  %v10061_v50 = vrot.slane %v10039_v62, %v13102_v38  ;;  %v9599_v27 = vadd.f32 %v14959_v21, %v9373_v3  ;;  %v9603_v37 = vadd.f32 %v14977_v45, %v9377_v2 }
 0x3f5   : > { %v9600_v23 = vadd.f32 %v14934_v61, %v9374_v48  ;;  %v9601_v9 = vadd.f32 %v14942_v22, %v9375_v5  ;;  %v9604_v4 = vadd.f32 %v14937_v19, %v9378_v53  ;;  %v10040_v6 = vcombine.low %v9597_v59, %v9598_v29 }
 0x3f6   : > { %v10109_v46 = vrot.slane %v9599_v27, %v13102_v38  ;;  %v10126_v1 = vcombine.low %v9602_v13, %v9603_v37  ;;  %v10079_v16 = vrot.slane %v10069_v39, %v13102_v38  ;;  %v10086_v21 = vrot.slane %v10070_v56, %v13102_v38 }
 0x3f7   : > { %v10068_v8 = vrot.slane %v10040_v6, %v13102_v38  ;;  %v10125_v57 = vcombine.low %v9600_v23, %v9601_v9  ;;  %v10127_v62 = vcombine.low %v9604_v4, %v9605_v42  ;;  %v16960_v40 = vcombine.low %v16958_v41, %v16959_v15 }
 0x3f8   : > { %v10110_v45 = vcombine.high %v10109_v46, %v10109_v46  ;;  %v10142_v61 = vrot.slane %v10126_v1, %v13102_v38  ;;  %11832 = vst.sshfl [vmem:[%s15294_s25 + $0x50] sm:$0x1 pattern:$0x73625140] %v10109_v46 }
 0x3f9   : > { %v10071_v22 = vcombine.low %v10061_v50, %v10068_v8  ;;  %v10072_v51 = vcombine.high %v10061_v50, %v10068_v8  ;;  %v10135_v19 = vrot.slane %v10125_v57, %v13102_v38  ;;  %v10149_v14 = vrot.slane %v10127_v62, %v13102_v38 }
 0x3fa   : > { %v10156_v17 = vrot.slane %v16960_v40, %v13102_v38  ;;  %11833 = vst.sshfl [vmem:[%s15294_s25 + $0x58] sm:$0x1 pattern:$0x73625140] %v10110_v45 }
 0x3fb   : > { %v10093_v35 = vrot.slane %v10071_v22, %v13102_v38  ;;  %v10100_v0 = vrot.slane %v10072_v51, %v13102_v38  ;;  %v10157_v39 = vcombine.low %v10135_v19, %v10142_v61  ;;  %v10158_v56 = vcombine.high %v10135_v19, %v10142_v61 }
 0x3fc   : > { %v10159_v49 = vcombine.low %v10149_v14, %v10156_v17  ;;  %v10160_v58 = vcombine.high %v10149_v14, %v10156_v17 }
 0x3fd   : > { %v10101_v43 = vcombine.low %v10079_v16, %v10093_v35  ;;  %v10102_v44 = vcombine.low %v10086_v21, %v10100_v0  ;;  %v10167_v25 = vrot.slane %v10157_v39, %v13102_v38  ;;  %v10174_v7 = vrot.slane %v10158_v56, %v13102_v38 }
 0x3fe   : > { %v10181_v26 = vrot.slane %v10159_v49, %v13102_v38  ;;  %v10188_v20 = vrot.slane %v10160_v58, %v13102_v38 }
 0x3ff   : > { %11341 = vst [vmem:[%s15294_s25 + $0x40] sm:$0xff] %v10101_v43  ;;  %11342 = vst [vmem:[%s15294_s25 + $0x48] sm:$0xff] %v10102_v44 }
 0x400   : > { %v10189_v60 = vcombine.low %v10167_v25, %v10181_v26  ;;  %v10190_v63 = vcombine.low %v10174_v7, %v10188_v20 }
 0x402   : > { %11345 = vst [vmem:[%s15294_s25 + $0x60] sm:$0xff] %v10189_v60  ;;  %11346 = vst [vmem:[%s15294_s25 + $0x68] sm:$0xff] %v10190_v63 }
 0x403 PF: > { %s14_s15 = sadd.s32 1, %s12492_s15  }
 0x404   : > { %p11_p4 = scmp.ge.s32.totalorder %s14_s15, 4  }
 0x406   :  { %13 = sbr.rel (!%p11_p4) target bundleno = 1 (0x1), region = 66 }

</bundles_post_ra>
